<compile_context>
chip_gen: v7x
topology: tpu7x:2x2x1
jax: 0.10.0
libtpu: 0.0.40
codegen_flags: <defaults>
</compile_context>

<pallas_src>
import jax
import jax.numpy as jnp
import numpy as np
from jax import lax
from jax.experimental import pallas as pl
from jax.experimental.pallas import tpu as pltpu


# ----------------------------- Pallas kernels ------------------------------ #

def fused_conv_kernel(pat_ref, w1_ref, b1_ref, w2_ref, b2_ref, h2_ref):
    """Fused conv1+relu+pool2 -> conv2+relu+pool2 for G images.

    pat_ref: (G*640, 32) bf16  conv1 im2col rows: per image 4 pool phases x
                               (4 parity blocks x 40 rows), cols = 25 taps + pad.
    w1_ref : (32, 32)    bf16  conv1 weight, rows (ki,kj) padded 25->32.
    b1_ref : (1, 32)     f32
    w2_ref : (800, 64)   bf16  conv2 weight, rows (ki*5+kj)*32 + ci.
    b2_ref : (1, 64)     f32
    h2_ref : (G, 24, 64) bf16  pooled conv2 activations; valid rows m: m%6<4, m<22.
    """
    G = h2_ref.shape[0]

    # ---- conv1 (+ its maxpool) : one GEMM over 4*160 rows/img, phase-max ----
    # conv1 is LHS-feed / epilogue bound (K=32 << MXU depth), not MXU bound.
    y1 = jnp.dot(pat_ref[...], w1_ref[...], preferred_element_type=jnp.float32)
    y1 = jnp.max(y1.reshape(G, 4, 160, 32), axis=1)            # pool over 4 phases
    h1 = jnp.maximum(y1 + b1_ref[...], 0.0)                    # (G,160,32) f32, parity-split

    # ---- conv2 (+ its maxpool): accumulate 25 taps on the VMEM-resident h1 ----
    w2b = jnp.broadcast_to(w2_ref[...].reshape(25, 32, 64)[None], (G, 25, 32, 64))
    acc = None
    for ki in range(5):
        for kj in range(5):
            parts = []
            for a in (0, 1):                                   # conv2 pool phase rows
                for b in (0, 1):
                    pr, pc = (a + ki) % 2, (b + kj) % 2
                    off = (pr * 2 + pc) * 40 + ((a + ki) // 2) * 6 + ((b + kj) // 2)
                    parts.append(h1[:, off:off + 24, :])       # contiguous 24-row window
            lhs = jnp.concatenate(parts, axis=1).astype(jnp.bfloat16)   # (G,96,32)
            term = jnp.einsum('gmk,gkn->gmn', lhs, w2b[:, ki * 5 + kj],
                              preferred_element_type=jnp.float32)        # (G,96,64)
            acc = term if acc is None else acc + term
    y2 = jnp.max(acc.reshape(G, 4, 24, 64), axis=1)            # pool over 4 phases
    h2_ref[...] = jnp.maximum(y2 + b2_ref[...], 0.0).astype(h2_ref.dtype)


def mlp_kernel(x_ref, w1_ref, b1_ref, w2_ref, b2_ref, o_ref):
    """o = relu(x @ W1 + b1) @ W2 + b2  (f32 accumulation, f32 epilogue)."""
    h = jnp.dot(x_ref[...], w1_ref[...], preferred_element_type=jnp.float32) + b1_ref[...]
    h = jnp.maximum(h, 0.0).astype(jnp.bfloat16)
    o_ref[...] = jnp.dot(h, w2_ref[...], preferred_element_type=jnp.float32) + b2_ref[...]


# ------------------------------ pallas_call glue ---------------------------- #

def _fused_conv_stage(pat2d, w1c, b1r, w2c, b2r, G):
    M2d, Kp = pat2d.shape                     # (Bp1*640, 32)
    Bp1 = M2d // 640
    flops = int(2 * M2d * Kp * 32 + 25 * 2 * (Bp1 * 96) * 32 * 64)
    bytes_accessed = int(pat2d.size * 2 + w1c.size * 2 + w2c.size * 2
                         + b1r.size * 4 + b2r.size * 4 + Bp1 * 24 * 64 * 2)
    return pl.pallas_call(
        fused_conv_kernel,
        out_shape=jax.ShapeDtypeStruct((Bp1, 24, 64), jnp.bfloat16),
        grid=(Bp1 // G,),
        in_specs=[
            pl.BlockSpec((G * 640, Kp), lambda i: (i, 0)),     # per-group im2col rows
            pl.BlockSpec((32, 32), lambda i: (0, 0)),          # resident weights/bias
            pl.BlockSpec((1, 32), lambda i: (0, 0)),
            pl.BlockSpec((800, 64), lambda i: (0, 0)),
            pl.BlockSpec((1, 64), lambda i: (0, 0)),
        ],
        out_specs=pl.BlockSpec((G, 24, 64), lambda i: (i, 0, 0)),
        compiler_params=pltpu.CompilerParams(
            dimension_semantics=("parallel",),
            # working set @G=8: 2x1.25MB pat + 2.5MB y1 + 0.6MB h1 + 0.8MB w2b
            # + 0.4MB acc + weights/out  ~= 7 MiB  -> 32 MiB cap has 4x headroom.
            vmem_limit_bytes=32 * 1024 * 1024,
        ),
        cost_estimate=pl.CostEstimate(flops=flops, transcendentals=0,
                                      bytes_accessed=bytes_accessed),
    )(pat2d, w1c, b1r, w2c, b2r)


def _mlp_stage(feats, w1c, b1r, w2c, b2r, tb):
    Bp, K = feats.shape
    flops = int(2 * Bp * (K * 256 + 256 * 10))
    bytes_accessed = int(feats.size * 2 + w1c.size * 2 + w2c.size * 2
                         + b1r.size * 4 + b2r.size * 4 + Bp * 128 * 4)
    return pl.pallas_call(
        mlp_kernel,
        out_shape=jax.ShapeDtypeStruct((Bp, 128), jnp.float32),
        grid=(Bp // tb,),
        in_specs=[
            pl.BlockSpec((tb, K), lambda i: (i, 0)),           # batch-row tile
            pl.BlockSpec((K, 256), lambda i: (0, 0)),          # resident weights/bias
            pl.BlockSpec((1, 256), lambda i: (0, 0)),
            pl.BlockSpec((256, 128), lambda i: (0, 0)),
            pl.BlockSpec((1, 128), lambda i: (0, 0)),
        ],
        out_specs=pl.BlockSpec((tb, 128), lambda i: (i, 0)),
        compiler_params=pltpu.CompilerParams(
            dimension_semantics=("parallel",),
            # working set @tb=256: ~1MB feats bufs + 0.6MB weights + 0.4MB hidden/out.
            vmem_limit_bytes=16 * 1024 * 1024,
        ),
        cost_estimate=pl.CostEstimate(flops=flops, transcendentals=0,
                                      bytes_accessed=bytes_accessed),
    )(feats, w1c, b1r, w2c, b2r)


# --------------------------- im2col (plain-JAX glue) ------------------------ #

def _conv1_im2col_pat(x):
    """x: (B, 28, 28).  conv1 im2col rows laid out for the fused kernel:
    per image, rows = [conv1 pool phase (a1,b1): 4] x [pooled-position parity
    block (pr,pc): 4, 40 rows each (36 valid + 4 zero pad)]; row (rr,cc) of a
    block holds the 5x5 patch (cols = ki*5+kj, padded to 32) of the conv1
    output position feeding pooled position (2rr+pr, 2cc+pc) under phase
    (a1,b1), i.e. pixel x[4rr+2pr+a1+ki, 4cc+2pc+b1+kj]."""
    B = x.shape[0]
    sl = {}
    for r0 in range(8):                        # 64 distinct stride-4 6x6 slices
        for c0 in range(8):
            s = lax.slice(x, (0, r0, c0), (B, r0 + 21, c0 + 21), (1, 4, 4))
            sl[(r0, c0)] = s.reshape(B, 36)
    phases = []
    for a1 in (0, 1):
        for b1 in (0, 1):
            blocks = []
            for pr in (0, 1):
                for pc in (0, 1):
                    cols = [sl[(2 * pr + a1 + ki, 2 * pc + b1 + kj)]
                            for ki in range(5) for kj in range(5)]
                    blk = jnp.stack(cols, axis=-1)                   # (B, 36, 25)
                    blocks.append(jnp.pad(blk, ((0, 0), (0, 4), (0, 7))))
            phases.append(jnp.concatenate(blocks, axis=1))           # (B, 160, 32)
    return jnp.concatenate(phases, axis=1)                           # (B, 640, 32)


# --------------------------- parameter re-layout ---------------------------- #

def _prepare_params(params):
    w1, b1, w2, b2, wf1, bf1, wf2, bf2 = params
    # conv weights OIHW -> (kh*kw*in, out); conv1 K padded 25 -> 32 only.
    w1c = jnp.transpose(w1, (2, 3, 1, 0)).reshape(25, 32)
    w1c = jnp.pad(w1c, ((0, 7), (0, 0))).astype(jnp.bfloat16)         # (32, 32)
    b1r = b1.reshape(1, 32).astype(jnp.float32)
    w2c = jnp.transpose(w2, (2, 3, 1, 0)).reshape(800, 64).astype(jnp.bfloat16)
    b2r = b2.reshape(1, 64).astype(jnp.float32)
    # torch's x.view(-1,1024) flattens (c,h,w); our features are (h,w,c) — permute fc1.
    wf1c = jnp.transpose(wf1.reshape(256, 64, 4, 4), (0, 2, 3, 1)).reshape(256, 1024)
    wf1c = wf1c.T.astype(jnp.bfloat16)                                # (1024, 256)
    bf1r = bf1.reshape(1, 256).astype(jnp.float32)
    wf2c = jnp.pad(wf2.T, ((0, 0), (0, 118))).astype(jnp.bfloat16)    # (256, 128) lane-dense
    bf2r = jnp.pad(bf2, (0, 118)).reshape(1, 128).astype(jnp.float32)
    return w1c, b1r, w2c, b2r, wf1c, bf1r, wf2c, bf2r


# ------------------------------ full forward -------------------------------- #

def cnn_forward_pallas(x_nchw, params):
    w1c, b1r, w2c, b2r, wf1c, bf1r, wf2c, bf2r = _prepare_params(params)
    B = x_nchw.shape[0]
    x = x_nchw.reshape(B, 28, 28).astype(jnp.bfloat16)

    # fused conv1+pool+conv2+pool; G images per grid step, grid >= 2 for B >= 2.
    G = max(1, min(8, B // 2))
    Bp1 = -(-B // G) * G
    pat = _conv1_im2col_pat(x)                                       # (B, 640, 32) bf16
    pat = jnp.pad(pat, ((0, Bp1 - B), (0, 0), (0, 0)))
    h2 = _fused_conv_stage(pat.reshape(Bp1 * 640, 32), w1c, b1r, w2c, b2r, G)

    # keep valid pooled positions (rows m with m%6<4, m<22) in (oi,oj) order.
    h2v = jnp.concatenate([h2[:, 0:4], h2[:, 6:10], h2[:, 12:16], h2[:, 18:22]], axis=1)
    feats = h2v.reshape(Bp1, 1024)[:B]                               # idx = (oi*4+oj)*64 + c

    # fc1(1024->256) + relu + fc2(256->10), batch-row-tiled grid.
    Bp2 = -(-B // 8) * 8
    tb = min(256, Bp2)
    Bp2 = -(-Bp2 // tb) * tb
    feats = jnp.pad(feats, ((0, Bp2 - B), (0, 0))).astype(jnp.bfloat16)
    out = _mlp_stage(feats, wf1c, bf1r, wf2c, bf2r, tb)              # (Bp2, 128) f32
    return out[:B, :10]


# --------------------------- pure-JAX reference ----------------------------- #

def cnn_forward_reference(x, params):
    w1, b1, w2, b2, wf1, bf1, wf2, bf2 = params
    dn = ("NCHW", "OIHW", "NCHW")
    h = lax.conv_general_dilated(x, w1, (1, 1), "VALID", dimension_numbers=dn)
    h = jnp.maximum(h + b1[None, :, None, None], 0.0)
    h = lax.reduce_window(h, -jnp.inf, lax.max, (1, 1, 2, 2), (1, 1, 2, 2), "VALID")
    h = lax.conv_general_dilated(h, w2, (1, 1), "VALID", dimension_numbers=dn)
    h = jnp.maximum(h + b2[None, :, None, None], 0.0)
    h = lax.reduce_window(h, -jnp.inf, lax.max, (1, 1, 2, 2), (1, 1, 2, 2), "VALID")
    h = h.reshape(h.shape[0], -1)                    # torch .view(-1, 1024): (c,h,w) order
    h = jnp.maximum(h @ wf1.T + bf1, 0.0)
    return h @ wf2.T + bf2


# ---------------------------------- main ------------------------------------ #

if __name__ == "__main__":
    key = jax.random.PRNGKey(0)
    ks = jax.random.split(key, 9)
    B = 2
    x = jax.random.normal(ks[0], (B, 1, 28, 28), jnp.float32)

    # Deterministic synthetic parameters in PyTorch layouts:
    # conv: (out, in, kh, kw); linear: (out, in)
    params = (
        0.05 * jax.random.normal(ks[1], (32, 1, 5, 5), jnp.float32),
        0.05 * jax.random.normal(ks[2], (32,), jnp.float32),
        0.05 * jax.random.normal(ks[3], (64, 32, 5, 5), jnp.float32),
        0.05 * jax.random.normal(ks[4], (64,), jnp.float32),
        0.05 * jax.random.normal(ks[5], (256, 1024), jnp.float32),
        0.05 * jax.random.normal(ks[6], (256,), jnp.float32),
        0.05 * jax.random.normal(ks[7], (10, 256), jnp.float32),
        0.05 * jax.random.normal(ks[8], (10,), jnp.float32),
    )

    out = jax.jit(cnn_forward_pallas)(x, params)
    out = jax.block_until_ready(out)
    assert out.shape == (B, 10) and out.dtype == jnp.float32

    ref = cnn_forward_reference(x, params)
    # bf16 inputs/weights with f32 accumulation: accuracy trade vs f32 PyTorch.
    np.testing.assert_allclose(np.asarray(out), np.asarray(ref), rtol=2e-2, atol=2e-2)

    print("KERNEL_OK")
</pallas_src>

<mosaic_0001>
module attributes {stable_mosaic.version = 11 : i64} {
  func.func @fused_conv_kernel(%arg0: i32, %arg1: memref<640x32xbf16, #tpu.memory_space<vmem>>, %arg2: memref<32x32xbf16, #tpu.memory_space<vmem>>, %arg3: memref<1x32xf32, #tpu.memory_space<vmem>>, %arg4: memref<800x64xbf16, #tpu.memory_space<vmem>>, %arg5: memref<1x64xf32, #tpu.memory_space<vmem>>, %arg6: memref<1x24x64xbf16, #tpu.memory_space<vmem>>) attributes {dimension_semantics = [#tpu.dimension_semantics<parallel>], iteration_bounds = array<i64: 2>, scalar_prefetch = 0 : i64, scratch_operands = 0 : i64, tpu.core_type = #tpu.core_type<tc>, window_params = [{transform_indices = @transform_0, window_bounds = array<i64: 640, 32>}, {pipeline_mode = #tpu.pipeline_mode<synchronous>, transform_indices = @transform_1, window_bounds = array<i64: 32, 32>}, {pipeline_mode = #tpu.pipeline_mode<synchronous>, transform_indices = @transform_2, window_bounds = array<i64: 1, 32>}, {pipeline_mode = #tpu.pipeline_mode<synchronous>, transform_indices = @transform_3, window_bounds = array<i64: 800, 64>}, {pipeline_mode = #tpu.pipeline_mode<synchronous>, transform_indices = @transform_4, window_bounds = array<i64: 1, 64>}, {transform_indices = @transform_5, window_bounds = array<i64: 1, 24, 64>}]} {
    %c0 = arith.constant 0 : index
    %c0_0 = arith.constant 0 : index
    %0 = vector.load %arg1[%c0, %c0_0] : memref<640x32xbf16, #tpu.memory_space<vmem>>, vector<640x32xbf16>
    %c0_1 = arith.constant 0 : index
    %c0_2 = arith.constant 0 : index
    %1 = vector.load %arg2[%c0_1, %c0_2] : memref<32x32xbf16, #tpu.memory_space<vmem>>, vector<32x32xbf16>
    %cst = arith.constant dense<0.000000e+00> : vector<640x32xf32>
    %2 = tpu.matmul %0, %1, %cst {dimension_numbers = #tpu.dot_dimension_numbers<[1], [0], [0], [1], [0, 0, 1, 1], [], []>} : vector<640x32xbf16>, vector<32x32xbf16>, vector<640x32xf32> -> vector<640x32xf32>
    %3 = vector.shape_cast %2 : vector<640x32xf32> to vector<1x4x160x32xf32>
    %cst_3 = arith.constant dense<0xFF800000> : vector<1x160x32xf32>
    %4 = vector.multi_reduction <maximumf>, %3, %cst_3 [1] : vector<1x4x160x32xf32> to vector<1x160x32xf32>
    %c0_4 = arith.constant 0 : index
    %c0_5 = arith.constant 0 : index
    %5 = vector.load %arg3[%c0_4, %c0_5] : memref<1x32xf32, #tpu.memory_space<vmem>>, vector<1x32xf32>
    %6 = vector.shape_cast %5 : vector<1x32xf32> to vector<1x1x32xf32>
    %7 = vector.broadcast %6 : vector<1x1x32xf32> to vector<1x160x32xf32>
    %8 = arith.addf %4, %7 : vector<1x160x32xf32>
    %cst_6 = arith.constant 0.000000e+00 : f32
    %9 = vector.broadcast %cst_6 : f32 to vector<1x160x32xf32>
    %10 = arith.maximumf %8, %9 : vector<1x160x32xf32>
    %c0_7 = arith.constant 0 : index
    %c0_8 = arith.constant 0 : index
    %11 = vector.load %arg4[%c0_7, %c0_8] : memref<800x64xbf16, #tpu.memory_space<vmem>>, vector<800x64xbf16>
    %12 = vector.shape_cast %11 : vector<800x64xbf16> to vector<25x32x64xbf16>
    %13 = vector.shape_cast %12 : vector<25x32x64xbf16> to vector<1x25x32x64xbf16>
    %14 = vector.extract_strided_slice %10 {offsets = [0, 0, 0], sizes = [1, 24, 32], strides = [1, 1, 1]} : vector<1x160x32xf32> to vector<1x24x32xf32>
    %15 = vector.extract_strided_slice %10 {offsets = [0, 40, 0], sizes = [1, 24, 32], strides = [1, 1, 1]} : vector<1x160x32xf32> to vector<1x24x32xf32>
    %16 = vector.extract_strided_slice %10 {offsets = [0, 80, 0], sizes = [1, 24, 32], strides = [1, 1, 1]} : vector<1x160x32xf32> to vector<1x24x32xf32>
    %17 = vector.extract_strided_slice %10 {offsets = [0, 120, 0], sizes = [1, 24, 32], strides = [1, 1, 1]} : vector<1x160x32xf32> to vector<1x24x32xf32>
    %18 = tpu.concatenate %14, %15, %16, %17 in 1 : vector<1x24x32xf32>, vector<1x24x32xf32>, vector<1x24x32xf32>, vector<1x24x32xf32> -> vector<1x96x32xf32>
    %19 = arith.truncf %18 : vector<1x96x32xf32> to vector<1x96x32xbf16>
    %20 = vector.extract_strided_slice %13 {offsets = [0, 0, 0, 0], sizes = [1, 1, 32, 64], strides = [1, 1, 1, 1]} : vector<1x25x32x64xbf16> to vector<1x1x32x64xbf16>
    %21 = vector.shape_cast %20 : vector<1x1x32x64xbf16> to vector<1x32x64xbf16>
    "tpu.trace_start"() <{level = 10 : i32, message = "gmk,gkn->gmn"}> : () -> ()
    %cst_9 = arith.constant dense<0.000000e+00> : vector<1x96x64xf32>
    %22 = tpu.matmul %19, %21, %cst_9 {dimension_numbers = #tpu.dot_dimension_numbers<[2], [1], [1], [2], [0, 0, 0, 1, 1, 2], [0], [0]>} : vector<1x96x32xbf16>, vector<1x32x64xbf16>, vector<1x96x64xf32> -> vector<1x96x64xf32>
    "tpu.trace_stop"() : () -> ()
    %23 = vector.extract_strided_slice %10 {offsets = [0, 40, 0], sizes = [1, 24, 32], strides = [1, 1, 1]} : vector<1x160x32xf32> to vector<1x24x32xf32>
    %24 = vector.extract_strided_slice %10 {offsets = [0, 1, 0], sizes = [1, 24, 32], strides = [1, 1, 1]} : vector<1x160x32xf32> to vector<1x24x32xf32>
    %25 = vector.extract_strided_slice %10 {offsets = [0, 120, 0], sizes = [1, 24, 32], strides = [1, 1, 1]} : vector<1x160x32xf32> to vector<1x24x32xf32>
    %26 = vector.extract_strided_slice %10 {offsets = [0, 81, 0], sizes = [1, 24, 32], strides = [1, 1, 1]} : vector<1x160x32xf32> to vector<1x24x32xf32>
    %27 = tpu.concatenate %23, %24, %25, %26 in 1 : vector<1x24x32xf32>, vector<1x24x32xf32>, vector<1x24x32xf32>, vector<1x24x32xf32> -> vector<1x96x32xf32>
    %28 = arith.truncf %27 : vector<1x96x32xf32> to vector<1x96x32xbf16>
    %29 = vector.extract_strided_slice %13 {offsets = [0, 1, 0, 0], sizes = [1, 1, 32, 64], strides = [1, 1, 1, 1]} : vector<1x25x32x64xbf16> to vector<1x1x32x64xbf16>
    %30 = vector.shape_cast %29 : vector<1x1x32x64xbf16> to vector<1x32x64xbf16>
    "tpu.trace_start"() <{level = 10 : i32, message = "gmk,gkn->gmn"}> : () -> ()
    %cst_10 = arith.constant dense<0.000000e+00> : vector<1x96x64xf32>
    %31 = tpu.matmul %28, %30, %cst_10 {dimension_numbers = #tpu.dot_dimension_numbers<[2], [1], [1], [2], [0, 0, 0, 1, 1, 2], [0], [0]>} : vector<1x96x32xbf16>, vector<1x32x64xbf16>, vector<1x96x64xf32> -> vector<1x96x64xf32>
    "tpu.trace_stop"() : () -> ()
    %32 = arith.addf %22, %31 : vector<1x96x64xf32>
    %33 = vector.extract_strided_slice %10 {offsets = [0, 1, 0], sizes = [1, 24, 32], strides = [1, 1, 1]} : vector<1x160x32xf32> to vector<1x24x32xf32>
    %34 = vector.extract_strided_slice %10 {offsets = [0, 41, 0], sizes = [1, 24, 32], strides = [1, 1, 1]} : vector<1x160x32xf32> to vector<1x24x32xf32>
    %35 = vector.extract_strided_slice %10 {offsets = [0, 81, 0], sizes = [1, 24, 32], strides = [1, 1, 1]} : vector<1x160x32xf32> to vector<1x24x32xf32>
    %36 = vector.extract_strided_slice %10 {offsets = [0, 121, 0], sizes = [1, 24, 32], strides = [1, 1, 1]} : vector<1x160x32xf32> to vector<1x24x32xf32>
    %37 = tpu.concatenate %33, %34, %35, %36 in 1 : vector<1x24x32xf32>, vector<1x24x32xf32>, vector<1x24x32xf32>, vector<1x24x32xf32> -> vector<1x96x32xf32>
    %38 = arith.truncf %37 : vector<1x96x32xf32> to vector<1x96x32xbf16>
    %39 = vector.extract_strided_slice %13 {offsets = [0, 2, 0, 0], sizes = [1, 1, 32, 64], strides = [1, 1, 1, 1]} : vector<1x25x32x64xbf16> to vector<1x1x32x64xbf16>
    %40 = vector.shape_cast %39 : vector<1x1x32x64xbf16> to vector<1x32x64xbf16>
    "tpu.trace_start"() <{level = 10 : i32, message = "gmk,gkn->gmn"}> : () -> ()
    %cst_11 = arith.constant dense<0.000000e+00> : vector<1x96x64xf32>
    %41 = tpu.matmul %38, %40, %cst_11 {dimension_numbers = #tpu.dot_dimension_numbers<[2], [1], [1], [2], [0, 0, 0, 1, 1, 2], [0], [0]>} : vector<1x96x32xbf16>, vector<1x32x64xbf16>, vector<1x96x64xf32> -> vector<1x96x64xf32>
    "tpu.trace_stop"() : () -> ()
    %42 = arith.addf %32, %41 : vector<1x96x64xf32>
    %43 = vector.extract_strided_slice %10 {offsets = [0, 41, 0], sizes = [1, 24, 32], strides = [1, 1, 1]} : vector<1x160x32xf32> to vector<1x24x32xf32>
    %44 = vector.extract_strided_slice %10 {offsets = [0, 2, 0], sizes = [1, 24, 32], strides = [1, 1, 1]} : vector<1x160x32xf32> to vector<1x24x32xf32>
    %45 = vector.extract_strided_slice %10 {offsets = [0, 121, 0], sizes = [1, 24, 32], strides = [1, 1, 1]} : vector<1x160x32xf32> to vector<1x24x32xf32>
    %46 = vector.extract_strided_slice %10 {offsets = [0, 82, 0], sizes = [1, 24, 32], strides = [1, 1, 1]} : vector<1x160x32xf32> to vector<1x24x32xf32>
    %47 = tpu.concatenate %43, %44, %45, %46 in 1 : vector<1x24x32xf32>, vector<1x24x32xf32>, vector<1x24x32xf32>, vector<1x24x32xf32> -> vector<1x96x32xf32>
    %48 = arith.truncf %47 : vector<1x96x32xf32> to vector<1x96x32xbf16>
    %49 = vector.extract_strided_slice %13 {offsets = [0, 3, 0, 0], sizes = [1, 1, 32, 64], strides = [1, 1, 1, 1]} : vector<1x25x32x64xbf16> to vector<1x1x32x64xbf16>
    %50 = vector.shape_cast %49 : vector<1x1x32x64xbf16> to vector<1x32x64xbf16>
    "tpu.trace_start"() <{level = 10 : i32, message = "gmk,gkn->gmn"}> : () -> ()
    %cst_12 = arith.constant dense<0.000000e+00> : vector<1x96x64xf32>
    %51 = tpu.matmul %48, %50, %cst_12 {dimension_numbers = #tpu.dot_dimension_numbers<[2], [1], [1], [2], [0, 0, 0, 1, 1, 2], [0], [0]>} : vector<1x96x32xbf16>, vector<1x32x64xbf16>, vector<1x96x64xf32> -> vector<1x96x64xf32>
    "tpu.trace_stop"() : () -> ()
    %52 = arith.addf %42, %51 : vector<1x96x64xf32>
    %53 = vector.extract_strided_slice %10 {offsets = [0, 2, 0], sizes = [1, 24, 32], strides = [1, 1, 1]} : vector<1x160x32xf32> to vector<1x24x32xf32>
    %54 = vector.extract_strided_slice %10 {offsets = [0, 42, 0], sizes = [1, 24, 32], strides = [1, 1, 1]} : vector<1x160x32xf32> to vector<1x24x32xf32>
    %55 = vector.extract_strided_slice %10 {offsets = [0, 82, 0], sizes = [1, 24, 32], strides = [1, 1, 1]} : vector<1x160x32xf32> to vector<1x24x32xf32>
    %56 = vector.extract_strided_slice %10 {offsets = [0, 122, 0], sizes = [1, 24, 32], strides = [1, 1, 1]} : vector<1x160x32xf32> to vector<1x24x32xf32>
    %57 = tpu.concatenate %53, %54, %55, %56 in 1 : vector<1x24x32xf32>, vector<1x24x32xf32>, vector<1x24x32xf32>, vector<1x24x32xf32> -> vector<1x96x32xf32>
    %58 = arith.truncf %57 : vector<1x96x32xf32> to vector<1x96x32xbf16>
    %59 = vector.extract_strided_slice %13 {offsets = [0, 4, 0, 0], sizes = [1, 1, 32, 64], strides = [1, 1, 1, 1]} : vector<1x25x32x64xbf16> to vector<1x1x32x64xbf16>
    %60 = vector.shape_cast %59 : vector<1x1x32x64xbf16> to vector<1x32x64xbf16>
    "tpu.trace_start"() <{level = 10 : i32, message = "gmk,gkn->gmn"}> : () -> ()
    %cst_13 = arith.constant dense<0.000000e+00> : vector<1x96x64xf32>
    %61 = tpu.matmul %58, %60, %cst_13 {dimension_numbers = #tpu.dot_dimension_numbers<[2], [1], [1], [2], [0, 0, 0, 1, 1, 2], [0], [0]>} : vector<1x96x32xbf16>, vector<1x32x64xbf16>, vector<1x96x64xf32> -> vector<1x96x64xf32>
    "tpu.trace_stop"() : () -> ()
    %62 = arith.addf %52, %61 : vector<1x96x64xf32>
    %63 = vector.extract_strided_slice %10 {offsets = [0, 80, 0], sizes = [1, 24, 32], strides = [1, 1, 1]} : vector<1x160x32xf32> to vector<1x24x32xf32>
    %64 = vector.extract_strided_slice %10 {offsets = [0, 120, 0], sizes = [1, 24, 32], strides = [1, 1, 1]} : vector<1x160x32xf32> to vector<1x24x32xf32>
    %65 = vector.extract_strided_slice %10 {offsets = [0, 6, 0], sizes = [1, 24, 32], strides = [1, 1, 1]} : vector<1x160x32xf32> to vector<1x24x32xf32>
    %66 = vector.extract_strided_slice %10 {offsets = [0, 46, 0], sizes = [1, 24, 32], strides = [1, 1, 1]} : vector<1x160x32xf32> to vector<1x24x32xf32>
    %67 = tpu.concatenate %63, %64, %65, %66 in 1 : vector<1x24x32xf32>, vector<1x24x32xf32>, vector<1x24x32xf32>, vector<1x24x32xf32> -> vector<1x96x32xf32>
    %68 = arith.truncf %67 : vector<1x96x32xf32> to vector<1x96x32xbf16>
    %69 = vector.extract_strided_slice %13 {offsets = [0, 5, 0, 0], sizes = [1, 1, 32, 64], strides = [1, 1, 1, 1]} : vector<1x25x32x64xbf16> to vector<1x1x32x64xbf16>
    %70 = vector.shape_cast %69 : vector<1x1x32x64xbf16> to vector<1x32x64xbf16>
    "tpu.trace_start"() <{level = 10 : i32, message = "gmk,gkn->gmn"}> : () -> ()
    %cst_14 = arith.constant dense<0.000000e+00> : vector<1x96x64xf32>
    %71 = tpu.matmul %68, %70, %cst_14 {dimension_numbers = #tpu.dot_dimension_numbers<[2], [1], [1], [2], [0, 0, 0, 1, 1, 2], [0], [0]>} : vector<1x96x32xbf16>, vector<1x32x64xbf16>, vector<1x96x64xf32> -> vector<1x96x64xf32>
    "tpu.trace_stop"() : () -> ()
    %72 = arith.addf %62, %71 : vector<1x96x64xf32>
    %73 = vector.extract_strided_slice %10 {offsets = [0, 120, 0], sizes = [1, 24, 32], strides = [1, 1, 1]} : vector<1x160x32xf32> to vector<1x24x32xf32>
    %74 = vector.extract_strided_slice %10 {offsets = [0, 81, 0], sizes = [1, 24, 32], strides = [1, 1, 1]} : vector<1x160x32xf32> to vector<1x24x32xf32>
    %75 = vector.extract_strided_slice %10 {offsets = [0, 46, 0], sizes = [1, 24, 32], strides = [1, 1, 1]} : vector<1x160x32xf32> to vector<1x24x32xf32>
    %76 = vector.extract_strided_slice %10 {offsets = [0, 7, 0], sizes = [1, 24, 32], strides = [1, 1, 1]} : vector<1x160x32xf32> to vector<1x24x32xf32>
    %77 = tpu.concatenate %73, %74, %75, %76 in 1 : vector<1x24x32xf32>, vector<1x24x32xf32>, vector<1x24x32xf32>, vector<1x24x32xf32> -> vector<1x96x32xf32>
    %78 = arith.truncf %77 : vector<1x96x32xf32> to vector<1x96x32xbf16>
    %79 = vector.extract_strided_slice %13 {offsets = [0, 6, 0, 0], sizes = [1, 1, 32, 64], strides = [1, 1, 1, 1]} : vector<1x25x32x64xbf16> to vector<1x1x32x64xbf16>
    %80 = vector.shape_cast %79 : vector<1x1x32x64xbf16> to vector<1x32x64xbf16>
    "tpu.trace_start"() <{level = 10 : i32, message = "gmk,gkn->gmn"}> : () -> ()
    %cst_15 = arith.constant dense<0.000000e+00> : vector<1x96x64xf32>
    %81 = tpu.matmul %78, %80, %cst_15 {dimension_numbers = #tpu.dot_dimension_numbers<[2], [1], [1], [2], [0, 0, 0, 1, 1, 2], [0], [0]>} : vector<1x96x32xbf16>, vector<1x32x64xbf16>, vector<1x96x64xf32> -> vector<1x96x64xf32>
    "tpu.trace_stop"() : () -> ()
    %82 = arith.addf %72, %81 : vector<1x96x64xf32>
    %83 = vector.extract_strided_slice %10 {offsets = [0, 81, 0], sizes = [1, 24, 32], strides = [1, 1, 1]} : vector<1x160x32xf32> to vector<1x24x32xf32>
    %84 = vector.extract_strided_slice %10 {offsets = [0, 121, 0], sizes = [1, 24, 32], strides = [1, 1, 1]} : vector<1x160x32xf32> to vector<1x24x32xf32>
    %85 = vector.extract_strided_slice %10 {offsets = [0, 7, 0], sizes = [1, 24, 32], strides = [1, 1, 1]} : vector<1x160x32xf32> to vector<1x24x32xf32>
    %86 = vector.extract_strided_slice %10 {offsets = [0, 47, 0], sizes = [1, 24, 32], strides = [1, 1, 1]} : vector<1x160x32xf32> to vector<1x24x32xf32>
    %87 = tpu.concatenate %83, %84, %85, %86 in 1 : vector<1x24x32xf32>, vector<1x24x32xf32>, vector<1x24x32xf32>, vector<1x24x32xf32> -> vector<1x96x32xf32>
    %88 = arith.truncf %87 : vector<1x96x32xf32> to vector<1x96x32xbf16>
    %89 = vector.extract_strided_slice %13 {offsets = [0, 7, 0, 0], sizes = [1, 1, 32, 64], strides = [1, 1, 1, 1]} : vector<1x25x32x64xbf16> to vector<1x1x32x64xbf16>
    %90 = vector.shape_cast %89 : vector<1x1x32x64xbf16> to vector<1x32x64xbf16>
    "tpu.trace_start"() <{level = 10 : i32, message = "gmk,gkn->gmn"}> : () -> ()
    %cst_16 = arith.constant dense<0.000000e+00> : vector<1x96x64xf32>
    %91 = tpu.matmul %88, %90, %cst_16 {dimension_numbers = #tpu.dot_dimension_numbers<[2], [1], [1], [2], [0, 0, 0, 1, 1, 2], [0], [0]>} : vector<1x96x32xbf16>, vector<1x32x64xbf16>, vector<1x96x64xf32> -> vector<1x96x64xf32>
    "tpu.trace_stop"() : () -> ()
    %92 = arith.addf %82, %91 : vector<1x96x64xf32>
    %93 = vector.extract_strided_slice %10 {offsets = [0, 121, 0], sizes = [1, 24, 32], strides = [1, 1, 1]} : vector<1x160x32xf32> to vector<1x24x32xf32>
    %94 = vector.extract_strided_slice %10 {offsets = [0, 82, 0], sizes = [1, 24, 32], strides = [1, 1, 1]} : vector<1x160x32xf32> to vector<1x24x32xf32>
    %95 = vector.extract_strided_slice %10 {offsets = [0, 47, 0], sizes = [1, 24, 32], strides = [1, 1, 1]} : vector<1x160x32xf32> to vector<1x24x32xf32>
    %96 = vector.extract_strided_slice %10 {offsets = [0, 8, 0], sizes = [1, 24, 32], strides = [1, 1, 1]} : vector<1x160x32xf32> to vector<1x24x32xf32>
    %97 = tpu.concatenate %93, %94, %95, %96 in 1 : vector<1x24x32xf32>, vector<1x24x32xf32>, vector<1x24x32xf32>, vector<1x24x32xf32> -> vector<1x96x32xf32>
    %98 = arith.truncf %97 : vector<1x96x32xf32> to vector<1x96x32xbf16>
    %99 = vector.extract_strided_slice %13 {offsets = [0, 8, 0, 0], sizes = [1, 1, 32, 64], strides = [1, 1, 1, 1]} : vector<1x25x32x64xbf16> to vector<1x1x32x64xbf16>
    %100 = vector.shape_cast %99 : vector<1x1x32x64xbf16> to vector<1x32x64xbf16>
    "tpu.trace_start"() <{level = 10 : i32, message = "gmk,gkn->gmn"}> : () -> ()
    %cst_17 = arith.constant dense<0.000000e+00> : vector<1x96x64xf32>
    %101 = tpu.matmul %98, %100, %cst_17 {dimension_numbers = #tpu.dot_dimension_numbers<[2], [1], [1], [2], [0, 0, 0, 1, 1, 2], [0], [0]>} : vector<1x96x32xbf16>, vector<1x32x64xbf16>, vector<1x96x64xf32> -> vector<1x96x64xf32>
    "tpu.trace_stop"() : () -> ()
    %102 = arith.addf %92, %101 : vector<1x96x64xf32>
    %103 = vector.extract_strided_slice %10 {offsets = [0, 82, 0], sizes = [1, 24, 32], strides = [1, 1, 1]} : vector<1x160x32xf32> to vector<1x24x32xf32>
    %104 = vector.extract_strided_slice %10 {offsets = [0, 122, 0], sizes = [1, 24, 32], strides = [1, 1, 1]} : vector<1x160x32xf32> to vector<1x24x32xf32>
    %105 = vector.extract_strided_slice %10 {offsets = [0, 8, 0], sizes = [1, 24, 32], strides = [1, 1, 1]} : vector<1x160x32xf32> to vector<1x24x32xf32>
    %106 = vector.extract_strided_slice %10 {offsets = [0, 48, 0], sizes = [1, 24, 32], strides = [1, 1, 1]} : vector<1x160x32xf32> to vector<1x24x32xf32>
    %107 = tpu.concatenate %103, %104, %105, %106 in 1 : vector<1x24x32xf32>, vector<1x24x32xf32>, vector<1x24x32xf32>, vector<1x24x32xf32> -> vector<1x96x32xf32>
    %108 = arith.truncf %107 : vector<1x96x32xf32> to vector<1x96x32xbf16>
    %109 = vector.extract_strided_slice %13 {offsets = [0, 9, 0, 0], sizes = [1, 1, 32, 64], strides = [1, 1, 1, 1]} : vector<1x25x32x64xbf16> to vector<1x1x32x64xbf16>
    %110 = vector.shape_cast %109 : vector<1x1x32x64xbf16> to vector<1x32x64xbf16>
    "tpu.trace_start"() <{level = 10 : i32, message = "gmk,gkn->gmn"}> : () -> ()
    %cst_18 = arith.constant dense<0.000000e+00> : vector<1x96x64xf32>
    %111 = tpu.matmul %108, %110, %cst_18 {dimension_numbers = #tpu.dot_dimension_numbers<[2], [1], [1], [2], [0, 0, 0, 1, 1, 2], [0], [0]>} : vector<1x96x32xbf16>, vector<1x32x64xbf16>, vector<1x96x64xf32> -> vector<1x96x64xf32>
    "tpu.trace_stop"() : () -> ()
    %112 = arith.addf %102, %111 : vector<1x96x64xf32>
    %113 = vector.extract_strided_slice %10 {offsets = [0, 6, 0], sizes = [1, 24, 32], strides = [1, 1, 1]} : vector<1x160x32xf32> to vector<1x24x32xf32>
    %114 = vector.extract_strided_slice %10 {offsets = [0, 46, 0], sizes = [1, 24, 32], strides = [1, 1, 1]} : vector<1x160x32xf32> to vector<1x24x32xf32>
    %115 = vector.extract_strided_slice %10 {offsets = [0, 86, 0], sizes = [1, 24, 32], strides = [1, 1, 1]} : vector<1x160x32xf32> to vector<1x24x32xf32>
    %116 = vector.extract_strided_slice %10 {offsets = [0, 126, 0], sizes = [1, 24, 32], strides = [1, 1, 1]} : vector<1x160x32xf32> to vector<1x24x32xf32>
    %117 = tpu.concatenate %113, %114, %115, %116 in 1 : vector<1x24x32xf32>, vector<1x24x32xf32>, vector<1x24x32xf32>, vector<1x24x32xf32> -> vector<1x96x32xf32>
    %118 = arith.truncf %117 : vector<1x96x32xf32> to vector<1x96x32xbf16>
    %119 = vector.extract_strided_slice %13 {offsets = [0, 10, 0, 0], sizes = [1, 1, 32, 64], strides = [1, 1, 1, 1]} : vector<1x25x32x64xbf16> to vector<1x1x32x64xbf16>
    %120 = vector.shape_cast %119 : vector<1x1x32x64xbf16> to vector<1x32x64xbf16>
    "tpu.trace_start"() <{level = 10 : i32, message = "gmk,gkn->gmn"}> : () -> ()
    %cst_19 = arith.constant dense<0.000000e+00> : vector<1x96x64xf32>
    %121 = tpu.matmul %118, %120, %cst_19 {dimension_numbers = #tpu.dot_dimension_numbers<[2], [1], [1], [2], [0, 0, 0, 1, 1, 2], [0], [0]>} : vector<1x96x32xbf16>, vector<1x32x64xbf16>, vector<1x96x64xf32> -> vector<1x96x64xf32>
    "tpu.trace_stop"() : () -> ()
    %122 = arith.addf %112, %121 : vector<1x96x64xf32>
    %123 = vector.extract_strided_slice %10 {offsets = [0, 46, 0], sizes = [1, 24, 32], strides = [1, 1, 1]} : vector<1x160x32xf32> to vector<1x24x32xf32>
    %124 = vector.extract_strided_slice %10 {offsets = [0, 7, 0], sizes = [1, 24, 32], strides = [1, 1, 1]} : vector<1x160x32xf32> to vector<1x24x32xf32>
    %125 = vector.extract_strided_slice %10 {offsets = [0, 126, 0], sizes = [1, 24, 32], strides = [1, 1, 1]} : vector<1x160x32xf32> to vector<1x24x32xf32>
    %126 = vector.extract_strided_slice %10 {offsets = [0, 87, 0], sizes = [1, 24, 32], strides = [1, 1, 1]} : vector<1x160x32xf32> to vector<1x24x32xf32>
    %127 = tpu.concatenate %123, %124, %125, %126 in 1 : vector<1x24x32xf32>, vector<1x24x32xf32>, vector<1x24x32xf32>, vector<1x24x32xf32> -> vector<1x96x32xf32>
    %128 = arith.truncf %127 : vector<1x96x32xf32> to vector<1x96x32xbf16>
    %129 = vector.extract_strided_slice %13 {offsets = [0, 11, 0, 0], sizes = [1, 1, 32, 64], strides = [1, 1, 1, 1]} : vector<1x25x32x64xbf16> to vector<1x1x32x64xbf16>
    %130 = vector.shape_cast %129 : vector<1x1x32x64xbf16> to vector<1x32x64xbf16>
    "tpu.trace_start"() <{level = 10 : i32, message = "gmk,gkn->gmn"}> : () -> ()
    %cst_20 = arith.constant dense<0.000000e+00> : vector<1x96x64xf32>
    %131 = tpu.matmul %128, %130, %cst_20 {dimension_numbers = #tpu.dot_dimension_numbers<[2], [1], [1], [2], [0, 0, 0, 1, 1, 2], [0], [0]>} : vector<1x96x32xbf16>, vector<1x32x64xbf16>, vector<1x96x64xf32> -> vector<1x96x64xf32>
    "tpu.trace_stop"() : () -> ()
    %132 = arith.addf %122, %131 : vector<1x96x64xf32>
    %133 = vector.extract_strided_slice %10 {offsets = [0, 7, 0], sizes = [1, 24, 32], strides = [1, 1, 1]} : vector<1x160x32xf32> to vector<1x24x32xf32>
    %134 = vector.extract_strided_slice %10 {offsets = [0, 47, 0], sizes = [1, 24, 32], strides = [1, 1, 1]} : vector<1x160x32xf32> to vector<1x24x32xf32>
    %135 = vector.extract_strided_slice %10 {offsets = [0, 87, 0], sizes = [1, 24, 32], strides = [1, 1, 1]} : vector<1x160x32xf32> to vector<1x24x32xf32>
    %136 = vector.extract_strided_slice %10 {offsets = [0, 127, 0], sizes = [1, 24, 32], strides = [1, 1, 1]} : vector<1x160x32xf32> to vector<1x24x32xf32>
    %137 = tpu.concatenate %133, %134, %135, %136 in 1 : vector<1x24x32xf32>, vector<1x24x32xf32>, vector<1x24x32xf32>, vector<1x24x32xf32> -> vector<1x96x32xf32>
    %138 = arith.truncf %137 : vector<1x96x32xf32> to vector<1x96x32xbf16>
    %139 = vector.extract_strided_slice %13 {offsets = [0, 12, 0, 0], sizes = [1, 1, 32, 64], strides = [1, 1, 1, 1]} : vector<1x25x32x64xbf16> to vector<1x1x32x64xbf16>
    %140 = vector.shape_cast %139 : vector<1x1x32x64xbf16> to vector<1x32x64xbf16>
    "tpu.trace_start"() <{level = 10 : i32, message = "gmk,gkn->gmn"}> : () -> ()
    %cst_21 = arith.constant dense<0.000000e+00> : vector<1x96x64xf32>
    %141 = tpu.matmul %138, %140, %cst_21 {dimension_numbers = #tpu.dot_dimension_numbers<[2], [1], [1], [2], [0, 0, 0, 1, 1, 2], [0], [0]>} : vector<1x96x32xbf16>, vector<1x32x64xbf16>, vector<1x96x64xf32> -> vector<1x96x64xf32>
    "tpu.trace_stop"() : () -> ()
    %142 = arith.addf %132, %141 : vector<1x96x64xf32>
    %143 = vector.extract_strided_slice %10 {offsets = [0, 47, 0], sizes = [1, 24, 32], strides = [1, 1, 1]} : vector<1x160x32xf32> to vector<1x24x32xf32>
    %144 = vector.extract_strided_slice %10 {offsets = [0, 8, 0], sizes = [1, 24, 32], strides = [1, 1, 1]} : vector<1x160x32xf32> to vector<1x24x32xf32>
    %145 = vector.extract_strided_slice %10 {offsets = [0, 127, 0], sizes = [1, 24, 32], strides = [1, 1, 1]} : vector<1x160x32xf32> to vector<1x24x32xf32>
    %146 = vector.extract_strided_slice %10 {offsets = [0, 88, 0], sizes = [1, 24, 32], strides = [1, 1, 1]} : vector<1x160x32xf32> to vector<1x24x32xf32>
    %147 = tpu.concatenate %143, %144, %145, %146 in 1 : vector<1x24x32xf32>, vector<1x24x32xf32>, vector<1x24x32xf32>, vector<1x24x32xf32> -> vector<1x96x32xf32>
    %148 = arith.truncf %147 : vector<1x96x32xf32> to vector<1x96x32xbf16>
    %149 = vector.extract_strided_slice %13 {offsets = [0, 13, 0, 0], sizes = [1, 1, 32, 64], strides = [1, 1, 1, 1]} : vector<1x25x32x64xbf16> to vector<1x1x32x64xbf16>
    %150 = vector.shape_cast %149 : vector<1x1x32x64xbf16> to vector<1x32x64xbf16>
    "tpu.trace_start"() <{level = 10 : i32, message = "gmk,gkn->gmn"}> : () -> ()
    %cst_22 = arith.constant dense<0.000000e+00> : vector<1x96x64xf32>
    %151 = tpu.matmul %148, %150, %cst_22 {dimension_numbers = #tpu.dot_dimension_numbers<[2], [1], [1], [2], [0, 0, 0, 1, 1, 2], [0], [0]>} : vector<1x96x32xbf16>, vector<1x32x64xbf16>, vector<1x96x64xf32> -> vector<1x96x64xf32>
    "tpu.trace_stop"() : () -> ()
    %152 = arith.addf %142, %151 : vector<1x96x64xf32>
    %153 = vector.extract_strided_slice %10 {offsets = [0, 8, 0], sizes = [1, 24, 32], strides = [1, 1, 1]} : vector<1x160x32xf32> to vector<1x24x32xf32>
    %154 = vector.extract_strided_slice %10 {offsets = [0, 48, 0], sizes = [1, 24, 32], strides = [1, 1, 1]} : vector<1x160x32xf32> to vector<1x24x32xf32>
    %155 = vector.extract_strided_slice %10 {offsets = [0, 88, 0], sizes = [1, 24, 32], strides = [1, 1, 1]} : vector<1x160x32xf32> to vector<1x24x32xf32>
    %156 = vector.extract_strided_slice %10 {offsets = [0, 128, 0], sizes = [1, 24, 32], strides = [1, 1, 1]} : vector<1x160x32xf32> to vector<1x24x32xf32>
    %157 = tpu.concatenate %153, %154, %155, %156 in 1 : vector<1x24x32xf32>, vector<1x24x32xf32>, vector<1x24x32xf32>, vector<1x24x32xf32> -> vector<1x96x32xf32>
    %158 = arith.truncf %157 : vector<1x96x32xf32> to vector<1x96x32xbf16>
    %159 = vector.extract_strided_slice %13 {offsets = [0, 14, 0, 0], sizes = [1, 1, 32, 64], strides = [1, 1, 1, 1]} : vector<1x25x32x64xbf16> to vector<1x1x32x64xbf16>
    %160 = vector.shape_cast %159 : vector<1x1x32x64xbf16> to vector<1x32x64xbf16>
    "tpu.trace_start"() <{level = 10 : i32, message = "gmk,gkn->gmn"}> : () -> ()
    %cst_23 = arith.constant dense<0.000000e+00> : vector<1x96x64xf32>
    %161 = tpu.matmul %158, %160, %cst_23 {dimension_numbers = #tpu.dot_dimension_numbers<[2], [1], [1], [2], [0, 0, 0, 1, 1, 2], [0], [0]>} : vector<1x96x32xbf16>, vector<1x32x64xbf16>, vector<1x96x64xf32> -> vector<1x96x64xf32>
    "tpu.trace_stop"() : () -> ()
    %162 = arith.addf %152, %161 : vector<1x96x64xf32>
    %163 = vector.extract_strided_slice %10 {offsets = [0, 86, 0], sizes = [1, 24, 32], strides = [1, 1, 1]} : vector<1x160x32xf32> to vector<1x24x32xf32>
    %164 = vector.extract_strided_slice %10 {offsets = [0, 126, 0], sizes = [1, 24, 32], strides = [1, 1, 1]} : vector<1x160x32xf32> to vector<1x24x32xf32>
    %165 = vector.extract_strided_slice %10 {offsets = [0, 12, 0], sizes = [1, 24, 32], strides = [1, 1, 1]} : vector<1x160x32xf32> to vector<1x24x32xf32>
    %166 = vector.extract_strided_slice %10 {offsets = [0, 52, 0], sizes = [1, 24, 32], strides = [1, 1, 1]} : vector<1x160x32xf32> to vector<1x24x32xf32>
    %167 = tpu.concatenate %163, %164, %165, %166 in 1 : vector<1x24x32xf32>, vector<1x24x32xf32>, vector<1x24x32xf32>, vector<1x24x32xf32> -> vector<1x96x32xf32>
    %168 = arith.truncf %167 : vector<1x96x32xf32> to vector<1x96x32xbf16>
    %169 = vector.extract_strided_slice %13 {offsets = [0, 15, 0, 0], sizes = [1, 1, 32, 64], strides = [1, 1, 1, 1]} : vector<1x25x32x64xbf16> to vector<1x1x32x64xbf16>
    %170 = vector.shape_cast %169 : vector<1x1x32x64xbf16> to vector<1x32x64xbf16>
    "tpu.trace_start"() <{level = 10 : i32, message = "gmk,gkn->gmn"}> : () -> ()
    %cst_24 = arith.constant dense<0.000000e+00> : vector<1x96x64xf32>
    %171 = tpu.matmul %168, %170, %cst_24 {dimension_numbers = #tpu.dot_dimension_numbers<[2], [1], [1], [2], [0, 0, 0, 1, 1, 2], [0], [0]>} : vector<1x96x32xbf16>, vector<1x32x64xbf16>, vector<1x96x64xf32> -> vector<1x96x64xf32>
    "tpu.trace_stop"() : () -> ()
    %172 = arith.addf %162, %171 : vector<1x96x64xf32>
    %173 = vector.extract_strided_slice %10 {offsets = [0, 126, 0], sizes = [1, 24, 32], strides = [1, 1, 1]} : vector<1x160x32xf32> to vector<1x24x32xf32>
    %174 = vector.extract_strided_slice %10 {offsets = [0, 87, 0], sizes = [1, 24, 32], strides = [1, 1, 1]} : vector<1x160x32xf32> to vector<1x24x32xf32>
    %175 = vector.extract_strided_slice %10 {offsets = [0, 52, 0], sizes = [1, 24, 32], strides = [1, 1, 1]} : vector<1x160x32xf32> to vector<1x24x32xf32>
    %176 = vector.extract_strided_slice %10 {offsets = [0, 13, 0], sizes = [1, 24, 32], strides = [1, 1, 1]} : vector<1x160x32xf32> to vector<1x24x32xf32>
    %177 = tpu.concatenate %173, %174, %175, %176 in 1 : vector<1x24x32xf32>, vector<1x24x32xf32>, vector<1x24x32xf32>, vector<1x24x32xf32> -> vector<1x96x32xf32>
    %178 = arith.truncf %177 : vector<1x96x32xf32> to vector<1x96x32xbf16>
    %179 = vector.extract_strided_slice %13 {offsets = [0, 16, 0, 0], sizes = [1, 1, 32, 64], strides = [1, 1, 1, 1]} : vector<1x25x32x64xbf16> to vector<1x1x32x64xbf16>
    %180 = vector.shape_cast %179 : vector<1x1x32x64xbf16> to vector<1x32x64xbf16>
    "tpu.trace_start"() <{level = 10 : i32, message = "gmk,gkn->gmn"}> : () -> ()
    %cst_25 = arith.constant dense<0.000000e+00> : vector<1x96x64xf32>
    %181 = tpu.matmul %178, %180, %cst_25 {dimension_numbers = #tpu.dot_dimension_numbers<[2], [1], [1], [2], [0, 0, 0, 1, 1, 2], [0], [0]>} : vector<1x96x32xbf16>, vector<1x32x64xbf16>, vector<1x96x64xf32> -> vector<1x96x64xf32>
    "tpu.trace_stop"() : () -> ()
    %182 = arith.addf %172, %181 : vector<1x96x64xf32>
    %183 = vector.extract_strided_slice %10 {offsets = [0, 87, 0], sizes = [1, 24, 32], strides = [1, 1, 1]} : vector<1x160x32xf32> to vector<1x24x32xf32>
    %184 = vector.extract_strided_slice %10 {offsets = [0, 127, 0], sizes = [1, 24, 32], strides = [1, 1, 1]} : vector<1x160x32xf32> to vector<1x24x32xf32>
    %185 = vector.extract_strided_slice %10 {offsets = [0, 13, 0], sizes = [1, 24, 32], strides = [1, 1, 1]} : vector<1x160x32xf32> to vector<1x24x32xf32>
    %186 = vector.extract_strided_slice %10 {offsets = [0, 53, 0], sizes = [1, 24, 32], strides = [1, 1, 1]} : vector<1x160x32xf32> to vector<1x24x32xf32>
    %187 = tpu.concatenate %183, %184, %185, %186 in 1 : vector<1x24x32xf32>, vector<1x24x32xf32>, vector<1x24x32xf32>, vector<1x24x32xf32> -> vector<1x96x32xf32>
    %188 = arith.truncf %187 : vector<1x96x32xf32> to vector<1x96x32xbf16>
    %189 = vector.extract_strided_slice %13 {offsets = [0, 17, 0, 0], sizes = [1, 1, 32, 64], strides = [1, 1, 1, 1]} : vector<1x25x32x64xbf16> to vector<1x1x32x64xbf16>
    %190 = vector.shape_cast %189 : vector<1x1x32x64xbf16> to vector<1x32x64xbf16>
    "tpu.trace_start"() <{level = 10 : i32, message = "gmk,gkn->gmn"}> : () -> ()
    %cst_26 = arith.constant dense<0.000000e+00> : vector<1x96x64xf32>
    %191 = tpu.matmul %188, %190, %cst_26 {dimension_numbers = #tpu.dot_dimension_numbers<[2], [1], [1], [2], [0, 0, 0, 1, 1, 2], [0], [0]>} : vector<1x96x32xbf16>, vector<1x32x64xbf16>, vector<1x96x64xf32> -> vector<1x96x64xf32>
    "tpu.trace_stop"() : () -> ()
    %192 = arith.addf %182, %191 : vector<1x96x64xf32>
    %193 = vector.extract_strided_slice %10 {offsets = [0, 127, 0], sizes = [1, 24, 32], strides = [1, 1, 1]} : vector<1x160x32xf32> to vector<1x24x32xf32>
    %194 = vector.extract_strided_slice %10 {offsets = [0, 88, 0], sizes = [1, 24, 32], strides = [1, 1, 1]} : vector<1x160x32xf32> to vector<1x24x32xf32>
    %195 = vector.extract_strided_slice %10 {offsets = [0, 53, 0], sizes = [1, 24, 32], strides = [1, 1, 1]} : vector<1x160x32xf32> to vector<1x24x32xf32>
    %196 = vector.extract_strided_slice %10 {offsets = [0, 14, 0], sizes = [1, 24, 32], strides = [1, 1, 1]} : vector<1x160x32xf32> to vector<1x24x32xf32>
    %197 = tpu.concatenate %193, %194, %195, %196 in 1 : vector<1x24x32xf32>, vector<1x24x32xf32>, vector<1x24x32xf32>, vector<1x24x32xf32> -> vector<1x96x32xf32>
    %198 = arith.truncf %197 : vector<1x96x32xf32> to vector<1x96x32xbf16>
    %199 = vector.extract_strided_slice %13 {offsets = [0, 18, 0, 0], sizes = [1, 1, 32, 64], strides = [1, 1, 1, 1]} : vector<1x25x32x64xbf16> to vector<1x1x32x64xbf16>
    %200 = vector.shape_cast %199 : vector<1x1x32x64xbf16> to vector<1x32x64xbf16>
    "tpu.trace_start"() <{level = 10 : i32, message = "gmk,gkn->gmn"}> : () -> ()
    %cst_27 = arith.constant dense<0.000000e+00> : vector<1x96x64xf32>
    %201 = tpu.matmul %198, %200, %cst_27 {dimension_numbers = #tpu.dot_dimension_numbers<[2], [1], [1], [2], [0, 0, 0, 1, 1, 2], [0], [0]>} : vector<1x96x32xbf16>, vector<1x32x64xbf16>, vector<1x96x64xf32> -> vector<1x96x64xf32>
    "tpu.trace_stop"() : () -> ()
    %202 = arith.addf %192, %201 : vector<1x96x64xf32>
    %203 = vector.extract_strided_slice %10 {offsets = [0, 88, 0], sizes = [1, 24, 32], strides = [1, 1, 1]} : vector<1x160x32xf32> to vector<1x24x32xf32>
    %204 = vector.extract_strided_slice %10 {offsets = [0, 128, 0], sizes = [1, 24, 32], strides = [1, 1, 1]} : vector<1x160x32xf32> to vector<1x24x32xf32>
    %205 = vector.extract_strided_slice %10 {offsets = [0, 14, 0], sizes = [1, 24, 32], strides = [1, 1, 1]} : vector<1x160x32xf32> to vector<1x24x32xf32>
    %206 = vector.extract_strided_slice %10 {offsets = [0, 54, 0], sizes = [1, 24, 32], strides = [1, 1, 1]} : vector<1x160x32xf32> to vector<1x24x32xf32>
    %207 = tpu.concatenate %203, %204, %205, %206 in 1 : vector<1x24x32xf32>, vector<1x24x32xf32>, vector<1x24x32xf32>, vector<1x24x32xf32> -> vector<1x96x32xf32>
    %208 = arith.truncf %207 : vector<1x96x32xf32> to vector<1x96x32xbf16>
    %209 = vector.extract_strided_slice %13 {offsets = [0, 19, 0, 0], sizes = [1, 1, 32, 64], strides = [1, 1, 1, 1]} : vector<1x25x32x64xbf16> to vector<1x1x32x64xbf16>
    %210 = vector.shape_cast %209 : vector<1x1x32x64xbf16> to vector<1x32x64xbf16>
    "tpu.trace_start"() <{level = 10 : i32, message = "gmk,gkn->gmn"}> : () -> ()
    %cst_28 = arith.constant dense<0.000000e+00> : vector<1x96x64xf32>
    %211 = tpu.matmul %208, %210, %cst_28 {dimension_numbers = #tpu.dot_dimension_numbers<[2], [1], [1], [2], [0, 0, 0, 1, 1, 2], [0], [0]>} : vector<1x96x32xbf16>, vector<1x32x64xbf16>, vector<1x96x64xf32> -> vector<1x96x64xf32>
    "tpu.trace_stop"() : () -> ()
    %212 = arith.addf %202, %211 : vector<1x96x64xf32>
    %213 = vector.extract_strided_slice %10 {offsets = [0, 12, 0], sizes = [1, 24, 32], strides = [1, 1, 1]} : vector<1x160x32xf32> to vector<1x24x32xf32>
    %214 = vector.extract_strided_slice %10 {offsets = [0, 52, 0], sizes = [1, 24, 32], strides = [1, 1, 1]} : vector<1x160x32xf32> to vector<1x24x32xf32>
    %215 = vector.extract_strided_slice %10 {offsets = [0, 92, 0], sizes = [1, 24, 32], strides = [1, 1, 1]} : vector<1x160x32xf32> to vector<1x24x32xf32>
    %216 = vector.extract_strided_slice %10 {offsets = [0, 132, 0], sizes = [1, 24, 32], strides = [1, 1, 1]} : vector<1x160x32xf32> to vector<1x24x32xf32>
    %217 = tpu.concatenate %213, %214, %215, %216 in 1 : vector<1x24x32xf32>, vector<1x24x32xf32>, vector<1x24x32xf32>, vector<1x24x32xf32> -> vector<1x96x32xf32>
    %218 = arith.truncf %217 : vector<1x96x32xf32> to vector<1x96x32xbf16>
    %219 = vector.extract_strided_slice %13 {offsets = [0, 20, 0, 0], sizes = [1, 1, 32, 64], strides = [1, 1, 1, 1]} : vector<1x25x32x64xbf16> to vector<1x1x32x64xbf16>
    %220 = vector.shape_cast %219 : vector<1x1x32x64xbf16> to vector<1x32x64xbf16>
    "tpu.trace_start"() <{level = 10 : i32, message = "gmk,gkn->gmn"}> : () -> ()
    %cst_29 = arith.constant dense<0.000000e+00> : vector<1x96x64xf32>
    %221 = tpu.matmul %218, %220, %cst_29 {dimension_numbers = #tpu.dot_dimension_numbers<[2], [1], [1], [2], [0, 0, 0, 1, 1, 2], [0], [0]>} : vector<1x96x32xbf16>, vector<1x32x64xbf16>, vector<1x96x64xf32> -> vector<1x96x64xf32>
    "tpu.trace_stop"() : () -> ()
    %222 = arith.addf %212, %221 : vector<1x96x64xf32>
    %223 = vector.extract_strided_slice %10 {offsets = [0, 52, 0], sizes = [1, 24, 32], strides = [1, 1, 1]} : vector<1x160x32xf32> to vector<1x24x32xf32>
    %224 = vector.extract_strided_slice %10 {offsets = [0, 13, 0], sizes = [1, 24, 32], strides = [1, 1, 1]} : vector<1x160x32xf32> to vector<1x24x32xf32>
    %225 = vector.extract_strided_slice %10 {offsets = [0, 132, 0], sizes = [1, 24, 32], strides = [1, 1, 1]} : vector<1x160x32xf32> to vector<1x24x32xf32>
    %226 = vector.extract_strided_slice %10 {offsets = [0, 93, 0], sizes = [1, 24, 32], strides = [1, 1, 1]} : vector<1x160x32xf32> to vector<1x24x32xf32>
    %227 = tpu.concatenate %223, %224, %225, %226 in 1 : vector<1x24x32xf32>, vector<1x24x32xf32>, vector<1x24x32xf32>, vector<1x24x32xf32> -> vector<1x96x32xf32>
    %228 = arith.truncf %227 : vector<1x96x32xf32> to vector<1x96x32xbf16>
    %229 = vector.extract_strided_slice %13 {offsets = [0, 21, 0, 0], sizes = [1, 1, 32, 64], strides = [1, 1, 1, 1]} : vector<1x25x32x64xbf16> to vector<1x1x32x64xbf16>
    %230 = vector.shape_cast %229 : vector<1x1x32x64xbf16> to vector<1x32x64xbf16>
    "tpu.trace_start"() <{level = 10 : i32, message = "gmk,gkn->gmn"}> : () -> ()
    %cst_30 = arith.constant dense<0.000000e+00> : vector<1x96x64xf32>
    %231 = tpu.matmul %228, %230, %cst_30 {dimension_numbers = #tpu.dot_dimension_numbers<[2], [1], [1], [2], [0, 0, 0, 1, 1, 2], [0], [0]>} : vector<1x96x32xbf16>, vector<1x32x64xbf16>, vector<1x96x64xf32> -> vector<1x96x64xf32>
    "tpu.trace_stop"() : () -> ()
    %232 = arith.addf %222, %231 : vector<1x96x64xf32>
    %233 = vector.extract_strided_slice %10 {offsets = [0, 13, 0], sizes = [1, 24, 32], strides = [1, 1, 1]} : vector<1x160x32xf32> to vector<1x24x32xf32>
    %234 = vector.extract_strided_slice %10 {offsets = [0, 53, 0], sizes = [1, 24, 32], strides = [1, 1, 1]} : vector<1x160x32xf32> to vector<1x24x32xf32>
    %235 = vector.extract_strided_slice %10 {offsets = [0, 93, 0], sizes = [1, 24, 32], strides = [1, 1, 1]} : vector<1x160x32xf32> to vector<1x24x32xf32>
    %236 = vector.extract_strided_slice %10 {offsets = [0, 133, 0], sizes = [1, 24, 32], strides = [1, 1, 1]} : vector<1x160x32xf32> to vector<1x24x32xf32>
    %237 = tpu.concatenate %233, %234, %235, %236 in 1 : vector<1x24x32xf32>, vector<1x24x32xf32>, vector<1x24x32xf32>, vector<1x24x32xf32> -> vector<1x96x32xf32>
    %238 = arith.truncf %237 : vector<1x96x32xf32> to vector<1x96x32xbf16>
    %239 = vector.extract_strided_slice %13 {offsets = [0, 22, 0, 0], sizes = [1, 1, 32, 64], strides = [1, 1, 1, 1]} : vector<1x25x32x64xbf16> to vector<1x1x32x64xbf16>
    %240 = vector.shape_cast %239 : vector<1x1x32x64xbf16> to vector<1x32x64xbf16>
    "tpu.trace_start"() <{level = 10 : i32, message = "gmk,gkn->gmn"}> : () -> ()
    %cst_31 = arith.constant dense<0.000000e+00> : vector<1x96x64xf32>
    %241 = tpu.matmul %238, %240, %cst_31 {dimension_numbers = #tpu.dot_dimension_numbers<[2], [1], [1], [2], [0, 0, 0, 1, 1, 2], [0], [0]>} : vector<1x96x32xbf16>, vector<1x32x64xbf16>, vector<1x96x64xf32> -> vector<1x96x64xf32>
    "tpu.trace_stop"() : () -> ()
    %242 = arith.addf %232, %241 : vector<1x96x64xf32>
    %243 = vector.extract_strided_slice %10 {offsets = [0, 53, 0], sizes = [1, 24, 32], strides = [1, 1, 1]} : vector<1x160x32xf32> to vector<1x24x32xf32>
    %244 = vector.extract_strided_slice %10 {offsets = [0, 14, 0], sizes = [1, 24, 32], strides = [1, 1, 1]} : vector<1x160x32xf32> to vector<1x24x32xf32>
    %245 = vector.extract_strided_slice %10 {offsets = [0, 133, 0], sizes = [1, 24, 32], strides = [1, 1, 1]} : vector<1x160x32xf32> to vector<1x24x32xf32>
    %246 = vector.extract_strided_slice %10 {offsets = [0, 94, 0], sizes = [1, 24, 32], strides = [1, 1, 1]} : vector<1x160x32xf32> to vector<1x24x32xf32>
    %247 = tpu.concatenate %243, %244, %245, %246 in 1 : vector<1x24x32xf32>, vector<1x24x32xf32>, vector<1x24x32xf32>, vector<1x24x32xf32> -> vector<1x96x32xf32>
    %248 = arith.truncf %247 : vector<1x96x32xf32> to vector<1x96x32xbf16>
    %249 = vector.extract_strided_slice %13 {offsets = [0, 23, 0, 0], sizes = [1, 1, 32, 64], strides = [1, 1, 1, 1]} : vector<1x25x32x64xbf16> to vector<1x1x32x64xbf16>
    %250 = vector.shape_cast %249 : vector<1x1x32x64xbf16> to vector<1x32x64xbf16>
    "tpu.trace_start"() <{level = 10 : i32, message = "gmk,gkn->gmn"}> : () -> ()
    %cst_32 = arith.constant dense<0.000000e+00> : vector<1x96x64xf32>
    %251 = tpu.matmul %248, %250, %cst_32 {dimension_numbers = #tpu.dot_dimension_numbers<[2], [1], [1], [2], [0, 0, 0, 1, 1, 2], [0], [0]>} : vector<1x96x32xbf16>, vector<1x32x64xbf16>, vector<1x96x64xf32> -> vector<1x96x64xf32>
    "tpu.trace_stop"() : () -> ()
    %252 = arith.addf %242, %251 : vector<1x96x64xf32>
    %253 = vector.extract_strided_slice %10 {offsets = [0, 14, 0], sizes = [1, 24, 32], strides = [1, 1, 1]} : vector<1x160x32xf32> to vector<1x24x32xf32>
    %254 = vector.extract_strided_slice %10 {offsets = [0, 54, 0], sizes = [1, 24, 32], strides = [1, 1, 1]} : vector<1x160x32xf32> to vector<1x24x32xf32>
    %255 = vector.extract_strided_slice %10 {offsets = [0, 94, 0], sizes = [1, 24, 32], strides = [1, 1, 1]} : vector<1x160x32xf32> to vector<1x24x32xf32>
    %256 = vector.extract_strided_slice %10 {offsets = [0, 134, 0], sizes = [1, 24, 32], strides = [1, 1, 1]} : vector<1x160x32xf32> to vector<1x24x32xf32>
    %257 = tpu.concatenate %253, %254, %255, %256 in 1 : vector<1x24x32xf32>, vector<1x24x32xf32>, vector<1x24x32xf32>, vector<1x24x32xf32> -> vector<1x96x32xf32>
    %258 = arith.truncf %257 : vector<1x96x32xf32> to vector<1x96x32xbf16>
    %259 = vector.extract_strided_slice %13 {offsets = [0, 24, 0, 0], sizes = [1, 1, 32, 64], strides = [1, 1, 1, 1]} : vector<1x25x32x64xbf16> to vector<1x1x32x64xbf16>
    %260 = vector.shape_cast %259 : vector<1x1x32x64xbf16> to vector<1x32x64xbf16>
    "tpu.trace_start"() <{level = 10 : i32, message = "gmk,gkn->gmn"}> : () -> ()
    %cst_33 = arith.constant dense<0.000000e+00> : vector<1x96x64xf32>
    %261 = tpu.matmul %258, %260, %cst_33 {dimension_numbers = #tpu.dot_dimension_numbers<[2], [1], [1], [2], [0, 0, 0, 1, 1, 2], [0], [0]>} : vector<1x96x32xbf16>, vector<1x32x64xbf16>, vector<1x96x64xf32> -> vector<1x96x64xf32>
    "tpu.trace_stop"() : () -> ()
    %262 = arith.addf %252, %261 : vector<1x96x64xf32>
    %263 = vector.shape_cast %262 : vector<1x96x64xf32> to vector<1x4x24x64xf32>
    %cst_34 = arith.constant dense<0xFF800000> : vector<1x24x64xf32>
    %264 = vector.multi_reduction <maximumf>, %263, %cst_34 [1] : vector<1x4x24x64xf32> to vector<1x24x64xf32>
    %c0_35 = arith.constant 0 : index
    %c0_36 = arith.constant 0 : index
    %265 = vector.load %arg5[%c0_35, %c0_36] : memref<1x64xf32, #tpu.memory_space<vmem>>, vector<1x64xf32>
    %266 = vector.shape_cast %265 : vector<1x64xf32> to vector<1x1x64xf32>
    %267 = vector.broadcast %266 : vector<1x1x64xf32> to vector<1x24x64xf32>
    %268 = arith.addf %264, %267 : vector<1x24x64xf32>
    %cst_37 = arith.constant 0.000000e+00 : f32
    %269 = vector.broadcast %cst_37 : f32 to vector<1x24x64xf32>
    %270 = arith.maximumf %268, %269 : vector<1x24x64xf32>
    %271 = arith.truncf %270 : vector<1x24x64xf32> to vector<1x24x64xbf16>
    %c0_38 = arith.constant 0 : index
    %c0_39 = arith.constant 0 : index
    %c0_40 = arith.constant 0 : index
    %272 = vector.load %arg6[%c0_38, %c0_39, %c0_40] : memref<1x24x64xbf16, #tpu.memory_space<vmem>>, vector<1x24x64xbf16>
    tpu.vector_store %arg6[%c0_38, %c0_39, %c0_40], %271 {strides = array<i32>} : memref<1x24x64xbf16, #tpu.memory_space<vmem>>, vector<1x24x64xbf16>,
    return
  }
  func.func @transform_0(%arg0: i32) -> (i32, i32) {
    %c0_i32 = arith.constant 0 : i32
    %c0_i32_0 = arith.constant 0 : i32
    return %arg0, %c0_i32 : i32, i32
  }
  func.func @transform_1(%arg0: i32) -> (i32, i32) {
    %c0_i32 = arith.constant 0 : i32
    %c0_i32_0 = arith.constant 0 : i32
    %c0_i32_1 = arith.constant 0 : i32
    return %c0_i32, %c0_i32_0 : i32, i32
  }
  func.func @transform_2(%arg0: i32) -> (i32, i32) {
    %c0_i32 = arith.constant 0 : i32
    %c0_i32_0 = arith.constant 0 : i32
    %c0_i32_1 = arith.constant 0 : i32
    return %c0_i32, %c0_i32_0 : i32, i32
  }
  func.func @transform_3(%arg0: i32) -> (i32, i32) {
    %c0_i32 = arith.constant 0 : i32
    %c0_i32_0 = arith.constant 0 : i32
    %c0_i32_1 = arith.constant 0 : i32
    return %c0_i32, %c0_i32_0 : i32, i32
  }
  func.func @transform_4(%arg0: i32) -> (i32, i32) {
    %c0_i32 = arith.constant 0 : i32
    %c0_i32_0 = arith.constant 0 : i32
    %c0_i32_1 = arith.constant 0 : i32
    return %c0_i32, %c0_i32_0 : i32, i32
  }
  func.func @transform_5(%arg0: i32) -> (i32, i32, i32) {
    %c0_i32 = arith.constant 0 : i32
    %c0_i32_0 = arith.constant 0 : i32
    %c0_i32_1 = arith.constant 0 : i32
    return %arg0, %c0_i32, %c0_i32_0 : i32, i32, i32
  }
}

module attributes {stable_mosaic.version = 11 : i64} {
  func.func @mlp_kernel(%arg0: i32, %arg1: memref<8x1024xbf16, #tpu.memory_space<vmem>>, %arg2: memref<1024x256xbf16, #tpu.memory_space<vmem>>, %arg3: memref<1x256xf32, #tpu.memory_space<vmem>>, %arg4: memref<256x128xbf16, #tpu.memory_space<vmem>>, %arg5: memref<1x128xf32, #tpu.memory_space<vmem>>, %arg6: memref<8x128xf32, #tpu.memory_space<vmem>>) attributes {dimension_semantics = [#tpu.dimension_semantics<parallel>], iteration_bounds = array<i64: 1>, scalar_prefetch = 0 : i64, scratch_operands = 0 : i64, tpu.core_type = #tpu.core_type<tc>, window_params = [{transform_indices = @transform_0, window_bounds = array<i64: 8, 1024>}, {pipeline_mode = #tpu.pipeline_mode<synchronous>, transform_indices = @transform_1, window_bounds = array<i64: 1024, 256>}, {pipeline_mode = #tpu.pipeline_mode<synchronous>, transform_indices = @transform_2, window_bounds = array<i64: 1, 256>}, {pipeline_mode = #tpu.pipeline_mode<synchronous>, transform_indices = @transform_3, window_bounds = array<i64: 256, 128>}, {pipeline_mode = #tpu.pipeline_mode<synchronous>, transform_indices = @transform_4, window_bounds = array<i64: 1, 128>}, {transform_indices = @transform_5, window_bounds = array<i64: 8, 128>}]} {
    %c0 = arith.constant 0 : index
    %c0_0 = arith.constant 0 : index
    %0 = vector.load %arg1[%c0, %c0_0] : memref<8x1024xbf16, #tpu.memory_space<vmem>>, vector<8x1024xbf16>
    %c0_1 = arith.constant 0 : index
    %c0_2 = arith.constant 0 : index
    %1 = vector.load %arg2[%c0_1, %c0_2] : memref<1024x256xbf16, #tpu.memory_space<vmem>>, vector<1024x256xbf16>
    %cst = arith.constant dense<0.000000e+00> : vector<8x256xf32>
    %2 = tpu.matmul %0, %1, %cst {dimension_numbers = #tpu.dot_dimension_numbers<[1], [0], [0], [1], [0, 0, 1, 1], [], []>} : vector<8x1024xbf16>, vector<1024x256xbf16>, vector<8x256xf32> -> vector<8x256xf32>
    %c0_3 = arith.constant 0 : index
    %c0_4 = arith.constant 0 : index
    %3 = vector.load %arg3[%c0_3, %c0_4] : memref<1x256xf32, #tpu.memory_space<vmem>>, vector<1x256xf32>
    %4 = vector.broadcast %3 : vector<1x256xf32> to vector<8x256xf32>
    %5 = arith.addf %2, %4 : vector<8x256xf32>
    %cst_5 = arith.constant 0.000000e+00 : f32
    %6 = vector.broadcast %cst_5 : f32 to vector<8x256xf32>
    %7 = arith.maximumf %5, %6 : vector<8x256xf32>
    %8 = arith.truncf %7 : vector<8x256xf32> to vector<8x256xbf16>
    %c0_6 = arith.constant 0 : index
    %c0_7 = arith.constant 0 : index
    %9 = vector.load %arg4[%c0_6, %c0_7] : memref<256x128xbf16, #tpu.memory_space<vmem>>, vector<256x128xbf16>
    %cst_8 = arith.constant dense<0.000000e+00> : vector<8x128xf32>
    %10 = tpu.matmul %8, %9, %cst_8 {dimension_numbers = #tpu.dot_dimension_numbers<[1], [0], [0], [1], [0, 0, 1, 1], [], []>} : vector<8x256xbf16>, vector<256x128xbf16>, vector<8x128xf32> -> vector<8x128xf32>
    %c0_9 = arith.constant 0 : index
    %c0_10 = arith.constant 0 : index
    %11 = vector.load %arg5[%c0_9, %c0_10] : memref<1x128xf32, #tpu.memory_space<vmem>>, vector<1x128xf32>
    %12 = vector.broadcast %11 : vector<1x128xf32> to vector<8x128xf32>
    %13 = arith.addf %10, %12 : vector<8x128xf32>
    %c0_11 = arith.constant 0 : index
    %c0_12 = arith.constant 0 : index
    %14 = vector.load %arg6[%c0_11, %c0_12] : memref<8x128xf32, #tpu.memory_space<vmem>>, vector<8x128xf32>
    tpu.vector_store %arg6[%c0_11, %c0_12], %13 {strides = array<i32>} : memref<8x128xf32, #tpu.memory_space<vmem>>, vector<8x128xf32>,
    return
  }
  func.func @transform_0(%arg0: i32) -> (i32, i32) {
    %c0_i32 = arith.constant 0 : i32
    %c0_i32_0 = arith.constant 0 : i32
    return %arg0, %c0_i32 : i32, i32
  }
  func.func @transform_1(%arg0: i32) -> (i32, i32) {
    %c0_i32 = arith.constant 0 : i32
    %c0_i32_0 = arith.constant 0 : i32
    %c0_i32_1 = arith.constant 0 : i32
    return %c0_i32, %c0_i32_0 : i32, i32
  }
  func.func @transform_2(%arg0: i32) -> (i32, i32) {
    %c0_i32 = arith.constant 0 : i32
    %c0_i32_0 = arith.constant 0 : i32
    %c0_i32_1 = arith.constant 0 : i32
    return %c0_i32, %c0_i32_0 : i32, i32
  }
  func.func @transform_3(%arg0: i32) -> (i32, i32) {
    %c0_i32 = arith.constant 0 : i32
    %c0_i32_0 = arith.constant 0 : i32
    %c0_i32_1 = arith.constant 0 : i32
    return %c0_i32, %c0_i32_0 : i32, i32
  }
  func.func @transform_4(%arg0: i32) -> (i32, i32) {
    %c0_i32 = arith.constant 0 : i32
    %c0_i32_0 = arith.constant 0 : i32
    %c0_i32_1 = arith.constant 0 : i32
    return %c0_i32, %c0_i32_0 : i32, i32
  }
  func.func @transform_5(%arg0: i32) -> (i32, i32) {
    %c0_i32 = arith.constant 0 : i32
    %c0_i32_0 = arith.constant 0 : i32
    return %arg0, %c0_i32 : i32, i32
  }
}

</mosaic_0001>

<bundles_post_ra>
// kernel: cnn_forward_pallas.2
= control target key start
LH: loop header
LB: loop body
LE: loop exit
PB: predicated region body
PF: predicated region fallthrough
CT: control target
= control target key end

     0   :  { %s6083_s18 = smov 0   ;;  %s7689_s0 = inlined_call_operand.vmem [shape: bf16[1280,32], index: 0, kind: input, shape index: {}]   ;;  %s7690_s1 = inlined_call_operand.vmem [shape: bf16[32,32], index: 1, kind: input, shape index: {}]   ;;  %s7691_s2 = inlined_call_operand.vmem [shape: f32[1,32], index: 2, kind: input, shape index: {}]   ;;  %s7692_s3 = inlined_call_operand.vmem [shape: bf16[800,64], index: 3, kind: input, shape index: {}]   ;;  %s7693_s4 = inlined_call_operand.vmem [shape: f32[1,64], index: 4, kind: input, shape index: {}]   ;;  %s7694_s5 = inlined_call_operand.vmem [shape: bf16[2,24,64], index: 5, kind: output, shape index: {}]  }
   0x1 LB: > { %s6089_s19 = sadd.s32 4294967295, %s6051_s18   ;;  %p4635_p0 = scmp.ge.s32.totalorder %s6051_s18, 1  ;;  %s6051_s18 = sphi %s6083_s18, %s15_s18  }
   0x2   : > { %p188_p1 = scmp.lt.s32.totalorder %s6051_s18, 3 }
   0x4   : > { %p189_p2 = pnand %p4635_p0, %p188_p1 }
   0x6   : > { %192 = sbr.rel (%p189_p2) target bundleno = 1008 (0x3f0), region = 40 }
   0xd   : > { %v5953_v0 = vld [vmem:[%s7690_s1] sm:$0xff]   ;;  %s216_s22 = smul.u32 80, %s6089_s19  ;;  %v5954_v1 = vld [vmem:[%s7690_s1 + $0x8] sm:$0xff]   ;;  %vm524_vm0 = vcmask 261120   ;;  %v5995_v46 = vld [vmem:[%s7692_s3 + $0x10] sm:$0xff]   ;;  %vm1295_vm1 = vcmask 1046528  }
   0xe   : > { %5172 = vmatprep.subr.bf16.mxu0 %v5953_v0  ;;  %v5996_v49 = vld [vmem:[%s7692_s3 + $0x18] sm:$0xff]   ;;  %v5997_v60 = vld [vmem:[%s7692_s3 + $0x90] sm:$0xff]   ;;  %vm2004_vm2 = vcmask 1041408   ;;  %vm1705_vm3 = vcmask 1045504   ;;  %vm2142_vm4 = vcmask 1040384   ;;  %vm3257_vm5 = vcmask 1043456  }
   0xf   : > { %p217_p3 = scmp.lt.s32.totalorder %s216_s22, 159  ;;  %5173 = vmatpush3.bf16.msra.mxu0 %v5953_v0  ;;  %5400 = vmatprep.subr.bf16.mxu1 %v5997_v60  ;;  %v5998_v0 = vld [vmem:[%s7692_s3 + $0x98] sm:$0xff]   ;;  %vm3396_vm6 = vcmask 1042432   ;;  %vm4524_vm7 = vcmask 523264   ;;  %p222_p4 = scmp.lt.s32.totalorder %s6089_s19, 1  ;;  %vm4572_vm8 = vcmask 519168  }
  0x10   : > { %5174 = vmatprep.subr.bf16.mxu0 %v5954_v1  ;;  %5401 = vmatpush3.bf16.msra.mxu1 %v5997_v60 }
  0x11   : > { %s7882_s22 = smov (!%p217_p3, %s216_s22), 159  ;;  %5402 = vmatprep.subr.bf16.mxu1 %v5998_v0  ;;  %s7884_s19 = smov (!%p222_p4, %s6089_s19), 1 }
  0x12   : > { %s4636_s25 = sshll.u32 %s7882_s22, 2  ;;  %s5944_s16 = smul.u32 12, %s7884_s19 }
  0x13   : > { %5175 = vmatpush3.bf16.msra.mxu0 %v5954_v1  ;;  %s6103_s28 = scalar_lea.vmem %s7689_s0, %s4636_s25 }
  0x14   : > { %v5955_v2 = vld [vmem:[%s6103_s28] sm:$0xff]   ;;  %v5956_v3 = vld [vmem:[%s6103_s28 + $0x8] sm:$0xff]   ;;  %v5957_v4 = vld [vmem:[%s6103_s28 + $0x10] sm:$0xff]   ;;  %5256 = vmatprep.subr.bf16.mxu0 %v5995_v46  ;;  %5403 = vmatpush3.bf16.msra.mxu1 %v5998_v0  ;;  %s226_s21 = scalar_lea.vmem %s7694_s5, %s5944_s16 }
  0x15   : > { %5176 = vmatprep.mubr.msk.bf16.mxu0 %vm524_vm0, %v5955_v2  ;;  %v5958_v5 = vld [vmem:[%s6103_s28 + $0x18] sm:$0xff]   ;;  %v5959_v6 = vld [vmem:[%s6103_s28 + $0x20] sm:$0xff]   ;;  %v5960_v7 = vld [vmem:[%s6103_s28 + $0x28] sm:$0xff]  }
  0x16   : > { %5177 = vmatmul.mubr.msk.bf16.vlgmr.msra.gmra.mrb[0].mxu0 %vm524_vm0, %v5956_v3  ;;  %v5961_v8 = vld [vmem:[%s6103_s28 + $0x30] sm:$0xff]   ;;  %v5962_v9 = vld [vmem:[%s6103_s28 + $0x38] sm:$0xff]   ;;  %v5963_v10 = vld [vmem:[%s6103_s28 + $0x40] sm:$0xff]  }
  0x17   : > { %5180 = vmatprep.mubr.msk.bf16.mxu0 %vm524_vm0, %v5957_v4  ;;  %v5964_v11 = vld [vmem:[%s6103_s28 + $0x48] sm:$0xff]   ;;  %v5965_v12 = vld [vmem:[%s6103_s28 + $0x50] sm:$0xff]   ;;  %v5966_v13 = vld [vmem:[%s6103_s28 + $0x58] sm:$0xff]   ;;  %5257 = vmatpush3.bf16.msra.mxu0 %v5995_v46 }
  0x18   : > { %v5967_v14 = vld [vmem:[%s6103_s28 + $0x60] sm:$0xff]   ;;  %v5968_v15 = vld [vmem:[%s6103_s28 + $0x68] sm:$0xff]   ;;  %v5969_v16 = vld [vmem:[%s6103_s28 + $0x70] sm:$0xff]   ;;  %5258 = vmatprep.subr.bf16.mxu0 %v5996_v49 }
  0x19   : > { %v5970_v17 = vld [vmem:[%s6103_s28 + $0x78] sm:$0xff]   ;;  %v5971_v18 = vld [vmem:[%s6103_s28 + $0x80] sm:$0xff]   ;;  %v5972_v19 = vld [vmem:[%s6103_s28 + $0x88] sm:$0xff]  }
  0x1a   : > { %v5973_v20 = vld [vmem:[%s6103_s28 + $0x90] sm:$0xff]   ;;  %v5974_v21 = vld [vmem:[%s6103_s28 + $0x98] sm:$0xff]   ;;  %v5975_v22 = vld [vmem:[%s6103_s28 + $0xa0] sm:$0xff]  }
  0x1b   : > { %v5976_v23 = vld [vmem:[%s6103_s28 + $0xa8] sm:$0xff]   ;;  %v5977_v24 = vld [vmem:[%s6103_s28 + $0xb0] sm:$0xff]   ;;  %v5978_v25 = vld [vmem:[%s6103_s28 + $0xb8] sm:$0xff]   ;;  %5259 = vmatpush3.bf16.msra.mxu0 %v5996_v49 }
  0x1c   : > { %v5979_v26 = vld [vmem:[%s6103_s28 + $0xc0] sm:$0xff]   ;;  %v5980_v27 = vld [vmem:[%s6103_s28 + $0xc8] sm:$0xff]   ;;  %v5981_v28 = vld [vmem:[%s6103_s28 + $0xd0] sm:$0xff]  }
  0x1d   : > { %v5982_v29 = vld [vmem:[%s6103_s28 + $0xd8] sm:$0xff]   ;;  %v5983_v30 = vld [vmem:[%s6103_s28 + $0xe0] sm:$0xff]   ;;  %v5984_v31 = vld [vmem:[%s6103_s28 + $0xe8] sm:$0xff]  }
  0x1e   : > { %5181 = vmatmul.mubr.msk.bf16.gmra.mrb[4].mxu0 %vm524_vm0, %v5958_v5  ;;  %v5985_v32 = vld [vmem:[%s6103_s28 + $0xf0] sm:$0xff]   ;;  %v5986_v33 = vld [vmem:[%s6103_s28 + $0xf8] sm:$0xff]   ;;  %v5987_v34 = vld [vmem:[%s6103_s28 + $0x100] sm:$0xff]  }
  0x1f   : > { %5184 = vmatprep.mubr.msk.bf16.mxu0 %vm524_vm0, %v5959_v6  ;;  %v5988_v35 = vld [vmem:[%s6103_s28 + $0x108] sm:$0xff]   ;;  %v5989_v36 = vld [vmem:[%s6103_s28 + $0x110] sm:$0xff]   ;;  %v5990_v37 = vld [vmem:[%s6103_s28 + $0x118] sm:$0xff]  }
  0x20   : > { %v5991_v38 = vld [vmem:[%s6103_s28 + $0x120] sm:$0xff]   ;;  %v5992_v39 = vld [vmem:[%s6103_s28 + $0x128] sm:$0xff]   ;;  %v5993_v40 = vld [vmem:[%s6103_s28 + $0x130] sm:$0xff]  }
  0x21   : > { %v5994_v41 = vld [vmem:[%s6103_s28 + $0x138] sm:$0xff]   ;;  %v6218_v2 = vld [vmem:[%s7692_s3 + $0xa0] sm:$0xff]  }
  0x22   : > { %5416 = vmatprep.subr.bf16.mxu1 %v6218_v2 }
  0x26   : > { %5185 = vmatmul.mubr.msk.bf16.gmra.mrb[8].mxu0 %vm524_vm0, %v5960_v7 }
  0x27   : > { %5188 = vmatprep.mubr.msk.bf16.mxu0 %vm524_vm0, %v5961_v8 }
  0x2e   : > { %5189 = vmatmul.mubr.msk.bf16.gmra.mrb[12].mxu0 %vm524_vm0, %v5962_v9 }
  0x2f   : > { %5192 = vmatprep.mubr.msk.bf16.mxu0 %vm524_vm0, %v5963_v10 }
  0x36   : > { %5193 = vmatmul.mubr.msk.bf16.gmra.mrb[16].mxu0 %vm524_vm0, %v5964_v11 }
  0x37   : > { %5196 = vmatprep.mubr.msk.bf16.mxu0 %vm524_vm0, %v5965_v12 }
  0x3e   : > { %5197 = vmatmul.mubr.msk.bf16.gmra.mrb[20].mxu0 %vm524_vm0, %v5966_v13 }
  0x3f   : > { %5200 = vmatprep.mubr.msk.bf16.mxu0 %vm524_vm0, %v5967_v14 }
  0x46   : > { %5201 = vmatmul.mubr.msk.bf16.gmra.mrb[24].mxu0 %vm524_vm0, %v5968_v15  ;;  %v6246_v15 = vld [vmem:[%s7692_s3] sm:$0xff]  }
  0x47   : > { %5204 = vmatprep.mubr.msk.bf16.mxu0 %vm524_vm0, %v5969_v16  ;;  %5272 = vmatprep.subr.bf16.mxu0 %v6246_v15 }
  0x4e   : > { %5205 = vmatmul.mubr.msk.bf16.gmra.mrb[28].mxu0 %vm524_vm0, %v5970_v17 }
  0x4f   : > { %5208 = vmatprep.mubr.msk.bf16.mxu0 %vm524_vm0, %v5971_v18 }
  0x56   : > { %5209 = vmatmul.mubr.msk.bf16.gmra.mrb[32].mxu0 %vm524_vm0, %v5972_v19 }
  0x57   : > { %5212 = vmatprep.mubr.msk.bf16.mxu0 %vm524_vm0, %v5973_v20 }
  0x5e   : > { %5213 = vmatmul.mubr.msk.bf16.gmra.mrb[36].mxu0 %vm524_vm0, %v5974_v21 }
  0x5f   : > { %5216 = vmatprep.mubr.msk.bf16.mxu0 %vm524_vm0, %v5975_v22 }
  0x66   : > { %5217 = vmatmul.mubr.msk.bf16.gmra.mrb[40].mxu0 %vm524_vm0, %v5976_v23 }
  0x67   : > { %5220 = vmatprep.mubr.msk.bf16.mxu0 %vm524_vm0, %v5977_v24 }
  0x6e   : > { %5221 = vmatmul.mubr.msk.bf16.gmra.mrb[44].mxu0 %vm524_vm0, %v5978_v25 }
  0x6f   : > { %5224 = vmatprep.mubr.msk.bf16.mxu0 %vm524_vm0, %v5979_v26 }
  0x76   : > { %5225 = vmatmul.mubr.msk.bf16.gmra.mrb[48].mxu0 %vm524_vm0, %v5980_v27 }
  0x77   : > { %5228 = vmatprep.mubr.msk.bf16.mxu0 %vm524_vm0, %v5981_v28 }
  0x7e   : > { %5229 = vmatmul.mubr.msk.bf16.gmra.mrb[52].mxu0 %vm524_vm0, %v5982_v29 }
  0x7f   : > { %5232 = vmatprep.mubr.msk.bf16.mxu0 %vm524_vm0, %v5983_v30 }
  0x86   : > { %5233 = vmatmul.mubr.msk.bf16.gmra.mrb[56].mxu0 %vm524_vm0, %v5984_v31 }
  0x87   : > { %5236 = vmatprep.mubr.msk.bf16.mxu0 %vm524_vm0, %v5985_v32 }
  0x8e   : > { %5237 = vmatmul.mubr.msk.bf16.gmra.mrb[60].mxu0 %vm524_vm0, %v5986_v33 }
  0x8f   : > { %5240 = vmatprep.mubr.msk.bf16.mxu0 %vm524_vm0, %v5987_v34 }
  0x96   : > { %5241 = vmatmul.mubr.msk.bf16.gmra.mrb[64].mxu0 %vm524_vm0, %v5988_v35 }
  0x97   : > { %5244 = vmatprep.mubr.msk.bf16.mxu0 %vm524_vm0, %v5989_v36 }
  0x9e   : > { %5245 = vmatmul.mubr.msk.bf16.gmra.mrb[68].mxu0 %vm524_vm0, %v5990_v37 }
  0x9f   : > { %5248 = vmatprep.mubr.msk.bf16.mxu0 %vm524_vm0, %v5991_v38 }
  0xa6   : > { %5249 = vmatmul.mubr.msk.bf16.gmra.mrb[72].mxu0 %vm524_vm0, %v5992_v39 }
  0xa7   : > { %5252 = vmatprep.mubr.msk.bf16.mxu0 %vm524_vm0, %v5993_v40 }
  0xae   : > { %5253 = vmatmul.mubr.msk.bf16.gmra.mrb[76].mxu0 %vm524_vm0, %v5994_v41 }
  0xe9   : > { %v5178_v42 = vpop.f32.mrb[0].mxu0 }
  0xea   : > { %v679_v43 = vpop.f32.mrb[1].mxu0  ;;  %v6222_v4 = vsel %vm524_vm0, %v5178_v42, -inf }
  0xeb   : > { %v5179_v44 = vpop.f32.mrb[2].mxu0  ;;  %v6228_v7 = vsel %vm524_vm0, %v679_v43, -inf }
  0xec   : > { %v682_v45 = vpop.f32.mrb[3].mxu0  ;;  %v6236_v11 = vsel %vm524_vm0, %v5179_v44, -inf }
  0xed   : > { %v6249_v16 = vsel %vm524_vm0, %v682_v45, -inf }
  0xf1   : > { %v5182_v47 = vpop.f32.mrb[4].mxu0 }
  0xf2   : > { %v695_v48 = vpop.f32.mrb[5].mxu0  ;;  %v6260_v21 = vsel %vm524_vm0, %v5182_v47, -inf }
  0xf3   : > { %v5183_v50 = vpop.f32.mrb[6].mxu0  ;;  %v6266_v24 = vsel %vm524_vm0, %v695_v48, -inf }
  0xf4   : > { %v698_v51 = vpop.f32.mrb[7].mxu0  ;;  %v6274_v28 = vsel %vm524_vm0, %v5183_v50, -inf }
  0xf5   : > { %v6282_v32 = vsel %vm524_vm0, %v698_v51, -inf }
  0xf9   : > { %v5186_v52 = vpop.f32.mrb[8].mxu0 }
  0xfa   : > { %v711_v53 = vpop.f32.mrb[9].mxu0  ;;  %v6292_v37 = vsel %vm524_vm0, %v5186_v52, -inf }
  0xfb   : > { %v5187_v54 = vpop.f32.mrb[10].mxu0  ;;  %v6298_v40 = vsel %vm524_vm0, %v711_v53, -inf }
  0xfc   : > { %v6191_v55 = vpop.f32.mrb[11].mxu0  ;;  %v6306_v44 = vsel %vm524_vm0, %v5187_v54, -inf }
  0xfd   : > { %v6315_v48 = vsel %vm524_vm0, %v6191_v55, -inf }
 0x101   : > { %v6193_v56 = vpop.f32.mrb[12].mxu0 }
 0x102   : > { %v6195_v57 = vpop.f32.mrb[13].mxu0  ;;  %v6326_v53 = vsel %vm524_vm0, %v6193_v56, -inf }
 0x103   : > { %v6197_v58 = vpop.f32.mrb[14].mxu0  ;;  %v6333_v55 = vsel %vm524_vm0, %v6195_v57, -inf }
 0x104   : > { %v6199_v59 = vpop.f32.mrb[15].mxu0 }
 0x105   : > { %v6351_v57 = vsel %vm524_vm0, %v6199_v59, -inf }
 0x109   : > { %v6204_v61 = vpop.f32.mrb[16].mxu0 }
 0x10a   : > { %v6206_v62 = vpop.f32.mrb[17].mxu0 }
 0x10b   : > { %v6208_v63 = vpop.f32.mrb[18].mxu0  ;;  %v6369_v59 = vsel %vm524_vm0, %v6206_v62, -inf }
 0x10c   : > { %v6213_v1 = vpop.f32.mrb[19].mxu0 }
 0x10d   : > { %v6387_v62 = vsel %vm524_vm0, %v6213_v1, -inf }
 0x111   : > { %v5198_v3 = vpop.f32.mrb[20].mxu0 }
 0x112   : > { %v6225_v5 = vsel %vm524_vm0, %v5198_v3, -inf  ;;  %v759_v6 = vpop.f32.mrb[21].mxu0 }
 0x113   : > { %v1014_v8 = vmax.f32 %v6222_v4, %v6225_v5  ;;  %v6233_v9 = vsel %vm524_vm0, %v759_v6, -inf  ;;  %v5199_v10 = vpop.f32.mrb[22].mxu0 }
 0x114   : > { %v1000_v12 = vmax.f32 %v6228_v7, %v6233_v9  ;;  %v6241_v13 = vsel %vm524_vm0, %v5199_v10, -inf  ;;  %v762_v14 = vpop.f32.mrb[23].mxu0  ;;  %v6342_v10 = vsel %vm524_vm0, %v6197_v58, -inf }
 0x115   : > { %v1021_v17 = vmax.f32 %v6236_v11, %v6241_v13  ;;  %v6254_v18 = vsel %vm524_vm0, %v762_v14, -inf }
 0x116   : > { %v1007_v19 = vmax.f32 %v6249_v16, %v6254_v18 }
 0x119   : > { %v5202_v20 = vpop.f32.mrb[24].mxu0 }
 0x11a   : > { %v6263_v22 = vsel %vm524_vm0, %v5202_v20, -inf  ;;  %v775_v23 = vpop.f32.mrb[25].mxu0 }
 0x11b   : > { %v1042_v25 = vmax.f32 %v6260_v21, %v6263_v22  ;;  %v6271_v26 = vsel %vm524_vm0, %v775_v23, -inf  ;;  %v5203_v27 = vpop.f32.mrb[26].mxu0 }
 0x11c   : > { %v1028_v29 = vmax.f32 %v6266_v24, %v6271_v26  ;;  %v6279_v30 = vsel %vm524_vm0, %v5203_v27, -inf  ;;  %v778_v31 = vpop.f32.mrb[27].mxu0 }
 0x11d   : > { %v1049_v33 = vmax.f32 %v6274_v28, %v6279_v30  ;;  %v6287_v34 = vsel %vm524_vm0, %v778_v31, -inf }
 0x11e   : > { %v1035_v35 = vmax.f32 %v6282_v32, %v6287_v34 }
 0x121   : > { %v5206_v36 = vpop.f32.mrb[28].mxu0 }
 0x122   : > { %v6295_v38 = vsel %vm524_vm0, %v5206_v36, -inf  ;;  %v791_v39 = vpop.f32.mrb[29].mxu0  ;;  %v6362_v36 = vsel %vm524_vm0, %v6204_v61, -inf }
 0x123   : > { %v1070_v41 = vmax.f32 %v6292_v37, %v6295_v38  ;;  %v6303_v42 = vsel %vm524_vm0, %v791_v39, -inf  ;;  %v5207_v43 = vpop.f32.mrb[30].mxu0 }
 0x124   : > { %v1056_v45 = vmax.f32 %v6298_v40, %v6303_v42  ;;  %v6311_v46 = vsel %vm524_vm0, %v5207_v43, -inf  ;;  %v794_v47 = vpop.f32.mrb[31].mxu0 }
 0x125   : > { %v1077_v49 = vmax.f32 %v6306_v44, %v6311_v46  ;;  %v6320_v50 = vsel %vm524_vm0, %v794_v47, -inf }
 0x126   : > { %v1063_v51 = vmax.f32 %v6315_v48, %v6320_v50 }
 0x129   : > { %v5210_v52 = vpop.f32.mrb[32].mxu0 }
 0x12a   : > { %v6329_v54 = vsel %vm524_vm0, %v5210_v52, -inf  ;;  %v807_v60 = vpop.f32.mrb[33].mxu0 }
 0x12b   : > { %v1098_v0 = vmax.f32 %v6326_v53, %v6329_v54  ;;  %v6338_v3 = vsel %vm524_vm0, %v807_v60, -inf  ;;  %v5211_v6 = vpop.f32.mrb[34].mxu0 }
 0x12c   : > { %v1084_v56 = vmax.f32 %v6333_v55, %v6338_v3  ;;  %v6347_v14 = vsel %vm524_vm0, %v5211_v6, -inf  ;;  %v810_v20 = vpop.f32.mrb[35].mxu0  ;;  %v6378_v6 = vsel %vm524_vm0, %v6208_v63, -inf }
 0x12d   : > { %v6356_v27 = vsel %vm524_vm0, %v810_v20, -inf }
 0x12e   : > { %v7749_v54 = vmax.f32 %v6351_v57, %v6356_v27 }
 0x131   : > { %v5214_v31 = vpop.f32.mrb[36].mxu0 }
 0x132   : > { %v6365_v39 = vsel %vm524_vm0, %v5214_v31, -inf  ;;  %v823_v43 = vpop.f32.mrb[37].mxu0 }
 0x133   : > { %v1126_v47 = vmax.f32 %v6362_v36, %v6365_v39  ;;  %v6374_v52 = vsel %vm524_vm0, %v823_v43, -inf  ;;  %v5215_v60 = vpop.f32.mrb[38].mxu0 }
 0x134   : > { %v1112_v61 = vmax.f32 %v6369_v59, %v6374_v52  ;;  %v6383_v20 = vsel %vm524_vm0, %v5215_v60, -inf  ;;  %v826_v31 = vpop.f32.mrb[39].mxu0 }
 0x135   : > { %v1133_v36 = vmax.f32 %v6378_v6, %v6383_v20  ;;  %v1118_v39 = vsel %vm524_vm0, %v826_v31, -inf }
 0x136   : > { %v1119_v43 = vmax.f32 %v6387_v62, %v1118_v39 }
 0x139   : > { %v5218_v63 = vpop.f32.mrb[40].mxu0 }
 0x13a   : > { %v1015_v58 = vsel %vm524_vm0, %v5218_v63, -inf  ;;  %v839_v23 = vpop.f32.mrb[41].mxu0 }
 0x13b   : > { %v6397_v59 = vmax.f32 %v1014_v8, %v1015_v58  ;;  %v1001_v52 = vsel %vm524_vm0, %v839_v23, -inf  ;;  %v5219_v1 = vpop.f32.mrb[42].mxu0 }
 0x13c   : > { %v6403_v60 = vmax.f32 %v1000_v12, %v1001_v52  ;;  %v1022_v6 = vsel %vm524_vm0, %v5219_v1, -inf  ;;  %v842_v20 = vpop.f32.mrb[43].mxu0 }
 0x13d   : > { %v6409_v31 = vmax.f32 %v1021_v17, %v1022_v6  ;;  %v1008_v4 = vsel %vm524_vm0, %v842_v20, -inf }
 0x13e   : > { %v6415_v5 = vmax.f32 %v1007_v19, %v1008_v4 }
 0x141   : > { %v5222_v8 = vpop.f32.mrb[44].mxu0 }
 0x142   : > { %v1043_v7 = vsel %vm524_vm0, %v5222_v8, -inf  ;;  %v855_v9 = vpop.f32.mrb[45].mxu0 }
 0x143   : > { %v6421_v12 = vmax.f32 %v1042_v25, %v1043_v7  ;;  %v1029_v11 = vsel %vm524_vm0, %v855_v9, -inf  ;;  %v5223_v13 = vpop.f32.mrb[46].mxu0 }
 0x144   : > { %v6427_v17 = vmax.f32 %v1028_v29, %v1029_v11  ;;  %v1050_v16 = vsel %vm524_vm0, %v5223_v13, -inf  ;;  %v858_v18 = vpop.f32.mrb[47].mxu0 }
 0x145   : > { %v6433_v19 = vmax.f32 %v1049_v33, %v1050_v16  ;;  %v1036_v21 = vsel %vm524_vm0, %v858_v18, -inf }
 0x146   : > { %v6439_v22 = vmax.f32 %v1035_v35, %v1036_v21 }
 0x149   : > { %v5226_v25 = vpop.f32.mrb[48].mxu0 }
 0x14a   : > { %v1071_v24 = vsel %vm524_vm0, %v5226_v25, -inf  ;;  %v871_v26 = vpop.f32.mrb[49].mxu0 }
 0x14b   : > { %v6445_v29 = vmax.f32 %v1070_v41, %v1071_v24  ;;  %v1057_v28 = vsel %vm524_vm0, %v871_v26, -inf  ;;  %v5227_v30 = vpop.f32.mrb[50].mxu0 }
 0x14c   : > { %v6451_v33 = vmax.f32 %v1056_v45, %v1057_v28  ;;  %v1078_v32 = vsel %vm524_vm0, %v5227_v30, -inf  ;;  %v874_v34 = vpop.f32.mrb[51].mxu0 }
 0x14d   : > { %v6457_v35 = vmax.f32 %v1077_v49, %v1078_v32  ;;  %v1064_v37 = vsel %vm524_vm0, %v874_v34, -inf }
 0x14e   : > { %v6463_v38 = vmax.f32 %v1063_v51, %v1064_v37  ;;  %v7748_v51 = vmax.f32 %v6342_v10, %v6347_v14 }
 0x151   : > { %v5230_v41 = vpop.f32.mrb[52].mxu0 }
 0x152   : > { %v1099_v40 = vsel %vm524_vm0, %v5230_v41, -inf  ;;  %v887_v42 = vpop.f32.mrb[53].mxu0 }
 0x153   : > { %v6469_v45 = vmax.f32 %v1098_v0, %v1099_v40  ;;  %v1085_v44 = vsel %vm524_vm0, %v887_v42, -inf  ;;  %v5231_v46 = vpop.f32.mrb[54].mxu0 }
 0x154   : > { %v6475_v49 = vmax.f32 %v1084_v56, %v1085_v44  ;;  %v1106_v48 = vsel %vm524_vm0, %v5231_v46, -inf  ;;  %v890_v50 = vpop.f32.mrb[55].mxu0 }
 0x155   : > { %v6481_v23 = vmax.f32 %v7748_v51, %v1106_v48  ;;  %v1092_v53 = vsel %vm524_vm0, %v890_v50, -inf }
 0x156   : > { %v6487_v0 = vmax.f32 %v7749_v54, %v1092_v53 }
 0x159   : > { %v5234_v58 = vpop.f32.mrb[56].mxu0 }
 0x15a   : > { %v1127_v55 = vsel %vm524_vm0, %v5234_v58, -inf  ;;  %v903_v3 = vpop.f32.mrb[57].mxu0 }
 0x15b   : > { %v6490_v56 = vmax.f32 %v1126_v47, %v1127_v55  ;;  %v1113_v62 = vsel %vm524_vm0, %v903_v3, -inf  ;;  %v5235_v39 = vpop.f32.mrb[58].mxu0  ;;  %v6505_v47 = vld [vmem:[%s7691_s2] ss:$0 sm:$0xff] }
 0x15c   : > { %v6493_v63 = vmax.f32 %v1112_v61, %v1113_v62  ;;  %v1134_v10 = vsel %vm524_vm0, %v5235_v39, -inf  ;;  %v906_v14 = vpop.f32.mrb[59].mxu0 }
 0x15d   : > { %v6496_v52 = vmax.f32 %v1133_v36, %v1134_v10  ;;  %v1120_v57 = vsel %vm524_vm0, %v906_v14, -inf }
 0x15e   : > { %v6499_v27 = vmax.f32 %v1119_v43, %v1120_v57 }
 0x161   : > { %v5238_v1 = vpop.f32.mrb[60].mxu0 }
 0x162   : > { %v1017_v6 = vsel %vm524_vm0, %v5238_v1, -inf  ;;  %v919_v20 = vpop.f32.mrb[61].mxu0 }
 0x163   : > { %v1018_v61 = vmax.f32 %v6397_v59, %v1017_v6  ;;  %v1003_v4 = vsel %vm524_vm0, %v919_v20, -inf  ;;  %v5239_v8 = vpop.f32.mrb[62].mxu0 }
 0x164   : > { %v1004_v36 = vmax.f32 %v6403_v60, %v1003_v4  ;;  %v1024_v7 = vsel %vm524_vm0, %v5239_v8, -inf  ;;  %v922_v43 = vpop.f32.mrb[63].mxu0 }
 0x165   : > { %v1147_v9 = vadd.f32 %v6505_v47, %v1018_v61  ;;  %v1025_v11 = vmax.f32 %v6409_v31, %v1024_v7  ;;  %v1010_v13 = vsel %vm524_vm0, %v922_v43, -inf }
 0x166   : > { %v1145_v16 = vadd.f32 %v6505_v47, %v1004_v36  ;;  %v1011_v18 = vmax.f32 %v6415_v5, %v1010_v13 }
 0x167   : > { %v6516_v21 = vmax.f32 %v1147_v9, 0.0  ;;  %v1148_v59 = vadd.f32 %v6505_v47, %v1025_v11 }
 0x168   : > { %v6519_v25 = vmax.f32 %v1145_v16, 0.0  ;;  %v1146_v60 = vadd.f32 %v6505_v47, %v1011_v18 }
 0x169   : > { %v6522_v24 = vmax.f32 %v1148_v59, 0.0  ;;  %v5242_v26 = vpop.f32.mrb[64].mxu0  ;;  %v1299_v31 = vrot.slane %v6516_v21, 1  ;;  %v2008_v28 = vrot.slane %v6516_v21, 6 }
 0x16a   : > { %v1296_v5 = vrot.slane %v6519_v25, 1  ;;  %v2143_v32 = vrot.slane %v6519_v25, 7  ;;  %v6529_v34 = vmax.f32 %v1146_v60, 0.0  ;;  %v1045_v37 = vsel %vm524_vm0, %v5242_v26, -inf  ;;  %v935_v41 = vpop.f32.mrb[65].mxu0 }
 0x16b   : > { %v1046_v40 = vmax.f32 %v6421_v12, %v1045_v37  ;;  %v1031_v42 = vsel %vm524_vm0, %v935_v41, -inf  ;;  %v5243_v44 = vpop.f32.mrb[66].mxu0  ;;  %v1301_v46 = vrot.slane %v6522_v24, 1  ;;  %v2005_v48 = vrot.slane %v6519_v25, 6 }
 0x16c   : > { %v1032_v50 = vmax.f32 %v6427_v17, %v1031_v42  ;;  %v1052_v51 = vsel %vm524_vm0, %v5243_v44, -inf  ;;  %v938_v53 = vpop.f32.mrb[67].mxu0  ;;  %v1297_v54 = vrot.slane %v6529_v34, 1  ;;  %v6562_v6 = vpack.c.bf16 %v6516_v21, %v6529_v34 }
 0x16d   : > { %v1151_v12 = vadd.f32 %v6505_v47, %v1046_v40  ;;  %v1053_v55 = vmax.f32 %v6433_v19, %v1052_v51  ;;  %v1038_v3 = vsel %vm524_vm0, %v938_v53, -inf  ;;  %v6545_v62 = vsel %vm1295_vm1, %v1299_v31, %v1301_v46 }
 0x16e   : > { %v1149_v17 = vadd.f32 %v6505_v47, %v1032_v50  ;;  %v1039_v39 = vmax.f32 %v6439_v22, %v1038_v3  ;;  %v6550_v10 = vsel %vm1295_vm1, %v1296_v5, %v1297_v54  ;;  %v6553_v14 = vsel %vm1295_vm1, %v1297_v54, %v1299_v31  ;;  %7750 = vst [vmem:[#allocation2_spill] sm:$0xff] %v6562_v6 }
 0x16f   : > { %v6555_v57 = vmax.f32 %v1151_v12, 0.0  ;;  %v1152_v1 = vadd.f32 %v6505_v47, %v1053_v55  ;;  %v1322_v19 = vpack.c.bf16 %v6545_v62, %v6553_v14  ;;  %v2006_v61 = vrot.slane %v6529_v34, 6 }
 0x170   : > { %v6564_v20 = vmax.f32 %v1149_v17, 0.0  ;;  %v1150_v22 = vadd.f32 %v6505_v47, %v1039_v39  ;;  %v7695_v4 = vrot.slane %v6522_v24, 6 }
 0x171   : > { %v6569_v8 = vmax.f32 %v1152_v1, 0.0  ;;  %v5246_v36 = vpop.f32.mrb[68].mxu0  ;;  %v7697_v7 = vrot.slane %v6555_v57, 1  ;;  %v6574_v43 = vpack.c.bf16 %v6555_v57, %v6522_v24  ;;  %v2016_v9 = vrot.slane %v6555_v57, 6 }
 0x172   : > { %v6580_v18 = vmax.f32 %v1150_v22, 0.0  ;;  %v951_v59 = vpop.f32.mrb[69].mxu0  ;;  %v1073_v60 = vsel %vm524_vm0, %v5246_v36, -inf  ;;  %v2007_v39 = vsel %vm2004_vm2, %v2005_v48, %v2006_v61 }
 0x173   : > { %7751 = vst [vmem:[#allocation3_spill] sm:$0xff] %v6574_v43  ;;  %v1059_v26 = vsel %vm524_vm0, %v951_v59, -inf  ;;  %v5247_v31 = vpop.f32.mrb[70].mxu0  ;;  %v1321_v5 = vpack.c.bf16 %v6550_v10, %v6569_v8  ;;  %v1074_v40 = vmax.f32 %v6445_v29, %v1073_v60 }
 0x174   : > { %v2015_v41 = vrot.slane %v6580_v18, 6  ;;  %v1060_v42 = vmax.f32 %v6451_v33, %v1059_v26  ;;  %v1080_v44 = vsel %vm524_vm0, %v5247_v31, -inf  ;;  %v954_v46 = vpop.f32.mrb[71].mxu0  ;;  %v1320_v53 = vpack.c.bf16 %v6555_v57, %v6580_v18  ;;  %v6001_v33 = vld [vmem:[%s7692_s3 + $0x8] sm:$0xff]  }
 0x175   : > { %v1081_v50 = vmax.f32 %v6457_v35, %v1080_v44  ;;  %v1066_v51 = vsel %vm524_vm0, %v954_v46, -inf  ;;  %v1552_v54 = vrot.slane %v6580_v18, 1  ;;  %v1155_v12 = vadd.f32 %v6505_v47, %v1074_v40 }
 0x176   : > { %v1153_v55 = vadd.f32 %v6505_v47, %v1060_v42  ;;  %v1067_v29 = vmax.f32 %v6463_v38, %v1066_v51  ;;  %5260 = vmatprep.mubr.msk.bf16.mxu0 %vm524_vm0, %v1320_v53  ;;  %v6616_v38 = vsel %vm2004_vm2, %v2006_v61, %v2008_v28  ;;  %v6635_v61 = vsel %vm2004_vm2, %v2008_v28, %v7695_v4  ;;  %v6653_v28 = vld [vmem:[%s7692_s3 + $0x20] sm:$0xff]  }
 0x177   : > { %v1156_v3 = vadd.f32 %v6505_v47, %v1081_v50  ;;  %v6610_v17 = vsel %vm1295_vm1, %v1552_v54, %v7697_v7  ;;  %v6618_v1 = vmax.f32 %v1155_v12, 0.0  ;;  %5261 = vmatmul.mubr.msk.bf16.vlgmr.msra.gmra.mrb[80].mxu0 %vm524_vm0, %v1321_v5  ;;  %v6638_v26 = vpack.c.bf16 %v6616_v38, %v2007_v39 }
 0x178   : > { %v6620_v22 = vmax.f32 %v1153_v55, 0.0  ;;  %v1154_v36 = vadd.f32 %v6505_v47, %v1067_v29  ;;  %5264 = vmatprep.mubr.msk.bf16.mxu0 %vm524_vm0, %v1322_v19  ;;  %5273 = vmatpush3.bf16.msra.mxu0 %v6246_v15  ;;  %v6643_v31 = vsel %vm2004_vm2, %v2015_v41, %v2016_v9 }
 0x179   : > { %v6626_v60 = vmax.f32 %v1156_v3, 0.0  ;;  %v5250_v48 = vpop.f32.mrb[72].mxu0  ;;  %7752 = vst [vmem:[#allocation4_spill] sm:$0xff] %v6638_v26  ;;  %v1716_v40 = vrot.slane %v6618_v1, 2  ;;  %v1310_v42 = vrot.slane %v6618_v1, 1  ;;  %5274 = vmatprep.subr.bf16.mxu0 %v6001_v33 }
 0x17a   : > { %v6645_v5 = vmax.f32 %v1154_v36, 0.0  ;;  %v1101_v19 = vsel %vm524_vm0, %v5250_v48, -inf  ;;  %v967_v15 = vpop.f32.mrb[73].mxu0 }
 0x17b   : > { %v1102_v44 = vmax.f32 %v6469_v45, %v1101_v19  ;;  %v1087_v41 = vsel %vm524_vm0, %v967_v15, -inf  ;;  %v5251_v46 = vpop.f32.mrb[74].mxu0  ;;  %v1717_v50 = vrot.slane %v6626_v60, 2  ;;  %v1311_v51 = vrot.slane %v6626_v60, 1 }
 0x17c   : > { %v1088_v55 = vmax.f32 %v6475_v49, %v1087_v41  ;;  %v970_v29 = vpop.f32.mrb[75].mxu0  ;;  %v1108_v45 = vsel %vm524_vm0, %v5251_v46, -inf  ;;  %5275 = vmatpush3.bf16.msra.mxu0 %v6001_v33  ;;  %v6684_v33 = vpack.c.bf16 %v6626_v60, %v6618_v1  ;;  %v2018_v41 = vrot.slane %v6569_v8, 6 }
 0x17d   : > { %v1159_v3 = vadd.f32 %v6505_v47, %v1102_v44  ;;  %v1094_v39 = vsel %vm524_vm0, %v970_v29, -inf  ;;  %v6667_v36 = vsel %vm1705_vm3, %v1716_v40, %v1717_v50  ;;  %v1109_v19 = vmax.f32 %v6481_v23, %v1108_v45  ;;  %5288 = vmatprep.subr.bf16.mxu0 %v6653_v28 }
 0x17e   : > { %v1157_v48 = vadd.f32 %v6505_v47, %v1088_v55  ;;  %v1095_v15 = vmax.f32 %v6487_v0, %v1094_v39  ;;  %v6673_v59 = vsel %vm1295_vm1, %v1310_v42, %v1311_v51  ;;  %v6680_v44 = vpack.c.bf16 %v6620_v22, %v6569_v8  ;;  %7754 = vst [vmem:[#allocation6_spill] sm:$0xff] %v6684_v33 }
 0x17f   : > { %v6676_v49 = vmax.f32 %v1159_v3, 0.0  ;;  %v6688_v23 = vpack.c.bf16 %v6643_v31, %v6635_v61  ;;  %v1160_v40 = vadd.f32 %v6505_v47, %v1109_v19  ;;  %v7696_v45 = vrot.slane %v6620_v22, 6 }
 0x180   : > { %7753 = vst [vmem:[#allocation5_spill] sm:$0xff] %v6680_v44  ;;  %v6690_v0 = vmax.f32 %v1157_v48, 0.0  ;;  %v1158_v42 = vadd.f32 %v6505_v47, %v1095_v15  ;;  %v6711_v29 = vsel %vm2004_vm2, %v2016_v9, %v2018_v41 }
 0x181   : > { %7755 = vst [vmem:[#allocation7_spill] sm:$0xff] %v6688_v23  ;;  %v5254_v3 = vpop.f32.mrb[76].mxu0  ;;  %v6699_v39 = vmax.f32 %v1160_v40, 0.0 }
 0x182   : > { %v6701_v54 = vmax.f32 %v1158_v42, 0.0  ;;  %v1129_v48 = vsel %vm524_vm0, %v5254_v3, -inf  ;;  %v983_v19 = vpop.f32.mrb[77].mxu0  ;;  %v1719_v15 = vrot.slane %v6690_v0, 2  ;;  %v1313_v55 = vrot.slane %v6690_v0, 1 }
 0x183   : > { %v1130_v12 = vmax.f32 %v6490_v56, %v1129_v48  ;;  %v1115_v46 = vsel %vm524_vm0, %v983_v19, -inf  ;;  %v5255_v4 = vpop.f32.mrb[78].mxu0  ;;  %v1865_v53 = vrot.slane %v6699_v39, 2 }
 0x184   : > { %v1116_v40 = vmax.f32 %v6493_v63, %v1115_v46  ;;  %v1136_v42 = vsel %vm524_vm0, %v5255_v4, -inf  ;;  %v986_v3 = vpop.f32.mrb[79].mxu0  ;;  %v1720_v16 = vsel %vm1705_vm3, %v1717_v50, %v1719_v15  ;;  %v1721_v13 = vrot.slane %v6701_v54, 2 }
 0x185   : > { %v1163_v56 = vadd.f32 %v6505_v47, %v1130_v12  ;;  %v1137_v48 = vmax.f32 %v6496_v52, %v1136_v42  ;;  %v1122_v19 = vsel %vm524_vm0, %v986_v3, -inf  ;;  %v6725_v46 = vpack.c.bf16 %v1720_v16, %v6667_v36 }
 0x186   : > { %v1161_v9 = vadd.f32 %v6505_v47, %v1116_v40  ;;  %v1123_v63 = vmax.f32 %v6499_v27, %v1122_v19  ;;  %v1722_v4 = vsel %vm1705_vm3, %v1719_v15, %v1721_v13  ;;  %v6733_v52 = vsel %vm1295_vm1, %v1311_v51, %v1313_v55 }
 0x187   : > { %7756 = vst [vmem:[#allocation8_spill] sm:$0xff] %v6725_v46  ;;  %v6727_v50 = vmax.f32 %v1163_v56, 0.0  ;;  %v1164_v11 = vadd.f32 %v6505_v47, %v1137_v48  ;;  %v6730_v12 = vpack.c.bf16 %v1722_v4, %v1720_v16  ;;  %5404 = vmatprep.mubr.msk.bf16.mxu1 %vm524_vm0, %v6725_v46  ;;  %v1315_v27 = vrot.slane %v6701_v54, 1 }
 0x188   : > { %v6735_v42 = vmax.f32 %v1161_v9, 0.0  ;;  %v1162_v40 = vadd.f32 %v6505_v47, %v1123_v63  ;;  %v6743_v13 = vpack.c.bf16 %v6699_v39, %v6690_v0  ;;  %v6752_v3 = vsel %vm2004_vm2, %v2018_v41, %v7696_v45 }
 0x189   : > { %7757 = vst [vmem:[#allocation9_spill] sm:$0xff] %v6730_v12  ;;  %v6745_v15 = vmax.f32 %v1164_v11, 0.0  ;;  %v1571_v16 = vrot.slane %v6727_v50, 1  ;;  %v1870_v51 = vrot.slane %v6727_v50, 2  ;;  %v6766_v37 = vsel %vm1295_vm1, %v1313_v55, %v1315_v27  ;;  %v6002_v55 = vld [vmem:[%s7692_s3 + $0xa8] sm:$0xff]  }
 0x18a   : > { %7758 = vst [vmem:[#allocation10_spill] sm:$0xff] %v6743_v13  ;;  %v6754_v47 = vmax.f32 %v1162_v40, 0.0  ;;  %v7698_v56 = vrot.slane %v6735_v42, 1  ;;  %v1866_v48 = vrot.slane %v6735_v42, 2  ;;  %v6760_v19 = vpack.c.bf16 %v6735_v42, %v6699_v39 }
 0x18b   : > { %v6781_v9 = vpack.c.bf16 %v6766_v37, %v6733_v52  ;;  %v2144_v27 = vrot.slane %v6529_v34, 7  ;;  %v1707_v12 = vrot.slane %v6529_v34, 2 }
 0x18c   : > { %7759 = vst [vmem:[#allocation11_spill] sm:$0xff] %v6760_v19  ;;  %v1569_v41 = vrot.slane %v6754_v47, 1  ;;  %v1867_v40 = vsel %vm1705_vm3, %v1865_v53, %v1866_v48  ;;  %5265 = vmatmul.mubr.msk.bf16.gmra.mrb[84].mxu0 %vm524_vm0, %v6760_v19  ;;  %v6774_v45 = vpack.c.bf16 %v6673_v59, %v6754_v47  ;;  %v1868_v11 = vrot.slane %v6754_v47, 2 }
 0x18d   : > { %v6777_v35 = vpack.c.bf16 %v1867_v40, %v1722_v4  ;;  %7762 = vst [vmem:[#allocation14_spill] sm:$0xff] %v6781_v9  ;;  %v6788_v53 = vpack.c.bf16 %v6752_v3, %v6711_v29  ;;  %v1706_v19 = vrot.slane %v6519_v25, 2 }
 0x18e   : > { %7760 = vst [vmem:[#allocation12_spill] sm:$0xff] %v6774_v45  ;;  %v6794_v63 = vsel %vm1295_vm1, %v7698_v56, %v1569_v41  ;;  %v1572_v4 = vsel %vm1295_vm1, %v1569_v41, %v1571_v16  ;;  %5268 = vmatprep.mubr.msk.bf16.mxu0 %vm524_vm0, %v6774_v45  ;;  %v1869_v40 = vsel %vm1705_vm3, %v1866_v48, %v1868_v11  ;;  %v7708_v41 = vrot.slane %v6701_v54, 6 }
 0x18f   : > { %7761 = vst [vmem:[#allocation13_spill] sm:$0xff] %v6777_v35  ;;  %7763 = vst [vmem:[#allocation15_spill] sm:$0xff] %v6788_v53  ;;  %v1871_v30 = vsel %vm1705_vm3, %v1868_v11, %v1870_v51  ;;  %v6802_v58 = vpack.c.bf16 %v1572_v4, %v6794_v63  ;;  %v6805_v7 = vpack.c.bf16 %v6667_v36, %v1572_v4  ;;  %5405 = vmatmul.mubr.msk.bf16.vlgmr.msra.gmra.mrb[0].mxu1 %vm524_vm0, %v6777_v35 }
 0x190   : > { %v6809_v56 = vpack.c.bf16 %v1871_v30, %v1869_v40  ;;  %v6814_v16 = vsel %vm2142_vm4, %v2143_v32, %v2144_v27  ;;  %5417 = vmatpush3.bf16.msra.mxu1 %v6218_v2  ;;  %v6823_v36 = vpack.c.bf16 %v6754_v47, %v6735_v42  ;;  %v2631_v30 = vrot.slane %v6618_v1, 6  ;;  %v6833_v2 = vld [vmem:[%s7692_s3 + $0xb0] sm:$0xff]  }
 0x191   : > { %7764 = vst [vmem:[#allocation16_spill] sm:$0xff] %v6802_v58  ;;  %7765 = vst [vmem:[#allocation17_spill] sm:$0xff] %v6805_v7  ;;  %v6819_v51 = vpack.c.bf16 %v6814_v16, %v6752_v3  ;;  %5418 = vmatprep.subr.bf16.mxu1 %v6002_v55  ;;  %v2632_v32 = vrot.slane %v6626_v60, 6  ;;  %v2634_v11 = vrot.slane %v6690_v0, 6  ;;  %v2641_v4 = vrot.slane %v6699_v39, 6 }
 0x192   : > { %7766 = vst [vmem:[#allocation18_spill] sm:$0xff] %v6809_v56  ;;  %5408 = vmatprep.mubr.msk.bf16.mxu1 %vm524_vm0, %v6809_v56  ;;  %v2642_v40 = vrot.slane %v6735_v42, 6  ;;  %v1555_v48 = vrot.slane %v6569_v8, 1  ;;  %v1557_v45 = vrot.slane %v6620_v22, 1 }
 0x193   : > { %7767 = vst [vmem:[#allocation19_spill] sm:$0xff] %v6819_v51  ;;  %v2633_v56 = vsel %vm2004_vm2, %v2631_v30, %v2632_v32  ;;  %v6845_v35 = vsel %vm2004_vm2, %v2632_v32, %v2634_v11  ;;  %v6850_v46 = vsel %vm2004_vm2, %v2634_v11, %v7708_v41  ;;  %v7770_v30 = vrot.slane %v6555_v57, 1 }
 0x194   : > { %7768 = vst [vmem:[#allocation20_spill] sm:$0xff] %v6845_v35  ;;  %7769 = vst [vmem:[#allocation21_spill] sm:$0xff] %v6850_v46  ;;  %5269 = vmatmul.mubr.msk.bf16.gmra.mrb[88].mxu0 %vm524_vm0, %v6781_v9  ;;  %5419 = vmatpush3.bf16.msra.mxu1 %v6002_v55  ;;  %v6856_v7 = vpack.c.bf16 %v6845_v35, %v2633_v56  ;;  %v2643_v58 = vsel %vm2004_vm2, %v2641_v4, %v2642_v40  ;;  %v2644_v51 = vrot.slane %v6754_v47, 6 }
 0x195   : > { %v6862_v32 = vsel %vm1295_vm1, %v7770_v30, %v1555_v48  ;;  %v7771_v11 = vpack.c.bf16 %v6529_v34, %v6519_v25  ;;  %5432 = vmatprep.subr.bf16.mxu1 %v6833_v2  ;;  %v6871_v55 = vpack.c.bf16 %v2643_v58, %v6850_v46  ;;  %v6874_v56 = vsel %vm1295_vm1, %v1555_v48, %v1557_v45 }
 0x196   : > { %v6877_v4 = vsel %vm1705_vm3, %v1706_v19, %v1707_v12  ;;  %v7710_v30 = vrot.slane %v6727_v50, 6  ;;  %v6889_v9 = vpack.c.bf16 %v6711_v29, %v6643_v31  ;;  %v6900_v19 = vpack.c.bf16 %v6733_v52, %v6673_v59 }
 0x197   : > { %5276 = vmatprep.mubr.msk.bf16.mxu0 %vm524_vm0, %v7771_v11  ;;  %v6885_v11 = vsel %vm2004_vm2, %v2642_v40, %v2644_v51  ;;  %5409 = vmatmul.mubr.msk.bf16.gmra.mrb[4].mxu1 %vm524_vm0, %v6562_v6  ;;  %v1566_v48 = vrot.slane %v6699_v39, 1  ;;  %v7775_v40 = vrot.slane %v6516_v21, 7  ;;  %v2271_v59 = vrot.slane %v6555_v57, 7  ;;  %v6005_v6 = vld [vmem:[%s7692_s3 + $0x28] sm:$0xff]  }
 0x198   : > { %7772 = vst [vmem:[#allocation22_spill] sm:$0xff] %v6885_v11  ;;  %v6896_v45 = vsel %vm2004_vm2, %v2644_v51, %v7710_v30  ;;  %7774 = vst [vmem:[#allocation24_spill] sm:$0xff] %v6900_v19  ;;  %5412 = vmatprep.mubr.msk.bf16.mxu1 %vm524_vm0, %v6574_v43  ;;  %v2148_v51 = vrot.slane %v6522_v24, 7  ;;  %v2270_v30 = vrot.slane %v6580_v18, 7  ;;  %v7776_v52 = vrot.slane %v6735_v42, 1 }
 0x199   : > { %7773 = vst [vmem:[#allocation23_spill] sm:$0xff] %v6896_v45  ;;  %v2147_v25 = vsel %vm2142_vm4, %v2144_v27, %v7775_v40  ;;  %v6910_v31 = vpack.c.bf16 %v6896_v45, %v6885_v11  ;;  %v6921_v40 = vpack.c.bf16 %v6885_v11, %v2643_v58  ;;  %v2768_v43 = vrot.slane %v6618_v1, 7  ;;  %v7849_v11 = vld [vmem:[#allocation4_spill] sm:$0xff] }
 0x19a   : > { %v1568_v41 = vsel %vm1295_vm1, %v1566_v48, %v7776_v52  ;;  %v7779_v35 = vrot.slane %v6516_v21, 7  ;;  %v2272_v48 = vsel %vm2142_vm4, %v2270_v30, %v2271_v59  ;;  %v2769_v52 = vrot.slane %v6626_v60, 7 }
 0x19b   : > { %7777 = vst [vmem:[#allocation25_spill] sm:$0xff] %v6921_v40  ;;  %v6928_v19 = vpack.c.bf16 %v1568_v41, %v6766_v37  ;;  %v1709_v1 = vrot.slane %v6516_v21, 2  ;;  %v1711_v40 = vrot.slane %v6522_v24, 2  ;;  %v7782_v37 = vpack.c.bf16 %v6580_v18, %v6516_v21 }
 0x19c   : > { %v2149_v46 = vsel %vm2142_vm4, %v7779_v35, %v2148_v51  ;;  %v1855_v35 = vrot.slane %v6580_v18, 2  ;;  %v1856_v30 = vrot.slane %v6555_v57, 2  ;;  %v2771_v51 = vrot.slane %v6690_v0, 7 }
 0x19d   : > { %7778 = vst [vmem:[#allocation26_spill] sm:$0xff] %v6928_v19  ;;  %v6935_v27 = vpack.c.bf16 %v2149_v46, %v2147_v25  ;;  %v6937_v58 = vpack.c.bf16 %v2272_v48, %v2149_v46  ;;  %5277 = vmatmul.mubr.msk.bf16.vlgmr.msra.gmra.mrb[80].mxu0 %vm524_vm0, %v7782_v37  ;;  %v2770_v19 = vsel %vm2142_vm4, %v2768_v43, %v2769_v52  ;;  %v2773_v18 = vrot.slane %v6701_v54, 7 }
 0x19e   : > { %v7783_v46 = vpack.c.bf16 %v6569_v8, %v6555_v57  ;;  %5289 = vmatpush3.bf16.msra.mxu0 %v6653_v28  ;;  %v6958_v37 = vsel %vm1705_vm3, %v1707_v12, %v1709_v1  ;;  %v6961_v43 = vsel %vm1705_vm3, %v1709_v1, %v1711_v40  ;;  %v2772_v12 = vsel %vm2142_vm4, %v2769_v52, %v2771_v51 }
 0x19f   : > { %7780 = vst [vmem:[#allocation27_spill] sm:$0xff] %v6935_v27  ;;  %7781 = vst [vmem:[#allocation28_spill] sm:$0xff] %v6937_v58  ;;  %v6955_v58 = vpack.c.bf16 %v2770_v19, %v6896_v45  ;;  %5290 = vmatprep.subr.bf16.mxu0 %v6005_v6  ;;  %v6967_v27 = vld [vmem:[%s7692_s3 + $0x30] sm:$0xff]   ;;  %5413 = vmatmul.mubr.msk.bf16.gmra.mrb[8].mxu1 %vm524_vm0, %v6680_v44  ;;  %v2774_v1 = vsel %vm2142_vm4, %v2771_v51, %v2773_v18  ;;  %v1858_v18 = vrot.slane %v6569_v8, 2 }
 0x1a0   : > { %5280 = vmatprep.mubr.msk.bf16.mxu0 %vm524_vm0, %v7783_v46  ;;  %v6972_v46 = vsel %vm1705_vm3, %v1855_v35, %v1856_v30  ;;  %v6984_v45 = vpack.c.bf16 %v6794_v63, %v1568_v41  ;;  %v2273_v35 = vrot.slane %v6569_v8, 7  ;;  %5420 = vmatprep.mubr.msk.bf16.mxu1 %vm524_vm0, %v6638_v26  ;;  %v6989_v52 = vpack.c.bf16 %v2774_v1, %v2772_v12 }
 0x1a1   : > { %7784 = vst [vmem:[#allocation29_spill] sm:$0xff] %v6955_v58  ;;  %7785 = vst [vmem:[#allocation30_spill] sm:$0xff] %v6972_v46  ;;  %v6976_v58 = vpack.c.bf16 %v2147_v25, %v6814_v16  ;;  %v2275_v16 = vrot.slane %v6620_v22, 7  ;;  %v6994_v28 = vpack.c.bf16 %v2772_v12, %v2770_v19  ;;  %v2895_v63 = vrot.slane %v6699_v39, 7 }
 0x1a2   : > { %5291 = vmatpush3.bf16.msra.mxu0 %v6005_v6  ;;  %v2274_v51 = vsel %vm2142_vm4, %v2271_v59, %v2273_v35  ;;  %v2896_v41 = vrot.slane %v6735_v42, 7  ;;  %v1860_v44 = vrot.slane %v6620_v22, 2  ;;  %v2898_v25 = vrot.slane %v6754_v47, 7 }
 0x1a3   : > { %5304 = vmatprep.subr.bf16.mxu0 %v6967_v27  ;;  %v2276_v40 = vsel %vm2142_vm4, %v2273_v35, %v2275_v16  ;;  %v2900_v19 = vrot.slane %v6727_v50, 7  ;;  %v7012_v12 = vsel %vm1705_vm3, %v1856_v30, %v1858_v18  ;;  %v6006_v30 = vld [vmem:[%s7692_s3 + $0xb8] sm:$0xff]  }
 0x1a4   : > { %v7005_v6 = vpack.c.bf16 %v2276_v40, %v2274_v51  ;;  %v7008_v59 = vpack.c.bf16 %v6529_v34, %v2276_v40  ;;  %v2897_v39 = vsel %vm2142_vm4, %v2895_v63, %v2896_v41  ;;  %v7019_v16 = vsel %vm1705_vm3, %v1858_v18, %v1860_v44 }
 0x1a5   : > { %5281 = vmatmul.mubr.msk.bf16.gmra.mrb[84].mxu0 %vm524_vm0, %v6684_v33  ;;  %v7016_v35 = vpack.c.bf16 %v2897_v39, %v2774_v1  ;;  %v2899_v26 = vsel %vm2142_vm4, %v2896_v41, %v2898_v25  ;;  %v2901_v46 = vsel %vm2142_vm4, %v2898_v25, %v2900_v19  ;;  %v7032_v1 = vpack.c.bf16 %v2274_v51, %v2272_v48 }
 0x1a6   : > { %7786 = vst [vmem:[#allocation31_spill] sm:$0xff] %v7008_v59  ;;  %5284 = vmatprep.mubr.msk.bf16.mxu0 %vm524_vm0, %v6743_v13  ;;  %v7030_v63 = vpack.c.bf16 %v2901_v46, %v2899_v26  ;;  %v7036_v44 = vpack.c.bf16 %v6522_v24, %v6516_v21  ;;  %v7038_v41 = vpack.c.bf16 %v2899_v26, %v2897_v39  ;;  %v3259_v51 = vrot.slane %v6516_v21, 4 }
 0x1a7   : > { %7787 = vst [vmem:[#allocation32_spill] sm:$0xff] %v7032_v1  ;;  %v7041_v25 = vpack.c.bf16 %v6626_v60, %v2901_v46  ;;  %v7045_v18 = vpack.c.bf16 %v6701_v54, %v6690_v0  ;;  %v7049_v19 = vpack.c.bf16 %v6690_v0, %v6626_v60  ;;  %5421 = vmatmul.mubr.msk.bf16.vlgmr.msra.gmra.mrb[0].mxu1 %vm524_vm0, %v6688_v23  ;;  %v3258_v46 = vrot.slane %v6529_v34, 4 }
 0x1a8   : > { %7788 = vst [vmem:[#allocation33_spill] sm:$0xff] %v7036_v44  ;;  %7789 = vst [vmem:[#allocation34_spill] sm:$0xff] %v7038_v41  ;;  %v7055_v48 = vpack.c.bf16 %v6735_v42, %v6701_v54  ;;  %v7059_v26 = vpack.c.bf16 %v6727_v50, %v6754_v47  ;;  %5433 = vmatpush3.bf16.msra.mxu1 %v6833_v2  ;;  %5424 = vmatprep.mubr.msk.bf16.mxu1 %vm524_vm0, %v6788_v53  ;;  %v3261_v39 = vrot.slane %v6522_v24, 4 }
 0x1a9   : > { %7790 = vst [vmem:[#allocation35_spill] sm:$0xff] %v7041_v25  ;;  %7791 = vst [vmem:[#allocation36_spill] sm:$0xff] %v7045_v18  ;;  %v3269_v40 = vrot.slane %v6555_v57, 4  ;;  %5434 = vmatprep.subr.bf16.mxu1 %v6006_v30  ;;  %v3260_v23 = vsel %vm3257_vm5, %v3258_v46, %v3259_v51  ;;  %v3397_v2 = vrot.slane %v6529_v34, 5  ;;  %v3398_v53 = vrot.slane %v6516_v21, 5 }
 0x1aa   : > { %7792 = vst [vmem:[#allocation37_spill] sm:$0xff] %v7049_v19  ;;  %7793 = vst [vmem:[#allocation38_spill] sm:$0xff] %v7055_v48  ;;  %v3270_v19 = vrot.slane %v6569_v8, 4  ;;  %v3272_v48 = vrot.slane %v6620_v22, 4  ;;  %v3400_v18 = vrot.slane %v6522_v24, 5  ;;  %v3262_v13 = vsel %vm3257_vm5, %v3259_v51, %v3261_v39 }
 0x1ab   : > { %7794 = vst [vmem:[#allocation39_spill] sm:$0xff] %v7059_v26  ;;  %v7073_v26 = vld [vmem:[%s7692_s3 + $0xc0] sm:$0xff]   ;;  %v7795_v25 = vrot.slane %v6564_v20, 4  ;;  %v7085_v59 = vpack.c.bf16 %v3262_v13, %v3260_v23  ;;  %v7796_v34 = vrot.slane %v6645_v5, 4  ;;  %v3524_v23 = vrot.slane %v6555_v57, 5 }
 0x1ac   : > { %v3271_v33 = vsel %vm3257_vm5, %v3269_v40, %v3270_v19  ;;  %v3273_v44 = vsel %vm3257_vm5, %v3270_v19, %v3272_v48  ;;  %5435 = vmatpush3.bf16.msra.mxu1 %v6006_v30  ;;  %v3399_v40 = vsel %vm3396_vm6, %v3397_v2, %v3398_v53  ;;  %v7797_v13 = vpack.c.bf16 %v6553_v14, %v6550_v10 }
 0x1ad   : > { %v3264_v41 = vsel %vm3257_vm5, %v3261_v39, %v7795_v25  ;;  %v3275_v21 = vsel %vm3257_vm5, %v3272_v48, %v7796_v34  ;;  %v7092_v46 = vpack.c.bf16 %v3273_v44, %v3271_v33  ;;  %5285 = vmatmul.mubr.msk.bf16.gmra.mrb[88].mxu0 %vm524_vm0, %v6823_v36  ;;  %v3401_v25 = vsel %vm3396_vm6, %v3398_v53, %v3400_v18 }
 0x1ae   : > { %v7087_v1 = vpack.c.bf16 %v3271_v33, %v3264_v41  ;;  %v7096_v51 = vpack.c.bf16 %v3275_v21, %v3273_v44  ;;  %5292 = vmatprep.mubr.msk.bf16.mxu0 %vm524_vm0, %v7797_v13  ;;  %5448 = vmatprep.subr.bf16.mxu1 %v7073_v26  ;;  %v7106_v33 = vpack.c.bf16 %v3399_v40, %v3275_v21  ;;  %v7798_v41 = vrot.slane %v6564_v20, 5 }
 0x1af   : > { %v7111_v44 = vpack.c.bf16 %v3401_v25, %v3399_v40  ;;  %v3525_v19 = vrot.slane %v6569_v8, 5  ;;  %v3527_v57 = vrot.slane %v6620_v22, 5  ;;  %v7799_v10 = vrot.slane %v6564_v20, 6  ;;  %5425 = vmatmul.mubr.msk.bf16.gmra.mrb[4].mxu1 %vm524_vm0, %v6856_v7 }
 0x1b0   : > { %v3403_v30 = vsel %vm3396_vm6, %v3400_v18, %v7798_v41  ;;  %v7800_v14 = vrot.slane %v6522_v24, 6  ;;  %v7124_v39 = vpack.c.bf16 %v6635_v61, %v6616_v38  ;;  %v7801_v20 = vrot.slane %v6645_v5, 6  ;;  %5428 = vmatprep.mubr.msk.bf16.mxu1 %vm524_vm0, %v6871_v55 }
 0x1b1   : > { %v7114_v53 = vpack.c.bf16 %v3403_v30, %v3401_v25  ;;  %v3526_v18 = vsel %vm3396_vm6, %v3524_v23, %v3525_v19  ;;  %v7802_v24 = vrot.slane %v6620_v22, 6  ;;  %v3528_v40 = vsel %vm3396_vm6, %v3525_v19, %v3527_v57 }
 0x1b2   : > { %v3652_v48 = vsel %vm2004_vm2, %v7800_v14, %v7799_v10  ;;  %v7142_v21 = vpack.c.bf16 %v3526_v18, %v3403_v30  ;;  %v7803_v25 = vrot.slane %v6645_v5, 5  ;;  %v7153_v13 = vpack.c.bf16 %v3528_v40, %v3526_v18  ;;  %v6009_v30 = vld [vmem:[%s7692_s3 + $0x38] sm:$0xff]  }
 0x1b3   : > { %v7130_v8 = vpack.c.bf16 %v3652_v48, %v6635_v61  ;;  %v7133_v2 = vpack.c.bf16 %v6711_v29, %v3652_v48  ;;  %v3772_v34 = vsel %vm2004_vm2, %v7802_v24, %v7801_v20  ;;  %v3892_v41 = vrot.slane %v6626_v60, 4 }
 0x1b4   : > { %v3530_v61 = vsel %vm3396_vm6, %v3527_v57, %v7803_v25  ;;  %v7149_v29 = vpack.c.bf16 %v3772_v34, %v6752_v3  ;;  %v3893_v5 = vrot.slane %v6690_v0, 4  ;;  %v3895_v19 = vrot.slane %v6701_v54, 4  ;;  %v7814_v25 = vld [vmem:[#allocation20_spill] sm:$0xff] }
 0x1b5   : > { %v7151_v23 = vpack.c.bf16 %v3530_v61, %v3528_v40  ;;  %v7156_v22 = vpack.c.bf16 %v6616_v38, %v3530_v61  ;;  %v3903_v3 = vrot.slane %v6735_v42, 4  ;;  %v3904_v57 = vrot.slane %v6754_v47, 4 }
 0x1b6   : > { %v3906_v10 = vrot.slane %v6727_v50, 4  ;;  %v4030_v14 = vrot.slane %v6626_v60, 5  ;;  %v4031_v38 = vrot.slane %v6690_v0, 5  ;;  %v4033_v48 = vrot.slane %v6701_v54, 5 }
 0x1b7   : > { %v7804_v18 = vpack.c.bf16 %v6610_v17, %v6545_v62  ;;  %v7175_v20 = vsel %vm3257_vm5, %v3892_v41, %v3893_v5  ;;  %v7178_v24 = vsel %vm3257_vm5, %v3893_v5, %v3895_v19  ;;  %v7805_v34 = vrot.slane %v6676_v49, 4  ;;  %v6012_v5 = vld [vmem:[%s7692_s3 + $0x40] sm:$0xff]   ;;  %5429 = vmatmul.mubr.msk.bf16.gmra.mrb[8].mxu1 %vm524_vm0, %v6910_v31  ;;  %v7823_v62 = vld [vmem:[#allocation27_spill] sm:$0xff] }
 0x1b8   : > { %v7186_v60 = vsel %vm3257_vm5, %v3903_v3, %v3904_v57  ;;  %v7806_v0 = vpack.c.bf16 %v6874_v56, %v6862_v32  ;;  %v7198_v61 = vsel %vm3257_vm5, %v3904_v57, %v3906_v10  ;;  %v4157_v41 = vrot.slane %v6735_v42, 5  ;;  %5436 = vmatprep.mubr.msk.bf16.mxu1 %vm524_vm0, %v6889_v9 }
 0x1b9   : > { %5293 = vmatmul.mubr.msk.bf16.vlgmr.msra.gmra.mrb[80].mxu0 %vm524_vm0, %v7804_v18  ;;  %v7183_v40 = vsel %vm3257_vm5, %v3895_v19, %v7805_v34  ;;  %v7807_v19 = vrot.slane %v6745_v15, 4  ;;  %v7212_v18 = vsel %vm3396_vm6, %v4030_v14, %v4031_v38  ;;  %v7215_v57 = vsel %vm3396_vm6, %v4031_v38, %v4033_v48  ;;  %v6011_v14 = vld [vmem:[%s7692_s3 + $0xd0] sm:$0xff]  }
 0x1ba   : > { %5296 = vmatprep.mubr.msk.bf16.mxu0 %vm524_vm0, %v7806_v0  ;;  %5305 = vmatpush3.bf16.msra.mxu0 %v6967_v27  ;;  %7808 = vst [vmem:[#allocation40_spill] sm:$0xff] %v7215_v57  ;;  %v4160_v3 = vrot.slane %v6727_v50, 5  ;;  %v7810_v34 = vrot.slane %v6676_v49, 6  ;;  %v7811_v42 = vrot.slane %v6701_v54, 6  ;;  %v7816_v57 = vrot.slane %v6727_v50, 6  ;;  %v6013_v50 = vld [vmem:[%s7692_s3 + $0x48] sm:$0xff]  }
 0x1bb   : > { %5306 = vmatprep.subr.bf16.mxu0 %v6009_v30  ;;  %v7207_v27 = vsel %vm3257_vm5, %v3906_v10, %v7807_v19  ;;  %v7809_v10 = vrot.slane %v6676_v49, 5  ;;  %v4158_v19 = vrot.slane %v6754_v47, 5  ;;  %v7815_v47 = vrot.slane %v6745_v15, 6 }
 0x1bc   : > { %v7828_v38 = vpack.c.bf16 %v6877_v4, %v6874_v56  ;;  %v7830_v56 = vld [vmem:[#allocation17_spill] sm:$0xff] }
 0x1bd   : > { %v7226_v0 = vsel %vm3396_vm6, %v4033_v48, %v7809_v10  ;;  %v7241_v48 = vsel %vm2004_vm2, %v7811_v42, %v7810_v34  ;;  %v7254_v49 = vsel %vm2004_vm2, %v7816_v57, %v7815_v47  ;;  %v7257_v54 = vsel %vm3396_vm6, %v4157_v41, %v4158_v19  ;;  %v7820_v47 = vld [vmem:[#allocation24_spill] sm:$0xff]  ;;  %v7826_v57 = vld [vmem:[#allocation25_spill] sm:$0xff] }
 0x1be   : > { %7812 = vst [vmem:[#allocation41_spill] sm:$0xff] %v7241_v48  ;;  %5307 = vmatpush3.bf16.msra.mxu0 %v6009_v30  ;;  %7817 = vst [vmem:[#allocation20_spill] sm:$0xff] %v7254_v49  ;;  %v7260_v30 = vsel %vm3396_vm6, %v4158_v19, %v4160_v3  ;;  %v7818_v42 = vrot.slane %v6745_v15, 5  ;;  %v7821_v15 = vld [vmem:[#allocation26_spill] sm:$0xff]  ;;  %v7824_v19 = vld [vmem:[#allocation16_spill] sm:$0xff]  ;;  %v7825_v41 = vpack.c.bf16 %v6862_v32, %v6610_v17 }
 0x1bf   : > { %5320 = vmatprep.subr.bf16.mxu0 %v6012_v5  ;;  %v7829_v17 = vpack.c.bf16 %v6961_v43, %v6958_v37  ;;  %v6016_v32 = vld [vmem:[%s7692_s3 + $0x50] sm:$0xff]   ;;  %v7852_v10 = vld [vmem:[#allocation5_spill] sm:$0xff]  ;;  %v7858_v48 = vld [vmem:[#allocation14_spill] sm:$0xff] }
 0x1c0   : > { %v7265_v34 = vsel %vm3396_vm6, %v4160_v3, %v7818_v42  ;;  %v6010_v3 = vld [vmem:[%s7692_s3 + $0xc8] sm:$0xff]  }
 0x1c1   : > { %5297 = vmatmul.mubr.msk.bf16.gmra.mrb[84].mxu0 %vm524_vm0, %v7820_v47  ;;  %v7822_v42 = vld [vmem:[#allocation19_spill] sm:$0xff] }
 0x1c2   : > { %5300 = vmatprep.mubr.msk.bf16.mxu0 %vm524_vm0, %v7821_v15  ;;  %5437 = vmatmul.mubr.msk.bf16.vlgmr.msra.gmra.mrb[0].mxu1 %vm524_vm0, %v7822_v42 }
 0x1c3   : > { %5449 = vmatpush3.bf16.msra.mxu1 %v7073_v26  ;;  %5440 = vmatprep.mubr.msk.bf16.mxu1 %vm524_vm0, %v7823_v62  ;;  %v7827_v26 = vld [vmem:[#allocation29_spill] sm:$0xff] }
 0x1c4   : > { %5450 = vmatprep.subr.bf16.mxu1 %v6010_v3 }
 0x1c7   : > { %5451 = vmatpush3.bf16.msra.mxu1 %v6010_v3  ;;  %v7833_v3 = vpack.c.bf16 %v6958_v37, %v6877_v4  ;;  %v7836_v4 = vpack.c.bf16 %v7019_v16, %v7012_v12  ;;  %v6020_v37 = vld [vmem:[%s7692_s3 + $0x60] sm:$0xff]   ;;  %v7839_v12 = vld [vmem:[#allocation13_spill] sm:$0xff]  ;;  %v6018_v16 = vld [vmem:[%s7692_s3 + $0xe8] sm:$0xff]  }
 0x1c8   : > { %5464 = vmatprep.subr.bf16.mxu1 %v6011_v14 }
 0x1c9   : > { %5301 = vmatmul.mubr.msk.bf16.gmra.mrb[88].mxu0 %vm524_vm0, %v7824_v19 }
 0x1ca   : > { %5308 = vmatprep.mubr.msk.bf16.mxu0 %vm524_vm0, %v7825_v41  ;;  %5441 = vmatmul.mubr.msk.bf16.gmra.mrb[4].mxu1 %vm524_vm0, %v7826_v57  ;;  %v7832_v41 = vld [vmem:[#allocation9_spill] sm:$0xff] }
 0x1cb   : > { %5444 = vmatprep.mubr.msk.bf16.mxu1 %vm524_vm0, %v7827_v26 }
 0x1d1   : > { %5309 = vmatmul.mubr.msk.bf16.vlgmr.msra.gmra.mrb[80].mxu0 %vm524_vm0, %v7828_v38  ;;  %v7831_v38 = vld [vmem:[#allocation28_spill] sm:$0xff] }
 0x1d2   : > { %5312 = vmatprep.mubr.msk.bf16.mxu0 %vm524_vm0, %v7829_v17  ;;  %5321 = vmatpush3.bf16.msra.mxu0 %v6012_v5  ;;  %v6014_v5 = vld [vmem:[%s7692_s3 + $0xd8] sm:$0xff]   ;;  %v7834_v17 = vld [vmem:[#allocation30_spill] sm:$0xff] }
 0x1d3   : > { %5322 = vmatprep.subr.bf16.mxu0 %v6013_v50  ;;  %5445 = vmatmul.mubr.msk.bf16.gmra.mrb[8].mxu1 %vm524_vm0, %v6989_v52  ;;  %v7835_v49 = vpack.c.bf16 %v7834_v17, %v6961_v43  ;;  %v7838_v43 = vld [vmem:[#allocation8_spill] sm:$0xff]  ;;  %v7843_v17 = vld [vmem:[#allocation6_spill] sm:$0xff] }
 0x1d4   : > { %5452 = vmatprep.mubr.msk.bf16.mxu1 %vm524_vm0, %v6976_v58 }
 0x1d6   : > { %5323 = vmatpush3.bf16.msra.mxu0 %v6013_v50  ;;  %v6015_v50 = vld [vmem:[%s7692_s3 + $0xe0] sm:$0xff]  }
 0x1d7   : > { %5336 = vmatprep.subr.bf16.mxu0 %v6016_v32 }
 0x1d9   : > { %5313 = vmatmul.mubr.msk.bf16.gmra.mrb[84].mxu0 %vm524_vm0, %v6984_v45 }
 0x1da   : > { %5316 = vmatprep.mubr.msk.bf16.mxu0 %vm524_vm0, %v7830_v56 }
 0x1db   : > { %5453 = vmatmul.mubr.msk.bf16.vlgmr.msra.gmra.mrb[0].mxu1 %vm524_vm0, %v7831_v38 }
 0x1dc   : > { %5465 = vmatpush3.bf16.msra.mxu1 %v6011_v14  ;;  %5456 = vmatprep.mubr.msk.bf16.mxu1 %vm524_vm0, %v7005_v6  ;;  %v6017_v14 = vld [vmem:[%s7692_s3 + $0x58] sm:$0xff]  }
 0x1dd   : > { %5466 = vmatprep.subr.bf16.mxu1 %v6014_v5 }
 0x1e0   : > { %5467 = vmatpush3.bf16.msra.mxu1 %v6014_v5  ;;  %v7837_v5 = vld [vmem:[#allocation32_spill] sm:$0xff] }
 0x1e1   : > { %5317 = vmatmul.mubr.msk.bf16.gmra.mrb[88].mxu0 %vm524_vm0, %v7832_v41  ;;  %5480 = vmatprep.subr.bf16.mxu1 %v6015_v50 }
 0x1e2   : > { %5324 = vmatprep.mubr.msk.bf16.mxu0 %vm524_vm0, %v7833_v3  ;;  %v6019_v3 = vld [vmem:[%s7692_s3 + $0xf0] sm:$0xff]  }
 0x1e3   : > { %5457 = vmatmul.mubr.msk.bf16.gmra.mrb[4].mxu1 %vm524_vm0, %v6994_v28 }
 0x1e4   : > { %5460 = vmatprep.mubr.msk.bf16.mxu1 %vm524_vm0, %v7016_v35 }
 0x1e9   : > { %5325 = vmatmul.mubr.msk.bf16.vlgmr.msra.gmra.mrb[80].mxu0 %vm524_vm0, %v7835_v49  ;;  %v7840_v49 = vld [vmem:[#allocation31_spill] sm:$0xff] }
 0x1ea   : > { %5328 = vmatprep.mubr.msk.bf16.mxu0 %vm524_vm0, %v7836_v4  ;;  %5337 = vmatpush3.bf16.msra.mxu0 %v6016_v32  ;;  %v7841_v32 = vld [vmem:[#allocation33_spill] sm:$0xff]  ;;  %v7844_v4 = vld [vmem:[#allocation34_spill] sm:$0xff] }
 0x1eb   : > { %5338 = vmatprep.subr.bf16.mxu0 %v6017_v14  ;;  %5461 = vmatmul.mubr.msk.bf16.gmra.mrb[8].mxu1 %vm524_vm0, %v7030_v63 }
 0x1ec   : > { %5468 = vmatprep.mubr.msk.bf16.mxu1 %vm524_vm0, %v7837_v5 }
 0x1ee   : > { %5339 = vmatpush3.bf16.msra.mxu0 %v6017_v14  ;;  %v7842_v14 = vld [vmem:[#allocation18_spill] sm:$0xff] }
 0x1ef   : > { %5352 = vmatprep.subr.bf16.mxu0 %v6020_v37 }
 0x1f1   : > { %5329 = vmatmul.mubr.msk.bf16.gmra.mrb[84].mxu0 %vm524_vm0, %v7838_v43  ;;  %v6021_v43 = vld [vmem:[%s7692_s3 + $0x68] sm:$0xff]  }
 0x1f2   : > { %5332 = vmatprep.mubr.msk.bf16.mxu0 %vm524_vm0, %v7839_v12  ;;  %v7846_v12 = vld [vmem:[#allocation10_spill] sm:$0xff] }
 0x1f3   : > { %5469 = vmatmul.mubr.msk.bf16.vlgmr.msra.gmra.mrb[0].mxu1 %vm524_vm0, %v7840_v49 }
 0x1f4   : > { %5481 = vmatpush3.bf16.msra.mxu1 %v6015_v50  ;;  %5472 = vmatprep.mubr.msk.bf16.mxu1 %vm524_vm0, %v7841_v32  ;;  %v7845_v50 = vld [vmem:[#allocation35_spill] sm:$0xff] }
 0x1f5   : > { %5482 = vmatprep.subr.bf16.mxu1 %v6018_v16 }
 0x1f8   : > { %5483 = vmatpush3.bf16.msra.mxu1 %v6018_v16  ;;  %v6024_v16 = vld [vmem:[%s7692_s3 + $0x70] sm:$0xff]  }
 0x1f9   : > { %5333 = vmatmul.mubr.msk.bf16.gmra.mrb[88].mxu0 %vm524_vm0, %v7842_v14  ;;  %5496 = vmatprep.subr.bf16.mxu1 %v6019_v3  ;;  %v7847_v14 = vld [vmem:[#allocation36_spill] sm:$0xff] }
 0x1fa   : > { %5340 = vmatprep.mubr.msk.bf16.mxu0 %vm524_vm0, %v7843_v17  ;;  %v7848_v17 = vld [vmem:[#allocation2_spill] sm:$0xff] }
 0x1fb   : > { %5473 = vmatmul.mubr.msk.bf16.gmra.mrb[4].mxu1 %vm524_vm0, %v7844_v4 }
 0x1fc   : > { %5476 = vmatprep.mubr.msk.bf16.mxu1 %vm524_vm0, %v7845_v50 }
 0x201   : > { %5341 = vmatmul.mubr.msk.bf16.vlgmr.msra.gmra.mrb[80].mxu0 %vm524_vm0, %v7846_v12  ;;  %v7850_v12 = vld [vmem:[#allocation7_spill] sm:$0xff] }
 0x202   : > { %5344 = vmatprep.mubr.msk.bf16.mxu0 %vm524_vm0, %v6823_v36  ;;  %5353 = vmatpush3.bf16.msra.mxu0 %v6020_v37  ;;  %v6022_v36 = vld [vmem:[%s7692_s3 + $0xf8] sm:$0xff]   ;;  %v7851_v37 = vld [vmem:[#allocation3_spill] sm:$0xff] }
 0x203   : > { %5354 = vmatprep.subr.bf16.mxu0 %v6021_v43  ;;  %5477 = vmatmul.mubr.msk.bf16.gmra.mrb[8].mxu1 %vm524_vm0, %v7847_v14 }
 0x204   : > { %5484 = vmatprep.mubr.msk.bf16.mxu1 %vm524_vm0, %v7848_v17  ;;  %v7854_v17 = vld [vmem:[#allocation11_spill] sm:$0xff] }
 0x206   : > { %5355 = vmatpush3.bf16.msra.mxu0 %v6021_v43  ;;  %v6023_v43 = vld [vmem:[%s7692_s3 + $0x100] sm:$0xff]  }
 0x207   : > { %5368 = vmatprep.subr.bf16.mxu0 %v6024_v16 }
 0x209   : > { %5345 = vmatmul.mubr.msk.bf16.gmra.mrb[84].mxu0 %vm524_vm0, %v7849_v11  ;;  %v7853_v11 = vld [vmem:[#allocation15_spill] sm:$0xff] }
 0x20a   : > { %5348 = vmatprep.mubr.msk.bf16.mxu0 %vm524_vm0, %v7850_v12  ;;  %v7855_v12 = vld [vmem:[#allocation37_spill] sm:$0xff] }
 0x20b   : > { %5485 = vmatmul.mubr.msk.bf16.vlgmr.msra.gmra.mrb[0].mxu1 %vm524_vm0, %v7851_v37  ;;  %v7857_v37 = vld [vmem:[#allocation12_spill] sm:$0xff] }
 0x20c   : > { %5497 = vmatpush3.bf16.msra.mxu1 %v6019_v3  ;;  %5488 = vmatprep.mubr.msk.bf16.mxu1 %vm524_vm0, %v7852_v10  ;;  %v7856_v3 = vld [vmem:[#allocation38_spill] sm:$0xff]  ;;  %v6025_v10 = vld [vmem:[%s7692_s3 + $0x78] sm:$0xff]  }
 0x20d   : > { %5498 = vmatprep.subr.bf16.mxu1 %v6022_v36 }
 0x210   : > { %5499 = vmatpush3.bf16.msra.mxu1 %v6022_v36  ;;  %v6028_v36 = vld [vmem:[%s7692_s3 + $0x80] sm:$0xff]  }
 0x211   : > { %5349 = vmatmul.mubr.msk.bf16.gmra.mrb[88].mxu0 %vm524_vm0, %v7853_v11  ;;  %5512 = vmatprep.subr.bf16.mxu1 %v6023_v43  ;;  %v7859_v11 = vld [vmem:[#allocation39_spill] sm:$0xff] }
 0x212   : > { %5356 = vmatprep.mubr.msk.bf16.mxu0 %vm524_vm0, %v7854_v17 }
 0x213   : > { %5489 = vmatmul.mubr.msk.bf16.gmra.mrb[4].mxu1 %vm524_vm0, %v7855_v12 }
 0x214   : > { %5492 = vmatprep.mubr.msk.bf16.mxu1 %vm524_vm0, %v7856_v3 }
 0x219   : > { %5357 = vmatmul.mubr.msk.bf16.vlgmr.msra.gmra.mrb[80].mxu0 %vm524_vm0, %v7857_v37 }
 0x21a   : > { %5360 = vmatprep.mubr.msk.bf16.mxu0 %vm524_vm0, %v7858_v48  ;;  %5369 = vmatpush3.bf16.msra.mxu0 %v6024_v16  ;;  %v6026_v48 = vld [vmem:[%s7692_s3 + $0x108] sm:$0xff]  }
 0x21b   : > { %5370 = vmatprep.subr.bf16.mxu0 %v6025_v10  ;;  %5493 = vmatmul.mubr.msk.bf16.gmra.mrb[8].mxu1 %vm524_vm0, %v7859_v11 }
 0x21c   : > { %5500 = vmatprep.mubr.msk.bf16.mxu1 %vm524_vm0, %v6856_v7  ;;  %v6027_v7 = vld [vmem:[%s7692_s3 + $0x110] sm:$0xff]  }
 0x21e   : > { %5371 = vmatpush3.bf16.msra.mxu0 %v6025_v10 }
 0x21f   : > { %5384 = vmatprep.subr.bf16.mxu0 %v6028_v36 }
 0x221   : > { %5361 = vmatmul.mubr.msk.bf16.gmra.mrb[84].mxu0 %vm524_vm0, %v6889_v9  ;;  %v6029_v9 = vld [vmem:[%s7692_s3 + $0x88] sm:$0xff]  }
 0x222   : > { %5364 = vmatprep.mubr.msk.bf16.mxu0 %vm524_vm0, %v7822_v42 }
 0x223   : > { %5501 = vmatmul.mubr.msk.bf16.vlgmr.msra.gmra.mrb[0].mxu1 %vm524_vm0, %v6871_v55  ;;  %v6030_v55 = vld [vmem:[%s7692_s3 + $0x118] sm:$0xff]  }
 0x224   : > { %5513 = vmatpush3.bf16.msra.mxu1 %v6023_v43  ;;  %5504 = vmatprep.mubr.msk.bf16.mxu1 %vm524_vm0, %v6910_v31  ;;  %v6031_v31 = vld [vmem:[%s7692_s3 + $0x120] sm:$0xff]  }
 0x225   : > { %5514 = vmatprep.subr.bf16.mxu1 %v6026_v48 }
 0x228   : > { %5515 = vmatpush3.bf16.msra.mxu1 %v6026_v48 }
 0x229   : > { %5365 = vmatmul.mubr.msk.bf16.gmra.mrb[88].mxu0 %vm524_vm0, %v7823_v62  ;;  %5528 = vmatprep.subr.bf16.mxu1 %v6027_v7  ;;  %v6039_v62 = vld [vmem:[%s7692_s3 + $0x160] sm:$0xff]  }
 0x22a   : > { %5372 = vmatprep.mubr.msk.bf16.mxu0 %vm524_vm0, %v7820_v47 }
 0x22b   : > { %5505 = vmatmul.mubr.msk.bf16.gmra.mrb[4].mxu1 %vm524_vm0, %v7085_v59 }
 0x22c   : > { %5508 = vmatprep.mubr.msk.bf16.mxu1 %vm524_vm0, %v7087_v1 }
 0x231   : > { %5373 = vmatmul.mubr.msk.bf16.vlgmr.msra.gmra.mrb[80].mxu0 %vm524_vm0, %v7821_v15 }
 0x232   : > { %5376 = vmatprep.mubr.msk.bf16.mxu0 %vm524_vm0, %v7824_v19  ;;  %5385 = vmatpush3.bf16.msra.mxu0 %v6028_v36 }
 0x233   : > { %5386 = vmatprep.subr.bf16.mxu0 %v6029_v9  ;;  %5509 = vmatmul.mubr.msk.bf16.gmra.mrb[8].mxu1 %vm524_vm0, %v7096_v51 }
 0x234   : > { %5516 = vmatprep.mubr.msk.bf16.mxu1 %vm524_vm0, %v7826_v57  ;;  %v7861_v57 = vpack.c.bf16 %v7186_v60, %v7183_v40  ;;  %v6042_v40 = vld [vmem:[%s7692_s3 + $0x178] sm:$0xff]  }
 0x236   : > { %5387 = vmatpush3.bf16.msra.mxu0 %v6029_v9 }
 0x239   : > { %5377 = vmatmul.mubr.msk.bf16.gmra.mrb[84].mxu0 %vm524_vm0, %v6976_v58  ;;  %v6033_v58 = vld [vmem:[%s7692_s3 + $0x130] sm:$0xff]  }
 0x23a   : > { %5380 = vmatprep.mubr.msk.bf16.mxu0 %vm524_vm0, %v7831_v38 }
 0x23b   : > { %5517 = vmatmul.mubr.msk.bf16.vlgmr.msra.gmra.mrb[0].mxu1 %vm524_vm0, %v7827_v26 }
 0x23c   : > { %5529 = vmatpush3.bf16.msra.mxu1 %v6027_v7  ;;  %5520 = vmatprep.mubr.msk.bf16.mxu1 %vm524_vm0, %v6989_v52  ;;  %v6035_v52 = vld [vmem:[%s7692_s3 + $0x140] sm:$0xff]  }
 0x23d   : > { %5530 = vmatprep.subr.bf16.mxu1 %v6030_v55 }
 0x240   : > { %5531 = vmatpush3.bf16.msra.mxu1 %v6030_v55 }
 0x241   : > { %5381 = vmatmul.mubr.msk.bf16.gmra.mrb[88].mxu0 %vm524_vm0, %v7005_v6  ;;  %5544 = vmatprep.subr.bf16.mxu1 %v6031_v31  ;;  %v6036_v6 = vld [vmem:[%s7692_s3 + $0x148] sm:$0xff]  }
 0x242   : > { %5388 = vmatprep.mubr.msk.bf16.mxu0 %vm524_vm0, %v6984_v45  ;;  %v6032_v45 = vld [vmem:[%s7692_s3 + $0x128] sm:$0xff]  }
 0x243   : > { %5521 = vmatmul.mubr.msk.bf16.gmra.mrb[4].mxu1 %vm524_vm0, %v7092_v46 }
 0x244   : > { %5524 = vmatprep.mubr.msk.bf16.mxu1 %vm524_vm0, %v7106_v33 }
 0x249   : > { %5389 = vmatmul.mubr.msk.bf16.vlgmr.msra.gmra.mrb[80].mxu0 %vm524_vm0, %v7830_v56 }
 0x24a   : > { %5392 = vmatprep.mubr.msk.bf16.mxu0 %vm524_vm0, %v7832_v41 }
 0x24b   : > { %5525 = vmatmul.mubr.msk.bf16.gmra.mrb[8].mxu1 %vm524_vm0, %v7114_v53 }
 0x24c   : > { %5532 = vmatprep.mubr.msk.bf16.mxu1 %vm524_vm0, %v6994_v28  ;;  %v6034_v28 = vld [vmem:[%s7692_s3 + $0x138] sm:$0xff]  }
 0x251   : > { %5393 = vmatmul.mubr.msk.bf16.gmra.mrb[84].mxu0 %vm524_vm0, %v7837_v5 }
 0x252   : > { %5396 = vmatprep.mubr.msk.bf16.mxu0 %vm524_vm0, %v7840_v49 }
 0x253   : > { %5533 = vmatmul.mubr.msk.bf16.vlgmr.msra.gmra.mrb[0].mxu1 %vm524_vm0, %v7016_v35  ;;  %v6037_v35 = vld [vmem:[%s7692_s3 + $0x150] sm:$0xff]  }
 0x254   : > { %5545 = vmatpush3.bf16.msra.mxu1 %v6031_v31  ;;  %5536 = vmatprep.mubr.msk.bf16.mxu1 %vm524_vm0, %v7030_v63  ;;  %v6038_v63 = vld [vmem:[%s7692_s3 + $0x158] sm:$0xff]  }
 0x255   : > { %5546 = vmatprep.subr.bf16.mxu1 %v6032_v45 }
 0x258   : > { %5547 = vmatpush3.bf16.msra.mxu1 %v6032_v45 }
 0x259   : > { %5397 = vmatmul.mubr.msk.bf16.gmra.mrb[88].mxu0 %vm524_vm0, %v7841_v32  ;;  %5560 = vmatprep.subr.bf16.mxu1 %v6033_v58 }
 0x25b   : > { %5537 = vmatmul.mubr.msk.bf16.gmra.mrb[4].mxu1 %vm524_vm0, %v7111_v44 }
 0x25c   : > { %5540 = vmatprep.mubr.msk.bf16.mxu1 %vm524_vm0, %v7142_v21 }
 0x263   : > { %5541 = vmatmul.mubr.msk.bf16.gmra.mrb[8].mxu1 %vm524_vm0, %v7151_v23 }
 0x264   : > { %5548 = vmatprep.mubr.msk.bf16.mxu1 %vm524_vm0, %v7844_v4 }
 0x26b   : > { %5549 = vmatmul.mubr.msk.bf16.vlgmr.msra.gmra.mrb[0].mxu1 %vm524_vm0, %v7845_v50 }
 0x26c   : > { %5561 = vmatpush3.bf16.msra.mxu1 %v6033_v58  ;;  %5552 = vmatprep.mubr.msk.bf16.mxu1 %vm524_vm0, %v7847_v14 }
 0x26d   : > { %5562 = vmatprep.subr.bf16.mxu1 %v6034_v28 }
 0x270   : > { %5563 = vmatpush3.bf16.msra.mxu1 %v6034_v28 }
 0x271   : > { %5576 = vmatprep.subr.bf16.mxu1 %v6035_v52 }
 0x273   : > { %5553 = vmatmul.mubr.msk.bf16.gmra.mrb[4].mxu1 %vm524_vm0, %v7153_v13 }
 0x274   : > { %5556 = vmatprep.mubr.msk.bf16.mxu1 %vm524_vm0, %v7156_v22 }
 0x27b   : > { %5557 = vmatmul.mubr.msk.bf16.gmra.mrb[8].mxu1 %vm524_vm0, %v7130_v8 }
 0x27c   : > { %5564 = vmatprep.mubr.msk.bf16.mxu1 %vm524_vm0, %v7855_v12 }
 0x283   : > { %5565 = vmatmul.mubr.msk.bf16.vlgmr.msra.gmra.mrb[0].mxu1 %vm524_vm0, %v7856_v3 }
 0x284   : > { %5577 = vmatpush3.bf16.msra.mxu1 %v6035_v52  ;;  %5568 = vmatprep.mubr.msk.bf16.mxu1 %vm524_vm0, %v7859_v11 }
 0x285   : > { %5578 = vmatprep.subr.bf16.mxu1 %v6036_v6 }
 0x288   : > { %5579 = vmatpush3.bf16.msra.mxu1 %v6036_v6 }
 0x289   : > { %5592 = vmatprep.subr.bf16.mxu1 %v6037_v35 }
 0x28b   : > { %5569 = vmatmul.mubr.msk.bf16.gmra.mrb[4].mxu1 %vm524_vm0, %v7124_v39 }
 0x28c   : > { %5572 = vmatprep.mubr.msk.bf16.mxu1 %vm524_vm0, %v7133_v2 }
 0x293   : > { %5573 = vmatmul.mubr.msk.bf16.gmra.mrb[8].mxu1 %vm524_vm0, %v7149_v29 }
 0x294   : > { %5580 = vmatprep.mubr.msk.bf16.mxu1 %vm524_vm0, %v7085_v59  ;;  %v7860_v59 = vpack.c.bf16 %v7178_v24, %v7175_v20  ;;  %v6041_v20 = vld [vmem:[%s7692_s3 + $0x170] sm:$0xff]   ;;  %v7864_v24 = vpack.c.bf16 %v7212_v18, %v7207_v27 }
 0x29b   : > { %5581 = vmatmul.mubr.msk.bf16.vlgmr.msra.gmra.mrb[0].mxu1 %vm524_vm0, %v7087_v1  ;;  %v7862_v1 = vpack.c.bf16 %v7207_v27, %v7198_v61  ;;  %v7870_v27 = vpack.c.bf16 %v7260_v30, %v7257_v54 }
 0x29c   : > { %5593 = vmatpush3.bf16.msra.mxu1 %v6037_v35  ;;  %5584 = vmatprep.mubr.msk.bf16.mxu1 %vm524_vm0, %v7096_v51  ;;  %v6040_v51 = vld [vmem:[%s7692_s3 + $0x168] sm:$0xff]  }
 0x29d   : > { %5594 = vmatprep.subr.bf16.mxu1 %v6038_v63 }
 0x2a0   : > { %5595 = vmatpush3.bf16.msra.mxu1 %v6038_v63 }
 0x2a1   : > { %5608 = vmatprep.subr.bf16.mxu1 %v6039_v62 }
 0x2a3   : > { %5585 = vmatmul.mubr.msk.bf16.gmra.mrb[4].mxu1 %vm524_vm0, %v7860_v59 }
 0x2a4   : > { %5588 = vmatprep.mubr.msk.bf16.mxu1 %vm524_vm0, %v7861_v57 }
 0x2ab   : > { %5589 = vmatmul.mubr.msk.bf16.gmra.mrb[8].mxu1 %vm524_vm0, %v7862_v1 }
 0x2ac   : > { %5596 = vmatprep.mubr.msk.bf16.mxu1 %vm524_vm0, %v7092_v46  ;;  %v7863_v46 = vpack.c.bf16 %v7198_v61, %v7186_v60  ;;  %v6043_v60 = vld [vmem:[%s7692_s3 + $0x180] sm:$0xff]   ;;  %v7868_v61 = vpack.c.bf16 %v7257_v54, %v7226_v0 }
 0x2b3   : > { %5597 = vmatmul.mubr.msk.bf16.vlgmr.msra.gmra.mrb[0].mxu1 %vm524_vm0, %v7106_v33  ;;  %v7865_v33 = vld [vmem:[#allocation40_spill] sm:$0xff] }
 0x2b4   : > { %5609 = vmatpush3.bf16.msra.mxu1 %v6039_v62  ;;  %5600 = vmatprep.mubr.msk.bf16.mxu1 %vm524_vm0, %v7114_v53  ;;  %v7866_v53 = vpack.c.bf16 %v7226_v0, %v7865_v33  ;;  %v7873_v0 = vld [vmem:[#allocation21_spill] sm:$0xff] }
 0x2b5   : > { %5610 = vmatprep.subr.bf16.mxu1 %v6040_v51 }
 0x2b8   : > { %5611 = vmatpush3.bf16.msra.mxu1 %v6040_v51 }
 0x2b9   : > { %5624 = vmatprep.subr.bf16.mxu1 %v6041_v20 }
 0x2bb   : > { %5601 = vmatmul.mubr.msk.bf16.gmra.mrb[4].mxu1 %vm524_vm0, %v7863_v46 }
 0x2bc   : > { %5604 = vmatprep.mubr.msk.bf16.mxu1 %vm524_vm0, %v7864_v24 }
 0x2c3   : > { %5605 = vmatmul.mubr.msk.bf16.gmra.mrb[8].mxu1 %vm524_vm0, %v7866_v53 }
 0x2c4   : > { %5612 = vmatprep.mubr.msk.bf16.mxu1 %vm524_vm0, %v7111_v44  ;;  %v7867_v44 = vpack.c.bf16 %v7865_v33, %v7212_v18  ;;  %v7872_v18 = vld [vmem:[#allocation41_spill] sm:$0xff] }
 0x2c5   : > { %v7874_v19 = vpack.c.bf16 %v7872_v18, %v7873_v0 }
 0x2cb   : > { %5613 = vmatmul.mubr.msk.bf16.vlgmr.msra.gmra.mrb[0].mxu1 %vm524_vm0, %v7142_v21  ;;  %v7869_v21 = vpack.c.bf16 %v7265_v34, %v7260_v30  ;;  %v7878_v30 = vld [vmem:[#allocation20_spill] sm:$0xff] }
 0x2cc   : > { %5625 = vmatpush3.bf16.msra.mxu1 %v6041_v20  ;;  %5616 = vmatprep.mubr.msk.bf16.mxu1 %vm524_vm0, %v7151_v23  ;;  %v6044_v23 = vld [vmem:[%s7692_s3 + $0x188] sm:$0xff]  }
 0x2cd   : > { %5626 = vmatprep.subr.bf16.mxu1 %v6042_v40 }
 0x2d0   : > { %5627 = vmatpush3.bf16.msra.mxu1 %v6042_v40 }
 0x2d1   : > { %5640 = vmatprep.subr.bf16.mxu1 %v6043_v60 }
 0x2d3   : > { %5617 = vmatmul.mubr.msk.bf16.gmra.mrb[4].mxu1 %vm524_vm0, %v7867_v44 }
 0x2d4   : > { %5620 = vmatprep.mubr.msk.bf16.mxu1 %vm524_vm0, %v7868_v61 }
 0x2db   : > { %5621 = vmatmul.mubr.msk.bf16.gmra.mrb[8].mxu1 %vm524_vm0, %v7869_v21 }
 0x2dc   : > { %5628 = vmatprep.mubr.msk.bf16.mxu1 %vm524_vm0, %v7153_v13  ;;  %v7871_v13 = vpack.c.bf16 %v7814_v25, %v7265_v34  ;;  %v7879_v34 = vld [vmem:[#allocation23_spill] sm:$0xff] }
 0x2dd   : > { %v7880_v47 = vpack.c.bf16 %v7878_v30, %v7879_v34 }
 0x2e3   : > { %5629 = vmatmul.mubr.msk.bf16.vlgmr.msra.gmra.mrb[0].mxu1 %vm524_vm0, %v7156_v22  ;;  %v7876_v22 = vld [vmem:[#allocation22_spill] sm:$0xff] }
 0x2e4   : > { %5641 = vmatpush3.bf16.msra.mxu1 %v6043_v60  ;;  %5632 = vmatprep.mubr.msk.bf16.mxu1 %vm524_vm0, %v7130_v8  ;;  %v7875_v8 = vpack.c.bf16 %v7873_v0, %v7814_v25  ;;  %v7877_v54 = vpack.c.bf16 %v7876_v22, %v7872_v18  ;;  %v4921_v60 = vld [vmem:[%s7693_s4] ss:$0 sm:$0xff] }
 0x2e5   : > { %5642 = vmatprep.subr.bf16.mxu1 %v6044_v23 }
 0x2e8   : > { %5643 = vmatpush3.bf16.msra.mxu1 %v6044_v23 }
 0x2eb   : > { %5633 = vmatmul.mubr.msk.bf16.gmra.mrb[4].mxu1 %vm524_vm0, %v7870_v27 }
 0x2ec   : > { %5636 = vmatprep.mubr.msk.bf16.mxu1 %vm524_vm0, %v7871_v13 }
 0x2f3   : > { %5637 = vmatmul.mubr.msk.bf16.gmra.mrb[8].mxu1 %vm524_vm0, %v7874_v19 }
 0x2f4   : > { %5644 = vmatprep.mubr.msk.bf16.mxu1 %vm524_vm0, %v7124_v39 }
 0x2fb   : > { %5645 = vmatmul.mubr.msk.bf16.vlgmr.msra.gmra.mrb[0].mxu1 %vm524_vm0, %v7133_v2 }
 0x2fc   : > { %5648 = vmatprep.mubr.msk.bf16.mxu1 %vm524_vm0, %v7149_v29 }
 0x303   : > { %5649 = vmatmul.mubr.msk.bf16.gmra.mrb[4].mxu1 %vm524_vm0, %v7875_v8 }
 0x304   : > { %5652 = vmatprep.mubr.msk.bf16.mxu1 %vm524_vm0, %v7877_v54 }
 0x30b   : > { %5653 = vmatmul.mubr.msk.bf16.gmra.mrb[8].mxu1 %vm524_vm0, %v7880_v47 }
 0x31c   : > { %v5390_v39 = vpop.f32.mrb[80].mxu0 }
 0x31d   : > { %v2455_v2 = vpop.f32.mrb[81].mxu0 }
 0x31e   : > { %v5391_v15 = vpop.f32.mrb[82].mxu0 }
 0x31f   : > { %v2458_v42 = vpop.f32.mrb[83].mxu0 }
 0x324   : > { %v5394_v29 = vpop.f32.mrb[84].mxu0 }
 0x325   : > { %v2471_v26 = vpop.f32.mrb[85].mxu0 }
 0x326   : > { %v5395_v56 = vpop.f32.mrb[86].mxu0 }
 0x327   : > { %v2474_v25 = vpop.f32.mrb[87].mxu0 }
 0x32c   : > { %v5398_v38 = vpop.f32.mrb[88].mxu0 }
 0x32d   : > { %v2487_v41 = vpop.f32.mrb[89].mxu0 }
 0x32e   : > { %v5399_v5 = vpop.f32.mrb[90].mxu0 }
 0x32f   : > { %v2490_v49 = vpop.f32.mrb[91].mxu0 }
 0x3ce   : > { %v5646_v32 = vpop.f32.mrb[0].mxu1 }
 0x3cf   : > { %v5656_v4 = vadd.f32 %v5646_v32, %v5390_v39  ;;  %v4465_v50 = vpop.f32.mrb[1].mxu1 }
 0x3d0   : > { %v5657_v16 = vadd.f32 %v4465_v50, %v2455_v2  ;;  %v5647_v14 = vpop.f32.mrb[2].mxu1 }
 0x3d1   : > { %v5658_v43 = vadd.f32 %v5647_v14, %v5391_v15  ;;  %v4468_v17 = vpop.f32.mrb[3].mxu1  ;;  %v4539_v46 = vsel %vm4524_vm7, %v5656_v4, -inf }
 0x3d2   : > { %v5659_v12 = vadd.f32 %v4468_v17, %v2458_v42  ;;  %v4525_v48 = vsel %vm4524_vm7, %v5657_v16, -inf }
 0x3d3   : > { %v4526_v21 = vsel %vm4524_vm7, %v5658_v43, -inf }
 0x3d4   : > { %v4532_v58 = vsel %vm4524_vm7, %v5659_v12, -inf }
 0x3d6   : > { %v5650_v3 = vpop.f32.mrb[4].mxu1 }
 0x3d7   : > { %v5660_v10 = vadd.f32 %v5650_v3, %v5394_v29  ;;  %v4481_v37 = vpop.f32.mrb[5].mxu1 }
 0x3d8   : > { %v5661_v36 = vadd.f32 %v4481_v37, %v2471_v26  ;;  %v5651_v11 = vpop.f32.mrb[6].mxu1 }
 0x3d9   : > { %v4527_v7 = vsel %vm4524_vm7, %v5660_v10, -inf  ;;  %v5662_v9 = vadd.f32 %v5651_v11, %v5395_v56  ;;  %v4484_v55 = vpop.f32.mrb[7].mxu1 }
 0x3da   : > { %v4528_v31 = vmax.f32 %v4525_v48, %v4527_v7  ;;  %v5663_v45 = vadd.f32 %v4484_v55, %v2474_v25  ;;  %v4533_v57 = vsel %vm4524_vm7, %v5661_v36, -inf }
 0x3db   : > { %v4534_v28 = vsel %vm4524_vm7, %v5662_v9, -inf }
 0x3dc   : > { %v4535_v52 = vmax.f32 %v4532_v58, %v4534_v28  ;;  %v4540_v40 = vsel %vm4524_vm7, %v5663_v45, -inf }
 0x3de   : > { %v5654_v6 = vpop.f32.mrb[8].mxu1 }
 0x3df   : > { %v5664_v35 = vadd.f32 %v5654_v6, %v5398_v38  ;;  %v4497_v63 = vpop.f32.mrb[9].mxu1 }
 0x3e0   : > { %v5665_v62 = vadd.f32 %v4497_v63, %v2487_v41  ;;  %v5655_v59 = vpop.f32.mrb[10].mxu1 }
 0x3e1   : > { %v4536_v1 = vsel %vm4524_vm7, %v5664_v35, -inf  ;;  %v5666_v51 = vadd.f32 %v5655_v59, %v5399_v5  ;;  %v4500_v20 = vpop.f32.mrb[11].mxu1 }
 0x3e2   : > { %v4537_v24 = vmax.f32 %v4533_v57, %v4536_v1  ;;  %v4541_v33 = vsel %vm4524_vm7, %v5665_v62, -inf  ;;  %v5667_v53 = vadd.f32 %v4500_v20, %v2490_v49 }
 0x3e3   : > { %v4542_v44 = vmax.f32 %v4539_v46, %v4541_v33  ;;  %v4543_v61 = vsel %vm4524_vm7, %v5666_v51, -inf }
 0x3e4   : > { %v4538_v23 = vmax.f32 %v4535_v52, %v4537_v24  ;;  %v4544_v27 = vmax.f32 %v4540_v40, %v4543_v61  ;;  %v4529_v13 = vsel %vm4524_vm7, %v5667_v53, -inf }
 0x3e5   : > { %v4530_v18 = vmax.f32 %v4526_v21, %v4529_v13 }
 0x3e6   : > { %v4554_v0 = vadd.f32 %v4921_v60, %v4538_v23  ;;  %v4545_v19 = vmax.f32 %v4542_v44, %v4544_v27 }
 0x3e7   : > { %v4531_v8 = vmax.f32 %v4528_v31, %v4530_v18 }
 0x3e8   : > { %v4557_v22 = vmax.f32 %v4554_v0, 0.0  ;;  %v4555_v54 = vadd.f32 %v4921_v60, %v4545_v19 }
 0x3e9   : > { %v4553_v30 = vadd.f32 %v4921_v60, %v4531_v8 }
 0x3ea   : > { %v4928_v34 = vpack.c.bf16 %v4557_v22, %v4557_v22  ;;  %v4558_v47 = vmax.f32 %v4555_v54, 0.0 }
 0x3eb   : > { %v4556_v39 = vmax.f32 %v4553_v30, 0.0 }
 0x3ec   : > { %4574 = vst.msk [vmem:[%s226_s21 + $0x4] sm:$0xf] %vm4572_vm8, %v4928_v34  ;;  %v4929_v2 = vpack.c.bf16 %v4558_v47, %v4558_v47 }
 0x3ed   : > { %v4927_v15 = vpack.c.bf16 %v4556_v39, %v4556_v39 }
 0x3ee   : > { %4575 = vst.msk [vmem:[%s226_s21 + $0x8] sm:$0xf] %vm4572_vm8, %v4929_v2 }
 0x3ef   : > { %4573 = vst.msk [vmem:[%s226_s21] sm:$0xf] %vm4572_vm8, %v4927_v15 }
 0x3f0 PF: > { %s15_s18 = sadd.s32 1, %s6051_s18  }
 0x3f1   : > { %p12_p5 = scmp.ge.s32.totalorder %s15_s18, 4  }
 0x3f3   :  { %14 = sbr.rel (!%p12_p5) target bundleno = 1 (0x1), region = 70 }

// kernel: cnn_forward_pallas.3
= control target key start
LH: loop header
LB: loop body
LE: loop exit
PB: predicated region body
PF: predicated region fallthrough
CT: control target
= control target key end

     0   :  { %s2079_s1 = inlined_call_operand.vmem [shape: bf16[1024,256], index: 1, kind: input, shape index: {}]   ;;  %s2080_s0 = inlined_call_operand.vmem [shape: bf16[8,1024], index: 0, kind: input, shape index: {}]   ;;  %s2081_s3 = inlined_call_operand.vmem [shape: bf16[256,128], index: 3, kind: input, shape index: {}]   ;;  %s2082_s2 = inlined_call_operand.vmem [shape: f32[1,256], index: 2, kind: input, shape index: {}]   ;;  %s2083_s4 = inlined_call_operand.vmem [shape: f32[1,128], index: 4, kind: input, shape index: {}]   ;;  %s2084_s5 = inlined_call_operand.vmem [shape: f32[8,128], index: 5, kind: output, shape index: {}]  }
   0x1   :  { %v1368_v0 = vld [vmem:[%s2079_s1 + $0x4] ss:$8 sps:$4 sm:$0xff]   ;;  %v1372_v2 = vld [vmem:[%s2079_s1] ss:$8 sps:$4 sm:$0xff]   ;;  %v1374_v4 = vld [vmem:[%s2079_s1 + $0x14] ss:$8 sps:$4 sm:$0xff]  }
   0x2   :  { %v1370_v1 = vld [vmem:[%s2079_s1 + $0x204] ss:$8 sps:$4 sm:$0xff]   ;;  %833 = vmatprep.subr.bf16.mxu1 %v1368_v0  ;;  %v1373_v3 = vld [vmem:[%s2079_s1 + $0x200] ss:$8 sps:$4 sm:$0xff]   ;;  %v1376_v5 = vld [vmem:[%s2079_s1 + $0x214] ss:$8 sps:$4 sm:$0xff]  }
   0x3   :  { %915 = vmatprep.subr.bf16.mxu0 %v1370_v1  ;;  %834 = vmatpush1.bf16.msra.mxu1 %v1372_v2  ;;  %v1378_v6 = vld [vmem:[%s2079_s1 + $0x10] ss:$8 sps:$4 sm:$0xff]   ;;  %v1380_v8 = vld [vmem:[%s2079_s1 + $0x24] ss:$8 sps:$4 sm:$0xff]   ;;  %v1384_v10 = vld [vmem:[%s2079_s1 + $0x20] ss:$8 sps:$4 sm:$0xff]  }
   0x4   :  { %916 = vmatpush1.bf16.msra.mxu0 %v1373_v3  ;;  %835 = vmatprep.subr.bf16.mxu1 %v1374_v4  ;;  %v1379_v7 = vld [vmem:[%s2079_s1 + $0x210] ss:$8 sps:$4 sm:$0xff]   ;;  %v1382_v9 = vld [vmem:[%s2079_s1 + $0x224] ss:$8 sps:$4 sm:$0xff]   ;;  %v1385_v11 = vld [vmem:[%s2079_s1 + $0x220] ss:$8 sps:$4 sm:$0xff]  }
   0x5   :  { %917 = vmatprep.subr.bf16.mxu0 %v1376_v5  ;;  %v1386_v12 = vld [vmem:[%s2079_s1 + $0x34] ss:$8 sps:$4 sm:$0xff]   ;;  %v1390_v14 = vld [vmem:[%s2079_s1 + $0x30] ss:$8 sps:$4 sm:$0xff]   ;;  %v1392_v16 = vld [vmem:[%s2079_s1 + $0x44] ss:$8 sps:$4 sm:$0xff]  }
   0x6   :  { %v1388_v13 = vld [vmem:[%s2079_s1 + $0x234] ss:$8 sps:$4 sm:$0xff]   ;;  %v1391_v15 = vld [vmem:[%s2079_s1 + $0x230] ss:$8 sps:$4 sm:$0xff]   ;;  %v1394_v17 = vld [vmem:[%s2079_s1 + $0x244] ss:$8 sps:$4 sm:$0xff]  }
   0x7   :  { %836 = vmatpush1.bf16.msra.mxu1 %v1378_v6  ;;  %v1396_v18 = vld [vmem:[%s2079_s1 + $0x40] ss:$8 sps:$4 sm:$0xff]   ;;  %v1398_v20 = vld [vmem:[%s2079_s1 + $0x54] ss:$8 sps:$4 sm:$0xff]   ;;  %v1402_v22 = vld [vmem:[%s2079_s1 + $0x50] ss:$8 sps:$4 sm:$0xff]  }
   0x8   :  { %918 = vmatpush1.bf16.msra.mxu0 %v1379_v7  ;;  %837 = vmatprep.subr.bf16.mxu1 %v1380_v8  ;;  %v1397_v19 = vld [vmem:[%s2079_s1 + $0x240] ss:$8 sps:$4 sm:$0xff]   ;;  %v1400_v21 = vld [vmem:[%s2079_s1 + $0x254] ss:$8 sps:$4 sm:$0xff]   ;;  %v1403_v23 = vld [vmem:[%s2079_s1 + $0x250] ss:$8 sps:$4 sm:$0xff]  }
   0x9   :  { %919 = vmatprep.subr.bf16.mxu0 %v1382_v9  ;;  %v1404_v24 = vld [vmem:[%s2079_s1 + $0x64] ss:$8 sps:$4 sm:$0xff]   ;;  %v1408_v26 = vld [vmem:[%s2079_s1 + $0x60] ss:$8 sps:$4 sm:$0xff]   ;;  %v1410_v28 = vld [vmem:[%s2079_s1 + $0x74] ss:$8 sps:$4 sm:$0xff]  }
   0xa   :  { %v1406_v25 = vld [vmem:[%s2079_s1 + $0x264] ss:$8 sps:$4 sm:$0xff]   ;;  %v1409_v27 = vld [vmem:[%s2079_s1 + $0x260] ss:$8 sps:$4 sm:$0xff]   ;;  %v1412_v29 = vld [vmem:[%s2079_s1 + $0x274] ss:$8 sps:$4 sm:$0xff]  }
   0xb   :  { %838 = vmatpush1.bf16.msra.mxu1 %v1384_v10  ;;  %v1414_v30 = vld [vmem:[%s2079_s1 + $0x70] ss:$8 sps:$4 sm:$0xff]   ;;  %v1416_v32 = vld [vmem:[%s2079_s1 + $0x84] ss:$8 sps:$4 sm:$0xff]   ;;  %v1420_v34 = vld [vmem:[%s2079_s1 + $0x80] ss:$8 sps:$4 sm:$0xff]  }
   0xc   :  { %920 = vmatpush1.bf16.msra.mxu0 %v1385_v11  ;;  %839 = vmatprep.subr.bf16.mxu1 %v1386_v12  ;;  %v1415_v31 = vld [vmem:[%s2079_s1 + $0x270] ss:$8 sps:$4 sm:$0xff]   ;;  %v1418_v33 = vld [vmem:[%s2079_s1 + $0x284] ss:$8 sps:$4 sm:$0xff]   ;;  %v1421_v35 = vld [vmem:[%s2079_s1 + $0x280] ss:$8 sps:$4 sm:$0xff]  }
   0xd   :  { %921 = vmatprep.subr.bf16.mxu0 %v1388_v13  ;;  %v1422_v36 = vld [vmem:[%s2079_s1 + $0x94] ss:$8 sps:$4 sm:$0xff]   ;;  %v1426_v38 = vld [vmem:[%s2079_s1 + $0x90] ss:$8 sps:$4 sm:$0xff]   ;;  %v1428_v40 = vld [vmem:[%s2079_s1 + $0xa4] ss:$8 sps:$4 sm:$0xff]  }
   0xe   :  { %v1424_v37 = vld [vmem:[%s2079_s1 + $0x294] ss:$8 sps:$4 sm:$0xff]   ;;  %v1427_v39 = vld [vmem:[%s2079_s1 + $0x290] ss:$8 sps:$4 sm:$0xff]   ;;  %v1430_v41 = vld [vmem:[%s2079_s1 + $0x2a4] ss:$8 sps:$4 sm:$0xff]  }
   0xf   :  { %840 = vmatpush1.bf16.msra.mxu1 %v1390_v14  ;;  %v1432_v42 = vld [vmem:[%s2079_s1 + $0xa0] ss:$8 sps:$4 sm:$0xff]   ;;  %v1434_v44 = vld [vmem:[%s2079_s1 + $0xb4] ss:$8 sps:$4 sm:$0xff]   ;;  %v1438_v47 = vld [vmem:[%s2079_s1 + $0xb0] ss:$8 sps:$4 sm:$0xff]  }
  0x10   :  { %922 = vmatpush1.bf16.msra.mxu0 %v1391_v15  ;;  %841 = vmatprep.subr.bf16.mxu1 %v1392_v16  ;;  %v1433_v43 = vld [vmem:[%s2079_s1 + $0x2a0] ss:$8 sps:$4 sm:$0xff]   ;;  %v1436_v45 = vld [vmem:[%s2079_s1 + $0x2b4] ss:$8 sps:$4 sm:$0xff]   ;;  %v1439_v49 = vld [vmem:[%s2079_s1 + $0x2b0] ss:$8 sps:$4 sm:$0xff]  }
  0x11   :  { %923 = vmatprep.subr.bf16.mxu0 %v1394_v17  ;;  %v21_v46 = vld [vmem:[%s2080_s0] sm:$0xff]  ;;  %v23_v50 = vld [vmem:[%s2080_s0 + $0x10] sm:$0xff] }
  0x12   :  { %v1182_v48 = vcombine.high %v21_v46, %v21_v46  ;;  %v1440_v51 = vld [vmem:[%s2079_s1 + $0xc4] ss:$8 sps:$4 sm:$0xff]   ;;  %v1186_v53 = vcombine.high %v23_v50, %v23_v50  ;;  %v1444_v54 = vld [vmem:[%s2079_s1 + $0xc0] ss:$8 sps:$4 sm:$0xff]   ;;  %v1446_v56 = vld [vmem:[%s2079_s1 + $0xd4] ss:$8 sps:$4 sm:$0xff]   ;;  %v1181_v6 = vcombine.low %v21_v46, %v21_v46  ;;  %v1185_v7 = vcombine.low %v23_v50, %v23_v50 }
  0x13   :  { %842 = vmatpush1.bf16.msra.mxu1 %v1396_v18  ;;  %v1442_v52 = vld [vmem:[%s2079_s1 + $0x2c4] ss:$8 sps:$4 sm:$0xff]   ;;  %v1445_v55 = vld [vmem:[%s2079_s1 + $0x2c0] ss:$8 sps:$4 sm:$0xff]   ;;  %v1448_v57 = vld [vmem:[%s2079_s1 + $0x2d4] ss:$8 sps:$4 sm:$0xff]  }
  0x14   :  { %924 = vmatpush1.bf16.msra.mxu0 %v1397_v19  ;;  %843 = vmatprep.subr.bf16.mxu1 %v1398_v20  ;;  %v1450_v58 = vld [vmem:[%s2079_s1 + $0xd0] ss:$8 sps:$4 sm:$0xff]   ;;  %v1452_v60 = vld [vmem:[%s2079_s1 + $0xe4] ss:$8 sps:$4 sm:$0xff]   ;;  %v1456_v62 = vld [vmem:[%s2079_s1 + $0xe0] ss:$8 sps:$4 sm:$0xff]  }
  0x15   :  { %925 = vmatprep.subr.bf16.mxu0 %v1400_v21  ;;  %865 = vmatprep.mubr.bf16.mxu1 %v1182_v48  ;;  %v1451_v59 = vld [vmem:[%s2079_s1 + $0x2d0] ss:$8 sps:$4 sm:$0xff]   ;;  %v1454_v61 = vld [vmem:[%s2079_s1 + $0x2e4] ss:$8 sps:$4 sm:$0xff]   ;;  %v1457_v63 = vld [vmem:[%s2079_s1 + $0x2e0] ss:$8 sps:$4 sm:$0xff]  }
  0x16   :  { %947 = vmatprep.mubr.bf16.mxu0 %v1186_v53  ;;  %v1458_v0 = vld [vmem:[%s2079_s1 + $0xf4] ss:$8 sps:$4 sm:$0xff]   ;;  %v1462_v2 = vld [vmem:[%s2079_s1 + $0xf0] ss:$8 sps:$4 sm:$0xff]   ;;  %v1468_v4 = vld [vmem:[%s2079_s1 + $0x104] ss:$8 sps:$4 sm:$0xff]  }
  0x17   :  { %844 = vmatpush1.bf16.msra.mxu1 %v1402_v22  ;;  %v1460_v1 = vld [vmem:[%s2079_s1 + $0x2f4] ss:$8 sps:$4 sm:$0xff]   ;;  %v1463_v3 = vld [vmem:[%s2079_s1 + $0x2f0] ss:$8 sps:$4 sm:$0xff]   ;;  %v1473_v5 = vld [vmem:[%s2079_s1 + $0x304] ss:$8 sps:$4 sm:$0xff]  }
  0x18   :  { %926 = vmatpush1.bf16.msra.mxu0 %v1403_v23  ;;  %845 = vmatprep.subr.bf16.mxu1 %v1404_v24  ;;  %v1466_v8 = vld [vmem:[%s2079_s1 + $0x100] ss:$8 sps:$4 sm:$0xff]   ;;  %v1476_v10 = vld [vmem:[%s2079_s1 + $0x114] ss:$8 sps:$4 sm:$0xff]   ;;  %v1474_v12 = vld [vmem:[%s2079_s1 + $0x110] ss:$8 sps:$4 sm:$0xff]  }
  0x19   :  { %927 = vmatprep.subr.bf16.mxu0 %v1406_v25  ;;  %v1471_v9 = vld [vmem:[%s2079_s1 + $0x300] ss:$8 sps:$4 sm:$0xff]   ;;  %v1479_v11 = vld [vmem:[%s2079_s1 + $0x314] ss:$8 sps:$4 sm:$0xff]   ;;  %v1477_v13 = vld [vmem:[%s2079_s1 + $0x310] ss:$8 sps:$4 sm:$0xff]  }
  0x1a   :  { %v1482_v14 = vld [vmem:[%s2079_s1 + $0x124] ss:$8 sps:$4 sm:$0xff]   ;;  %v1480_v16 = vld [vmem:[%s2079_s1 + $0x120] ss:$8 sps:$4 sm:$0xff]   ;;  %v1488_v18 = vld [vmem:[%s2079_s1 + $0x134] ss:$8 sps:$4 sm:$0xff]  }
  0x1b   :  { %846 = vmatpush1.bf16.msra.mxu1 %v1408_v26  ;;  %v1485_v15 = vld [vmem:[%s2079_s1 + $0x324] ss:$8 sps:$4 sm:$0xff]   ;;  %v1483_v17 = vld [vmem:[%s2079_s1 + $0x320] ss:$8 sps:$4 sm:$0xff]   ;;  %v1491_v19 = vld [vmem:[%s2079_s1 + $0x334] ss:$8 sps:$4 sm:$0xff]  }
  0x1c   :  { %928 = vmatpush1.bf16.msra.mxu0 %v1409_v27  ;;  %847 = vmatprep.subr.bf16.mxu1 %v1410_v28  ;;  %v1486_v20 = vld [vmem:[%s2079_s1 + $0x130] ss:$8 sps:$4 sm:$0xff]   ;;  %v1494_v22 = vld [vmem:[%s2079_s1 + $0x144] ss:$8 sps:$4 sm:$0xff]   ;;  %v1492_v24 = vld [vmem:[%s2079_s1 + $0x140] ss:$8 sps:$4 sm:$0xff]  }
  0x1d   :  { %929 = vmatprep.subr.bf16.mxu0 %v1412_v29  ;;  %v1489_v21 = vld [vmem:[%s2079_s1 + $0x330] ss:$8 sps:$4 sm:$0xff]   ;;  %v1497_v23 = vld [vmem:[%s2079_s1 + $0x344] ss:$8 sps:$4 sm:$0xff]   ;;  %v1495_v25 = vld [vmem:[%s2079_s1 + $0x340] ss:$8 sps:$4 sm:$0xff]  }
  0x1e   :  { %v1500_v26 = vld [vmem:[%s2079_s1 + $0x154] ss:$8 sps:$4 sm:$0xff]   ;;  %v1498_v28 = vld [vmem:[%s2079_s1 + $0x150] ss:$8 sps:$4 sm:$0xff]   ;;  %v1530_v50 = vld [vmem:[%s2079_s1 + $0x1a4] ss:$8 sps:$4 sm:$0xff]  }
  0x1f   :  { %848 = vmatpush1.bf16.msra.mxu1 %v1414_v30  ;;  %v1503_v27 = vld [vmem:[%s2079_s1 + $0x354] ss:$8 sps:$4 sm:$0xff]   ;;  %v1501_v29 = vld [vmem:[%s2079_s1 + $0x350] ss:$8 sps:$4 sm:$0xff]   ;;  %v1506_v30 = vld [vmem:[%s2079_s1 + $0x164] ss:$8 sps:$4 sm:$0xff]  }
  0x20   :  { %930 = vmatpush1.bf16.msra.mxu0 %v1415_v31  ;;  %849 = vmatprep.subr.bf16.mxu1 %v1416_v32  ;;  %v1509_v31 = vld [vmem:[%s2079_s1 + $0x364] ss:$8 sps:$4 sm:$0xff]   ;;  %v1504_v32 = vld [vmem:[%s2079_s1 + $0x160] ss:$8 sps:$4 sm:$0xff]   ;;  %v1524_v46 = vld [vmem:[%s2079_s1 + $0x194] ss:$8 sps:$4 sm:$0xff]  }
  0x21   :  { %931 = vmatprep.subr.bf16.mxu0 %v1418_v33  ;;  %v1896_v33 = vld [vmem:[%s2080_s0 + $0x8] sm:$0xff]  ;;  %v1522_v48 = vld [vmem:[%s2079_s1 + $0x190] ss:$8 sps:$4 sm:$0xff]  }
  0x22   :  { %v1531_v53 = vld [vmem:[%s2079_s1 + $0x3a0] ss:$8 sps:$4 sm:$0xff]  }
  0x23   :  { %850 = vmatpush1.bf16.msra.mxu1 %v1420_v34  ;;  %v1901_v34 = vld [vmem:[%s2080_s0 + $0x18] sm:$0xff] }
  0x24   :  { %932 = vmatpush1.bf16.msra.mxu0 %v1421_v35  ;;  %851 = vmatprep.subr.bf16.mxu1 %v1422_v36  ;;  %v1507_v35 = vld [vmem:[%s2079_s1 + $0x360] ss:$8 sps:$4 sm:$0xff]   ;;  %v1184_v36 = vcombine.high %v1896_v33, %v1896_v33 }
  0x25   :  { %933 = vmatprep.subr.bf16.mxu0 %v1424_v37  ;;  %v1188_v37 = vcombine.high %v1901_v34, %v1901_v34 }
  0x27   :  { %852 = vmatpush1.bf16.msra.mxu1 %v1426_v38  ;;  %v1512_v38 = vld [vmem:[%s2079_s1 + $0x174] ss:$8 sps:$4 sm:$0xff]  }
  0x28   :  { %934 = vmatpush1.bf16.msra.mxu0 %v1427_v39  ;;  %853 = vmatprep.subr.bf16.mxu1 %v1428_v40  ;;  %v1515_v39 = vld [vmem:[%s2079_s1 + $0x374] ss:$8 sps:$4 sm:$0xff]   ;;  %v1510_v40 = vld [vmem:[%s2079_s1 + $0x170] ss:$8 sps:$4 sm:$0xff]  }
  0x29   :  { %935 = vmatprep.subr.bf16.mxu0 %v1430_v41  ;;  %v1513_v41 = vld [vmem:[%s2079_s1 + $0x370] ss:$8 sps:$4 sm:$0xff]  }
  0x2b   :  { %854 = vmatpush1.bf16.msra.mxu1 %v1432_v42  ;;  %v1518_v42 = vld [vmem:[%s2079_s1 + $0x184] ss:$8 sps:$4 sm:$0xff]  }
  0x2c   :  { %936 = vmatpush1.bf16.msra.mxu0 %v1433_v43  ;;  %855 = vmatprep.subr.bf16.mxu1 %v1434_v44  ;;  %v1521_v43 = vld [vmem:[%s2079_s1 + $0x384] ss:$8 sps:$4 sm:$0xff]   ;;  %v1516_v44 = vld [vmem:[%s2079_s1 + $0x180] ss:$8 sps:$4 sm:$0xff]  }
  0x2d   :  { %937 = vmatprep.subr.bf16.mxu0 %v1436_v45  ;;  %v1519_v45 = vld [vmem:[%s2079_s1 + $0x380] ss:$8 sps:$4 sm:$0xff]  }
  0x2f   :  { %856 = vmatpush1.bf16.msra.mxu1 %v1438_v47  ;;  %v1527_v47 = vld [vmem:[%s2079_s1 + $0x394] ss:$8 sps:$4 sm:$0xff]  }
  0x30   :  { %938 = vmatpush1.bf16.msra.mxu0 %v1439_v49  ;;  %857 = vmatprep.subr.bf16.mxu1 %v1440_v51  ;;  %v1525_v49 = vld [vmem:[%s2079_s1 + $0x390] ss:$8 sps:$4 sm:$0xff]   ;;  %v1533_v51 = vld [vmem:[%s2079_s1 + $0x3a4] ss:$8 sps:$4 sm:$0xff]  }
  0x31   :  { %939 = vmatprep.subr.bf16.mxu0 %v1442_v52  ;;  %v1528_v52 = vld [vmem:[%s2079_s1 + $0x1a0] ss:$8 sps:$4 sm:$0xff]  }
  0x33   :  { %858 = vmatpush1.bf16.msra.mxu1 %v1444_v54  ;;  %v1536_v54 = vld [vmem:[%s2079_s1 + $0x1b4] ss:$8 sps:$4 sm:$0xff]  }
  0x34   :  { %940 = vmatpush1.bf16.msra.mxu0 %v1445_v55  ;;  %859 = vmatprep.subr.bf16.mxu1 %v1446_v56  ;;  %v1539_v55 = vld [vmem:[%s2079_s1 + $0x3b4] ss:$8 sps:$4 sm:$0xff]   ;;  %v1534_v56 = vld [vmem:[%s2079_s1 + $0x1b0] ss:$8 sps:$4 sm:$0xff]  }
  0x35   :  { %941 = vmatprep.subr.bf16.mxu0 %v1448_v57  ;;  %v1537_v57 = vld [vmem:[%s2079_s1 + $0x3b0] ss:$8 sps:$4 sm:$0xff]  }
  0x37   :  { %860 = vmatpush1.bf16.msra.mxu1 %v1450_v58  ;;  %v1542_v58 = vld [vmem:[%s2079_s1 + $0x1c4] ss:$8 sps:$4 sm:$0xff]  }
  0x38   :  { %942 = vmatpush1.bf16.msra.mxu0 %v1451_v59  ;;  %861 = vmatprep.subr.bf16.mxu1 %v1452_v60  ;;  %v1545_v59 = vld [vmem:[%s2079_s1 + $0x3c4] ss:$8 sps:$4 sm:$0xff]   ;;  %v1540_v60 = vld [vmem:[%s2079_s1 + $0x1c0] ss:$8 sps:$4 sm:$0xff]  }
  0x39   :  { %943 = vmatprep.subr.bf16.mxu0 %v1454_v61  ;;  %v1543_v61 = vld [vmem:[%s2079_s1 + $0x3c0] ss:$8 sps:$4 sm:$0xff]  }
  0x3b   :  { %862 = vmatpush1.bf16.msra.mxu1 %v1456_v62  ;;  %v1548_v62 = vld [vmem:[%s2079_s1 + $0x1d4] ss:$8 sps:$4 sm:$0xff]  }
  0x3c   :  { %944 = vmatpush1.bf16.msra.mxu0 %v1457_v63  ;;  %863 = vmatprep.subr.bf16.mxu1 %v1458_v0  ;;  %v1551_v63 = vld [vmem:[%s2079_s1 + $0x3d4] ss:$8 sps:$4 sm:$0xff]   ;;  %v1546_v0 = vld [vmem:[%s2079_s1 + $0x1d0] ss:$8 sps:$4 sm:$0xff]  }
  0x3d   :  { %945 = vmatprep.subr.bf16.mxu0 %v1460_v1  ;;  %v1549_v1 = vld [vmem:[%s2079_s1 + $0x3d0] ss:$8 sps:$4 sm:$0xff]  }
  0x3f   :  { %864 = vmatpush1.bf16.msra.mxu1 %v1462_v2  ;;  %v1554_v2 = vld [vmem:[%s2079_s1 + $0x1e4] ss:$8 sps:$4 sm:$0xff]  }
  0x40   :  { %946 = vmatpush1.bf16.msra.mxu0 %v1463_v3  ;;  %874 = vmatprep.subr.bf16.mxu1 %v1468_v4  ;;  %v1557_v3 = vld [vmem:[%s2079_s1 + $0x3e4] ss:$8 sps:$4 sm:$0xff]   ;;  %v1552_v4 = vld [vmem:[%s2079_s1 + $0x1e0] ss:$8 sps:$4 sm:$0xff]  }
  0x41   :  { %956 = vmatprep.subr.bf16.mxu0 %v1473_v5  ;;  %v1555_v5 = vld [vmem:[%s2079_s1 + $0x3e0] ss:$8 sps:$4 sm:$0xff]  }
  0x42   :  { %866 = vmatmul.mubr.bf16.vlgmr.msra.gmra.mrb[0].mxu1 %v1181_v6  ;;  %v1560_v6 = vld [vmem:[%s2079_s1 + $0x1f4] ss:$8 sps:$4 sm:$0xff]  }
  0x43   :  { %948 = vmatmul.mubr.bf16.vlgmr.msra.gmra.mrb[0].mxu0 %v1185_v7  ;;  %875 = vmatpush1.bf16.msra.mxu1 %v1466_v8  ;;  %v1563_v7 = vld [vmem:[%s2079_s1 + $0x3f4] ss:$8 sps:$4 sm:$0xff]   ;;  %v1558_v8 = vld [vmem:[%s2079_s1 + $0x1f0] ss:$8 sps:$4 sm:$0xff]  }
  0x44   :  { %957 = vmatpush1.bf16.msra.mxu0 %v1471_v9  ;;  %876 = vmatprep.subr.bf16.mxu1 %v1476_v10  ;;  %v1561_v9 = vld [vmem:[%s2079_s1 + $0x3f0] ss:$8 sps:$4 sm:$0xff]   ;;  %v1568_v10 = vld [vmem:[%s2081_s3 + $0x40] sm:$0xff]  }
  0x45   :  { %958 = vmatprep.subr.bf16.mxu0 %v1479_v11  ;;  %906 = vmatprep.mubr.bf16.mxu1 %v1184_v36  ;;  %v1183_v11 = vcombine.low %v1896_v33, %v1896_v33 }
  0x46   :  { %988 = vmatprep.mubr.bf16.mxu0 %v1188_v37 }
  0x47   :  { %877 = vmatpush1.bf16.msra.mxu1 %v1474_v12  ;;  %v1187_v12 = vcombine.low %v1901_v34, %v1901_v34 }
  0x48   :  { %959 = vmatpush1.bf16.msra.mxu0 %v1477_v13  ;;  %878 = vmatprep.subr.bf16.mxu1 %v1482_v14  ;;  %v1569_v13 = vld [vmem:[%s2081_s3] sm:$0xff]   ;;  %v1570_v14 = vld [vmem:[%s2081_s3 + $0x48] sm:$0xff]  }
  0x49   :  { %960 = vmatprep.subr.bf16.mxu0 %v1485_v15  ;;  %v1571_v15 = vld [vmem:[%s2081_s3 + $0x8] sm:$0xff]  }
  0x4b   :  { %879 = vmatpush1.bf16.msra.mxu1 %v1480_v16  ;;  %v1572_v16 = vld [vmem:[%s2081_s3 + $0x50] sm:$0xff]  }
  0x4c   :  { %961 = vmatpush1.bf16.msra.mxu0 %v1483_v17  ;;  %880 = vmatprep.subr.bf16.mxu1 %v1488_v18  ;;  %v1573_v17 = vld [vmem:[%s2081_s3 + $0x10] sm:$0xff]   ;;  %v1574_v18 = vld [vmem:[%s2081_s3 + $0x58] sm:$0xff]  }
  0x4d   :  { %962 = vmatprep.subr.bf16.mxu0 %v1491_v19  ;;  %v1575_v19 = vld [vmem:[%s2081_s3 + $0x18] sm:$0xff]  }
  0x4f   :  { %881 = vmatpush1.bf16.msra.mxu1 %v1486_v20  ;;  %v1576_v20 = vld [vmem:[%s2081_s3 + $0x60] sm:$0xff]  }
  0x50   :  { %963 = vmatpush1.bf16.msra.mxu0 %v1489_v21  ;;  %882 = vmatprep.subr.bf16.mxu1 %v1494_v22  ;;  %v1577_v21 = vld [vmem:[%s2081_s3 + $0x20] sm:$0xff]   ;;  %v1578_v22 = vld [vmem:[%s2081_s3 + $0x68] sm:$0xff]  }
  0x51   :  { %964 = vmatprep.subr.bf16.mxu0 %v1497_v23  ;;  %v1579_v23 = vld [vmem:[%s2081_s3 + $0x28] sm:$0xff]  }
  0x53   :  { %883 = vmatpush1.bf16.msra.mxu1 %v1492_v24  ;;  %v1580_v24 = vld [vmem:[%s2081_s3 + $0x70] sm:$0xff]  }
  0x54   :  { %965 = vmatpush1.bf16.msra.mxu0 %v1495_v25  ;;  %884 = vmatprep.subr.bf16.mxu1 %v1500_v26  ;;  %v1581_v25 = vld [vmem:[%s2081_s3 + $0x30] sm:$0xff]   ;;  %v1582_v26 = vld [vmem:[%s2081_s3 + $0x78] sm:$0xff]  }
  0x55   :  { %966 = vmatprep.subr.bf16.mxu0 %v1503_v27  ;;  %v1583_v27 = vld [vmem:[%s2081_s3 + $0x38] sm:$0xff]  }
  0x57   :  { %885 = vmatpush1.bf16.msra.mxu1 %v1498_v28  ;;  %v155_v28 = vlaneseq }
  0x58   :  { %967 = vmatpush1.bf16.msra.mxu0 %v1501_v29  ;;  %886 = vmatprep.subr.bf16.mxu1 %v1506_v30 }
  0x59   :  { %968 = vmatprep.subr.bf16.mxu0 %v1509_v31  ;;  %v156_v29 = vshrl.u32 %v155_v28, 7  ;;  %v153_v31 = vld [vmem:[%s2082_s2] sm:$0x3] }
  0x5b   :  { %887 = vmatpush1.bf16.msra.mxu1 %v1504_v32  ;;  %v157_v30 = vsub.s32 0, %v156_v29  ;;  %v161_v32 = vsub.s32 1, %v156_v29 }
  0x5c   :  { %969 = vmatpush1.bf16.msra.mxu0 %v1507_v35  ;;  %888 = vmatprep.subr.bf16.mxu1 %v1512_v38 }
  0x5d   :  { %970 = vmatprep.subr.bf16.mxu0 %v1515_v39  ;;  %v158_v33 = vrot.slane %v153_v31, %v157_v30  ;;  %v162_v34 = vrot.slane %v153_v31, %v161_v32 }
  0x5f   :  { %889 = vmatpush1.bf16.msra.mxu1 %v1510_v40 }
  0x60   :  { %971 = vmatpush1.bf16.msra.mxu0 %v1513_v41  ;;  %890 = vmatprep.subr.bf16.mxu1 %v1518_v42 }
  0x61   :  { %972 = vmatprep.subr.bf16.mxu0 %v1521_v43 }
  0x63   :  { %891 = vmatpush1.bf16.msra.mxu1 %v1516_v44 }
  0x64   :  { %973 = vmatpush1.bf16.msra.mxu0 %v1519_v45  ;;  %892 = vmatprep.subr.bf16.mxu1 %v1524_v46 }
  0x65   :  { %974 = vmatprep.subr.bf16.mxu0 %v1527_v47 }
  0x67   :  { %893 = vmatpush1.bf16.msra.mxu1 %v1522_v48 }
  0x68   :  { %975 = vmatpush1.bf16.msra.mxu0 %v1525_v49  ;;  %894 = vmatprep.subr.bf16.mxu1 %v1530_v50 }
  0x69   :  { %976 = vmatprep.subr.bf16.mxu0 %v1533_v51 }
  0x6b   :  { %895 = vmatpush1.bf16.msra.mxu1 %v1528_v52  ;;  %v1317_v52 = vld [vmem:[%s2083_s4] ss:$0 sm:$0xff] }
  0x6c   :  { %977 = vmatpush1.bf16.msra.mxu0 %v1531_v53  ;;  %896 = vmatprep.subr.bf16.mxu1 %v1536_v54 }
  0x6d   :  { %978 = vmatprep.subr.bf16.mxu0 %v1539_v55 }
  0x6f   :  { %897 = vmatpush1.bf16.msra.mxu1 %v1534_v56 }
  0x70   :  { %979 = vmatpush1.bf16.msra.mxu0 %v1537_v57  ;;  %898 = vmatprep.subr.bf16.mxu1 %v1542_v58 }
  0x71   :  { %980 = vmatprep.subr.bf16.mxu0 %v1545_v59 }
  0x73   :  { %899 = vmatpush1.bf16.msra.mxu1 %v1540_v60 }
  0x74   :  { %981 = vmatpush1.bf16.msra.mxu0 %v1543_v61  ;;  %900 = vmatprep.subr.bf16.mxu1 %v1548_v62 }
  0x75   :  { %982 = vmatprep.subr.bf16.mxu0 %v1551_v63 }
  0x77   :  { %901 = vmatpush1.bf16.msra.mxu1 %v1546_v0 }
  0x78   :  { %983 = vmatpush1.bf16.msra.mxu0 %v1549_v1  ;;  %902 = vmatprep.subr.bf16.mxu1 %v1554_v2 }
  0x79   :  { %984 = vmatprep.subr.bf16.mxu0 %v1557_v3 }
  0x7b   :  { %903 = vmatpush1.bf16.msra.mxu1 %v1552_v4 }
  0x7c   :  { %985 = vmatpush1.bf16.msra.mxu0 %v1555_v5  ;;  %904 = vmatprep.subr.bf16.mxu1 %v1560_v6 }
  0x7d   :  { %986 = vmatprep.subr.bf16.mxu0 %v1563_v7 }
  0x7f   :  { %905 = vmatpush1.bf16.msra.mxu1 %v1558_v8 }
  0x80   :  { %987 = vmatpush1.bf16.msra.mxu0 %v1561_v9  ;;  %1334 = vmatprep.subr.bf16.mxu1 %v1568_v10 }
  0x82   :  { %907 = vmatmul.mubr.bf16.vlgmr.msra.gmra.mrb[0].mxu1 %v1183_v11 }
  0x83   :  { %989 = vmatmul.mubr.bf16.vlgmr.msra.gmra.mrb[0].mxu0 %v1187_v12  ;;  %1335 = vmatpush3.bf16.msra.mxu1 %v1569_v13 }
  0x84   :  { %1336 = vmatprep.subr.bf16.mxu1 %v1570_v14 }
  0x87   :  { %1337 = vmatpush3.bf16.msra.mxu1 %v1571_v15 }
  0x88   :  { %1338 = vmatprep.subr.bf16.mxu1 %v1572_v16 }
  0x8b   :  { %1339 = vmatpush3.bf16.msra.mxu1 %v1573_v17 }
  0x8c   :  { %1340 = vmatprep.subr.bf16.mxu1 %v1574_v18 }
  0x8f   :  { %1341 = vmatpush3.bf16.msra.mxu1 %v1575_v19 }
  0x90   :  { %1342 = vmatprep.subr.bf16.mxu1 %v1576_v20 }
  0x93   :  { %1343 = vmatpush3.bf16.msra.mxu1 %v1577_v21 }
  0x94   :  { %1344 = vmatprep.subr.bf16.mxu1 %v1578_v22 }
  0x97   :  { %1345 = vmatpush3.bf16.msra.mxu1 %v1579_v23 }
  0x98   :  { %1346 = vmatprep.subr.bf16.mxu1 %v1580_v24 }
  0x9b   :  { %1347 = vmatpush3.bf16.msra.mxu1 %v1581_v25 }
  0x9c   :  { %1348 = vmatprep.subr.bf16.mxu1 %v1582_v26 }
  0x9f   :  { %1349 = vmatpush3.bf16.msra.mxu1 %v1583_v27 }
 0x155   :  { %v908_v35 = vpop.f32.mrb[0].mxu1 }
 0x156   :  { %v990_v36 = vpop.f32.mrb[0].mxu0  ;;  %v1356_v37 = vadd.f32 %v908_v35, %v158_v33  ;;  %v910_v38 = vpop.f32.mrb[1].mxu1 }
 0x157   :  { %v992_v39 = vpop.f32.mrb[1].mxu0  ;;  %v1358_v40 = vadd.f32 %v910_v38, %v162_v34  ;;  %v912_v41 = vpop.f32.mrb[2].mxu1 }
 0x158   :  { %v994_v42 = vpop.f32.mrb[2].mxu0  ;;  %v1357_v43 = vadd.f32 %v1356_v37, %v990_v36  ;;  %v913_v44 = vpop.f32.mrb[3].mxu1 }
 0x159   :  { %v995_v45 = vpop.f32.mrb[3].mxu0  ;;  %v1359_v46 = vadd.f32 %v1358_v40, %v992_v39 }
 0x15a   :  { %v997_v47 = vmax.f32 %v1357_v43, 0.0 }
 0x15b   :  { %v998_v48 = vmax.f32 %v1359_v46, 0.0 }
 0x15c   :  { %v999_v50 = vpack.c.bf16 %v997_v47, %v997_v47 }
 0x15d   :  { %v1000_v49 = vpack.c.bf16 %v998_v48, %v998_v48 }
 0x15f   :  { %1168 = vmatprep.mubr.bf16.mxu1 %v1000_v49 }
 0x160   :  { %1169 = vmatmul.mubr.bf16.vlgmr.msra.gmra.mrb[4].mxu1 %v999_v50 }
 0x233   :  { %v1350_v51 = vpop.f32.mrb[4].mxu1 }
 0x234   :  { %v1351_v53 = vpop.f32.mrb[5].mxu1 }
 0x235   :  { %v1352_v54 = vadd.f32 %v1351_v53, %v1350_v51  ;;  %v1353_v55 = vpop.f32.mrb[6].mxu1 }
 0x236   :  { %v1354_v56 = vpop.f32.mrb[7].mxu1 }
 0x237   :  { %v1171_v57 = vadd.f32 %v1352_v54, %v1317_v52 }
 0x239   :  { %1176 = vst [vmem:[%s2084_s5] sm:$0xff] %v1171_v57 }

</bundles_post_ra>
